<compile_context>
chip_gen: v7x
topology: tpu7x:2x2x1
jax: 0.10.0
libtpu: 0.0.40
codegen_flags: <defaults>
</compile_context>

<pallas_src>
from functools import partial

import jax
import jax.numpy as jnp
from jax.experimental import pallas as pl
from jax.experimental.pallas import tpu as pltpu

LANE = 128        # padded feature width (f_in=4, hidden=16, out=2 all pad to one lane tile)
NODE_ALIGN = 512  # node-count padding so >=512 adjacency tiles always divide


def _round_up(n, m):
    return -(-n // m) * m


def _vmem_usable_bytes():
    phys = 64 << 20                      # conservative default (v7x physical per TC)
    try:
        info = pltpu.get_tpu_info()
        phys = int(getattr(info, "vmem_capacity_bytes", phys))
    except Exception:
        pass
    return int(phys * 0.8)               # headroom for compiler scratch / semaphores


def _vmem_estimate(np_, tm, tk, out_itemsize):
    return (2 * tm * tk * 2              # adjacency tiles (bf16, double-buffered)
            + 2 * np_ * LANE * 2         # resident feature matrix (bf16), 2x conservative
            + 2 * 2 * LANE * LANE * 4    # W_rel + W_root (f32, resident)
            + 2 * LANE * 4               # bias
            + 2 * tm * LANE * out_itemsize  # output tiles
            + tm * LANE * 4)             # f32 accumulator scratch


def _pick_tiles(np_, out_itemsize, vmem_usable):
    for tm in (1024, 512):               # prefer big dst tiles (fewer epilogues)
        if np_ % tm:
            continue
        for tk in (1024, 512):           # prefer long contiguous adjacency DMA runs
            if np_ % tk:
                continue
            need = _vmem_estimate(np_, tm, tk, out_itemsize)
            if need <= vmem_usable:
                return tm, tk, need
    need = _vmem_estimate(np_, NODE_ALIGN, NODE_ALIGN, out_itemsize)
    if need > vmem_usable:
        # TODO(synk): fall back to a streamed-feature / sparse CSR kernel here.
        raise ValueError(
            f"padded graph ({np_} nodes) exceeds VMEM budget "
            f"({need} > {vmem_usable} bytes) of the dense GraphConv kernel")
    return NODE_ALIGN, NODE_ALIGN, need


def _graphconv_kernel(adj_ref, feat_ref, wrel_ref, wroot_ref, b_ref,
                      o_ref, acc_ref, *, tm, tk, apply_relu):
    # adj_ref : (tm, tk)   bf16  adjacency tile A[dst tile i, src tile k]
    # feat_ref: (NP, 128)  bf16  VMEM-resident, lane-padded node features
    # wrel/wroot: (128,128) f32  padded layer weights (resident)
    # b_ref  : (1, 128)    f32
    # acc_ref: (tm, 128)   f32   accumulator scratch
    i = pl.program_id(0)              # dst-row tile        ("parallel")
    k = pl.program_id(1)              # src / reduction tile ("arbitrary", last)
    nk = pl.num_programs(1)

    @pl.when(k == 0)
    def _():
        acc_ref[...] = jnp.zeros_like(acc_ref)

    # bf16 x bf16 MXU matmul, f32 accumulation:  acc += A[i, k] @ feat[k]
    ks = pl.multiple_of(k * tk, tk)
    acc_ref[...] += jnp.dot(adj_ref[...], feat_ref[pl.ds(ks, tk), :],
                            preferred_element_type=jnp.float32)

    @pl.when(k == nk - 1)
    def _():
        # Epilogue, once per dst tile:
        #   out = (A @ feat) @ W_rel + feat_i @ W_root + b   [+ relu]
        rs = pl.multiple_of(i * tm, tm)
        agg = jnp.dot(acc_ref[...], wrel_ref[...],
                      preferred_element_type=jnp.float32)
        root = jnp.dot(feat_ref[pl.ds(rs, tm), :].astype(jnp.float32),
                       wroot_ref[...], preferred_element_type=jnp.float32)
        out = agg + root + b_ref[...]
        if apply_relu:
            out = jnp.maximum(out, 0.0)
        o_ref[...] = out.astype(o_ref.dtype)


def graphconv_layer(adj_bf16, feat_p, w_rel, w_root, b, *, apply_relu, out_dtype):
    """One GraphConv layer: relu?((A @ feat) @ W_rel + feat @ W_root + b)."""
    np_ = adj_bf16.shape[0]
    fin, fout = w_rel.shape
    wrel_p = jnp.zeros((LANE, LANE), jnp.float32).at[:fin, :fout].set(w_rel)
    wroot_p = jnp.zeros((LANE, LANE), jnp.float32).at[:fin, :fout].set(w_root)
    b_p = jnp.zeros((1, LANE), jnp.float32).at[0, :fout].set(b)

    out_itemsize = jnp.dtype(out_dtype).itemsize
    usable = _vmem_usable_bytes()
    tm, tk, need = _pick_tiles(np_, out_itemsize, usable)
    vmem_limit = int(min(usable, max(int(1.5 * need), 32 << 20)))

    return pl.pallas_call(
        partial(_graphconv_kernel, tm=tm, tk=tk, apply_relu=apply_relu),
        out_shape=jax.ShapeDtypeStruct((np_, LANE), out_dtype),
        grid=(np_ // tm, np_ // tk),
        in_specs=[
            pl.BlockSpec((tm, tk), lambda i, k: (i, k)),       # adjacency tile
            pl.BlockSpec((np_, LANE), lambda i, k: (0, 0)),    # features, VMEM-resident
            pl.BlockSpec((LANE, LANE), lambda i, k: (0, 0)),   # W_rel (resident)
            pl.BlockSpec((LANE, LANE), lambda i, k: (0, 0)),   # W_root (resident)
            pl.BlockSpec((1, LANE), lambda i, k: (0, 0)),      # bias (resident)
        ],
        out_specs=pl.BlockSpec((tm, LANE), lambda i, k: (i, 0)),
        scratch_shapes=[pltpu.VMEM((tm, LANE), jnp.float32)],
        compiler_params=pltpu.CompilerParams(
            dimension_semantics=("parallel", "arbitrary"),
            vmem_limit_bytes=vmem_limit),
    )(adj_bf16, feat_p, wrel_p, wroot_p, b_p)


def build_padded_adjacency(edge_index, padded_nodes):
    """A[dst, src] = edge multiplicity, padded & stored bf16 (counts exact to 256)."""
    src, dst = edge_index[0], edge_index[1]
    adj = jnp.zeros((padded_nodes, padded_nodes), jnp.float32)
    adj = adj.at[dst, src].add(1.0)       # build counts in f32, then narrow
    return adj.astype(jnp.bfloat16)


def model_forward(params, x, edge_index):
    n, f_in = x.shape
    np_ = max(NODE_ALIGN, _round_up(n, NODE_ALIGN))
    adj = build_padded_adjacency(edge_index, np_)

    feat0 = jnp.zeros((np_, LANE), jnp.bfloat16).at[:n, :f_in].set(
        x.astype(jnp.bfloat16))

    h = graphconv_layer(adj, feat0, params["w_rel1"], params["w_root1"],
                        params["b1"], apply_relu=True, out_dtype=jnp.bfloat16)
    out = graphconv_layer(adj, h, params["w_rel2"], params["w_root2"],
                          params["b2"], apply_relu=False, out_dtype=jnp.float32)
    f_out = params["w_rel2"].shape[1]
    return out[:n, :f_out]


def init_params(key, f_in, hidden, f_out):
    ks = jax.random.split(key, 6)
    s1 = 1.0 / jnp.sqrt(f_in)
    s2 = 1.0 / jnp.sqrt(hidden)
    return {
        "w_rel1": jax.random.uniform(ks[0], (f_in, hidden), jnp.float32, -s1, s1),
        "w_root1": jax.random.uniform(ks[1], (f_in, hidden), jnp.float32, -s1, s1),
        "b1": jax.random.uniform(ks[2], (hidden,), jnp.float32, -s1, s1),
        "w_rel2": jax.random.uniform(ks[3], (hidden, f_out), jnp.float32, -s2, s2),
        "w_root2": jax.random.uniform(ks[4], (hidden, f_out), jnp.float32, -s2, s2),
        "b2": jax.random.uniform(ks[5], (f_out,), jnp.float32, -s2, s2),
    }


def _dense_adj(edge_index, n):
    src, dst = edge_index[0], edge_index[1]
    return jnp.zeros((n, n), jnp.float32).at[dst, src].add(1.0)


def _reference_forward(params, x, edge_index):
    """Pure f32 GraphConv x2 reference."""
    n = x.shape[0]
    adj = _dense_adj(edge_index, n)
    hp = "highest"
    h = (jnp.dot(jnp.dot(adj, x, precision=hp), params["w_rel1"], precision=hp)
         + jnp.dot(x, params["w_root1"], precision=hp) + params["b1"])
    h = jnp.maximum(h, 0.0)
    return (jnp.dot(jnp.dot(adj, h, precision=hp), params["w_rel2"], precision=hp)
            + jnp.dot(h, params["w_root2"], precision=hp) + params["b2"])


def _quantized_reference(params, x, edge_index):
    """Same math as the kernel (bf16 features, f32 accumulation)."""
    n = x.shape[0]
    adj = _dense_adj(edge_index, n)
    hp = "highest"
    xq = x.astype(jnp.bfloat16).astype(jnp.float32)
    h = (jnp.dot(jnp.dot(adj, xq, precision=hp), params["w_rel1"], precision=hp)
         + jnp.dot(xq, params["w_root1"], precision=hp) + params["b1"])
    h = jnp.maximum(h, 0.0)
    hq = h.astype(jnp.bfloat16).astype(jnp.float32)
    return (jnp.dot(jnp.dot(adj, hq, precision=hp), params["w_rel2"], precision=hp)
            + jnp.dot(hq, params["w_root2"], precision=hp) + params["b2"])


if __name__ == "__main__":
    key = jax.random.PRNGKey(0)
    k_x, k_e, k_p = jax.random.split(key, 3)

    N, F_IN, HIDDEN, F_OUT, E = 8, 4, 16, 2, 16

    x = jax.random.normal(k_x, (N, F_IN), jnp.float32)
    edge_index = jax.random.randint(k_e, (2, E), 0, N, jnp.int32)
    params = init_params(k_p, F_IN, HIDDEN, F_OUT)

    fwd = jax.jit(model_forward)
    out = jax.block_until_ready(fwd(params, x, edge_index))
    assert out.shape == (N, F_OUT)

    ref_q = _quantized_reference(params, x, edge_index)   # matches kernel math
    ref_f = _reference_forward(params, x, edge_index)     # pure f32 semantics
    err_q = float(jnp.max(jnp.abs(out - ref_q)))
    err_f = float(jnp.max(jnp.abs(out - ref_f)))
    assert jnp.allclose(out, ref_q, atol=1e-2, rtol=1e-2), err_q
    assert jnp.allclose(out, ref_f, atol=5e-2, rtol=5e-2), err_f

    print("KERNEL_OK")
</pallas_src>

<mosaic_0001>
module attributes {stable_mosaic.version = 11 : i64} {
  func.func private @main(%arg0: i32) attributes {dimension_semantics = [#tpu.dimension_semantics<core_parallel>], iteration_bounds = array<i64: 2>, tpu.core_type = #tpu.core_type<sc_scalar_subcore>, window_params = []} {
    return
  }
}

module attributes {stable_mosaic.version = 11 : i64} {
  func.func private @main(%arg0: i32) attributes {dimension_semantics = [#tpu.dimension_semantics<core_parallel>], iteration_bounds = array<i64: 2>, tpu.core_type = #tpu.core_type<sc_scalar_subcore>, window_params = []} {
    return
  }
}

module attributes {stable_mosaic.version = 11 : i64} {
  func.func @_graphconv_kernel(%arg0: i32, %arg1: i32, %arg2: memref<512x512xbf16, #tpu.memory_space<vmem>>, %arg3: memref<512x128xbf16, #tpu.memory_space<vmem>>, %arg4: memref<128x128xf32, #tpu.memory_space<vmem>>, %arg5: memref<128x128xf32, #tpu.memory_space<vmem>>, %arg6: memref<1x128xf32, #tpu.memory_space<vmem>>, %arg7: memref<512x128xbf16, #tpu.memory_space<vmem>>, %arg8: memref<512x128xf32, #tpu.memory_space<vmem>>) attributes {dimension_semantics = [#tpu.dimension_semantics<parallel>, #tpu.dimension_semantics<arbitrary>], iteration_bounds = array<i64: 1, 1>, scalar_prefetch = 0 : i64, scratch_operands = 1 : i64, tpu.core_type = #tpu.core_type<tc>, window_params = [{transform_indices = @transform_0, window_bounds = array<i64: 512, 512>}, {pipeline_mode = #tpu.pipeline_mode<synchronous>, transform_indices = @transform_1, window_bounds = array<i64: 512, 128>}, {pipeline_mode = #tpu.pipeline_mode<synchronous>, transform_indices = @transform_2, window_bounds = array<i64: 128, 128>}, {pipeline_mode = #tpu.pipeline_mode<synchronous>, transform_indices = @transform_3, window_bounds = array<i64: 128, 128>}, {pipeline_mode = #tpu.pipeline_mode<synchronous>, transform_indices = @transform_4, window_bounds = array<i64: 1, 128>}, {transform_indices = @transform_5, window_bounds = array<i64: 512, 128>}]} {
    %c0_i32 = arith.constant 0 : i32
    %0 = arith.cmpi eq, %arg1, %c0_i32 : i32
    %1 = arith.extui %0 : i1 to i32
    %c0_i32_0 = arith.constant 0 : i32
    %2 = arith.cmpi ne, %1, %c0_i32_0 : i32
    scf.if %2 {
      %cst_9 = arith.constant 0.000000e+00 : f32
      %15 = vector.broadcast %cst_9 : f32 to vector<512x128xf32>
      %c0_10 = arith.constant 0 : index
      %c0_11 = arith.constant 0 : index
      %16 = vector.load %arg8[%c0_10, %c0_11] : memref<512x128xf32, #tpu.memory_space<vmem>>, vector<512x128xf32>
      tpu.vector_store %arg8[%c0_10, %c0_11], %15 {strides = array<i32>} : memref<512x128xf32, #tpu.memory_space<vmem>>, vector<512x128xf32>,
    } else {
    }
    %c512_i32 = arith.constant 512 : i32
    %3 = arith.muli %arg1, %c512_i32 : i32
    %4 = tpu.assume_multiple %3, 512 : i32
    %c0 = arith.constant 0 : index
    %c0_1 = arith.constant 0 : index
    %5 = vector.load %arg8[%c0, %c0_1] : memref<512x128xf32, #tpu.memory_space<vmem>>, vector<512x128xf32>
    %c0_2 = arith.constant 0 : index
    %c0_3 = arith.constant 0 : index
    %6 = vector.load %arg2[%c0_2, %c0_3] : memref<512x512xbf16, #tpu.memory_space<vmem>>, vector<512x512xbf16>
    %7 = arith.index_cast %4 : i32 to index
    %c0_4 = arith.constant 0 : index
    %8 = vector.load %arg3[%7, %c0_4] : memref<512x128xbf16, #tpu.memory_space<vmem>>, vector<512x128xbf16>
    %cst = arith.constant dense<0.000000e+00> : vector<512x128xf32>
    %9 = tpu.matmul %6, %8, %cst {dimension_numbers = #tpu.dot_dimension_numbers<[1], [0], [0], [1], [0, 0, 1, 1], [], []>} : vector<512x512xbf16>, vector<512x128xbf16>, vector<512x128xf32> -> vector<512x128xf32>
    %10 = arith.addf %5, %9 : vector<512x128xf32>
    %c0_5 = arith.constant 0 : index
    %c0_6 = arith.constant 0 : index
    %11 = vector.load %arg8[%c0_5, %c0_6] : memref<512x128xf32, #tpu.memory_space<vmem>>, vector<512x128xf32>
    tpu.vector_store %arg8[%c0_5, %c0_6], %10 {strides = array<i32>} : memref<512x128xf32, #tpu.memory_space<vmem>>, vector<512x128xf32>,
    %c0_i32_7 = arith.constant 0 : i32
    %12 = arith.cmpi eq, %arg1, %c0_i32_7 : i32
    %13 = arith.extui %12 : i1 to i32
    %c0_i32_8 = arith.constant 0 : i32
    %14 = arith.cmpi ne, %13, %c0_i32_8 : i32
    scf.if %14 {
      %c512_i32_9 = arith.constant 512 : i32
      %15 = arith.muli %arg0, %c512_i32_9 : i32
      %16 = tpu.assume_multiple %15, 512 : i32
      %c0_10 = arith.constant 0 : index
      %c0_11 = arith.constant 0 : index
      %17 = vector.load %arg8[%c0_10, %c0_11] : memref<512x128xf32, #tpu.memory_space<vmem>>, vector<512x128xf32>
      %c0_12 = arith.constant 0 : index
      %c0_13 = arith.constant 0 : index
      %18 = vector.load %arg4[%c0_12, %c0_13] : memref<128x128xf32, #tpu.memory_space<vmem>>, vector<128x128xf32>
      %cst_14 = arith.constant dense<0.000000e+00> : vector<512x128xf32>
      %19 = tpu.matmul %17, %18, %cst_14 {dimension_numbers = #tpu.dot_dimension_numbers<[1], [0], [0], [1], [0, 0, 1, 1], [], []>} : vector<512x128xf32>, vector<128x128xf32>, vector<512x128xf32> -> vector<512x128xf32>
      %20 = arith.index_cast %16 : i32 to index
      %c0_15 = arith.constant 0 : index
      %21 = vector.load %arg3[%20, %c0_15] : memref<512x128xbf16, #tpu.memory_space<vmem>>, vector<512x128xbf16>
      %22 = arith.extf %21 : vector<512x128xbf16> to vector<512x128xf32>
      %c0_16 = arith.constant 0 : index
      %c0_17 = arith.constant 0 : index
      %23 = vector.load %arg5[%c0_16, %c0_17] : memref<128x128xf32, #tpu.memory_space<vmem>>, vector<128x128xf32>
      %cst_18 = arith.constant dense<0.000000e+00> : vector<512x128xf32>
      %24 = tpu.matmul %22, %23, %cst_18 {dimension_numbers = #tpu.dot_dimension_numbers<[1], [0], [0], [1], [0, 0, 1, 1], [], []>} : vector<512x128xf32>, vector<128x128xf32>, vector<512x128xf32> -> vector<512x128xf32>
      %25 = arith.addf %19, %24 : vector<512x128xf32>
      %c0_19 = arith.constant 0 : index
      %c0_20 = arith.constant 0 : index
      %26 = vector.load %arg6[%c0_19, %c0_20] : memref<1x128xf32, #tpu.memory_space<vmem>>, vector<1x128xf32>
      %27 = vector.broadcast %26 : vector<1x128xf32> to vector<512x128xf32>
      %28 = arith.addf %25, %27 : vector<512x128xf32>
      %cst_21 = arith.constant 0.000000e+00 : f32
      %29 = vector.broadcast %cst_21 : f32 to vector<512x128xf32>
      %30 = arith.maximumf %28, %29 : vector<512x128xf32>
      %31 = arith.truncf %30 : vector<512x128xf32> to vector<512x128xbf16>
      %c0_22 = arith.constant 0 : index
      %c0_23 = arith.constant 0 : index
      %32 = vector.load %arg7[%c0_22, %c0_23] : memref<512x128xbf16, #tpu.memory_space<vmem>>, vector<512x128xbf16>
      tpu.vector_store %arg7[%c0_22, %c0_23], %31 {strides = array<i32>} : memref<512x128xbf16, #tpu.memory_space<vmem>>, vector<512x128xbf16>,
    } else {
    }
    return
  }
  func.func @transform_0(%arg0: i32, %arg1: i32) -> (i32, i32) {
    %c0_i32 = arith.constant 0 : i32
    return %arg0, %arg1 : i32, i32
  }
  func.func @transform_1(%arg0: i32, %arg1: i32) -> (i32, i32) {
    %c0_i32 = arith.constant 0 : i32
    %c0_i32_0 = arith.constant 0 : i32
    %c0_i32_1 = arith.constant 0 : i32
    return %c0_i32, %c0_i32_0 : i32, i32
  }
  func.func @transform_2(%arg0: i32, %arg1: i32) -> (i32, i32) {
    %c0_i32 = arith.constant 0 : i32
    %c0_i32_0 = arith.constant 0 : i32
    %c0_i32_1 = arith.constant 0 : i32
    return %c0_i32, %c0_i32_0 : i32, i32
  }
  func.func @transform_3(%arg0: i32, %arg1: i32) -> (i32, i32) {
    %c0_i32 = arith.constant 0 : i32
    %c0_i32_0 = arith.constant 0 : i32
    %c0_i32_1 = arith.constant 0 : i32
    return %c0_i32, %c0_i32_0 : i32, i32
  }
  func.func @transform_4(%arg0: i32, %arg1: i32) -> (i32, i32) {
    %c0_i32 = arith.constant 0 : i32
    %c0_i32_0 = arith.constant 0 : i32
    %c0_i32_1 = arith.constant 0 : i32
    return %c0_i32, %c0_i32_0 : i32, i32
  }
  func.func @transform_5(%arg0: i32, %arg1: i32) -> (i32, i32) {
    %c0_i32 = arith.constant 0 : i32
    %c0_i32_0 = arith.constant 0 : i32
    return %arg0, %c0_i32 : i32, i32
  }
}

module attributes {stable_mosaic.version = 11 : i64} {
  func.func @_graphconv_kernel(%arg0: i32, %arg1: i32, %arg2: memref<512x512xbf16, #tpu.memory_space<vmem>>, %arg3: memref<512x128xbf16, #tpu.memory_space<vmem>>, %arg4: memref<128x128xf32, #tpu.memory_space<vmem>>, %arg5: memref<128x128xf32, #tpu.memory_space<vmem>>, %arg6: memref<1x128xf32, #tpu.memory_space<vmem>>, %arg7: memref<512x128xf32, #tpu.memory_space<vmem>>, %arg8: memref<512x128xf32, #tpu.memory_space<vmem>>) attributes {dimension_semantics = [#tpu.dimension_semantics<parallel>, #tpu.dimension_semantics<arbitrary>], iteration_bounds = array<i64: 1, 1>, scalar_prefetch = 0 : i64, scratch_operands = 1 : i64, tpu.core_type = #tpu.core_type<tc>, window_params = [{transform_indices = @transform_0, window_bounds = array<i64: 512, 512>}, {pipeline_mode = #tpu.pipeline_mode<synchronous>, transform_indices = @transform_1, window_bounds = array<i64: 512, 128>}, {pipeline_mode = #tpu.pipeline_mode<synchronous>, transform_indices = @transform_2, window_bounds = array<i64: 128, 128>}, {pipeline_mode = #tpu.pipeline_mode<synchronous>, transform_indices = @transform_3, window_bounds = array<i64: 128, 128>}, {pipeline_mode = #tpu.pipeline_mode<synchronous>, transform_indices = @transform_4, window_bounds = array<i64: 1, 128>}, {transform_indices = @transform_5, window_bounds = array<i64: 512, 128>}]} {
    %c0_i32 = arith.constant 0 : i32
    %0 = arith.cmpi eq, %arg1, %c0_i32 : i32
    %1 = arith.extui %0 : i1 to i32
    %c0_i32_0 = arith.constant 0 : i32
    %2 = arith.cmpi ne, %1, %c0_i32_0 : i32
    scf.if %2 {
      %cst_9 = arith.constant 0.000000e+00 : f32
      %15 = vector.broadcast %cst_9 : f32 to vector<512x128xf32>
      %c0_10 = arith.constant 0 : index
      %c0_11 = arith.constant 0 : index
      %16 = vector.load %arg8[%c0_10, %c0_11] : memref<512x128xf32, #tpu.memory_space<vmem>>, vector<512x128xf32>
      tpu.vector_store %arg8[%c0_10, %c0_11], %15 {strides = array<i32>} : memref<512x128xf32, #tpu.memory_space<vmem>>, vector<512x128xf32>,
    } else {
    }
    %c512_i32 = arith.constant 512 : i32
    %3 = arith.muli %arg1, %c512_i32 : i32
    %4 = tpu.assume_multiple %3, 512 : i32
    %c0 = arith.constant 0 : index
    %c0_1 = arith.constant 0 : index
    %5 = vector.load %arg8[%c0, %c0_1] : memref<512x128xf32, #tpu.memory_space<vmem>>, vector<512x128xf32>
    %c0_2 = arith.constant 0 : index
    %c0_3 = arith.constant 0 : index
    %6 = vector.load %arg2[%c0_2, %c0_3] : memref<512x512xbf16, #tpu.memory_space<vmem>>, vector<512x512xbf16>
    %7 = arith.index_cast %4 : i32 to index
    %c0_4 = arith.constant 0 : index
    %8 = vector.load %arg3[%7, %c0_4] : memref<512x128xbf16, #tpu.memory_space<vmem>>, vector<512x128xbf16>
    %cst = arith.constant dense<0.000000e+00> : vector<512x128xf32>
    %9 = tpu.matmul %6, %8, %cst {dimension_numbers = #tpu.dot_dimension_numbers<[1], [0], [0], [1], [0, 0, 1, 1], [], []>} : vector<512x512xbf16>, vector<512x128xbf16>, vector<512x128xf32> -> vector<512x128xf32>
    %10 = arith.addf %5, %9 : vector<512x128xf32>
    %c0_5 = arith.constant 0 : index
    %c0_6 = arith.constant 0 : index
    %11 = vector.load %arg8[%c0_5, %c0_6] : memref<512x128xf32, #tpu.memory_space<vmem>>, vector<512x128xf32>
    tpu.vector_store %arg8[%c0_5, %c0_6], %10 {strides = array<i32>} : memref<512x128xf32, #tpu.memory_space<vmem>>, vector<512x128xf32>,
    %c0_i32_7 = arith.constant 0 : i32
    %12 = arith.cmpi eq, %arg1, %c0_i32_7 : i32
    %13 = arith.extui %12 : i1 to i32
    %c0_i32_8 = arith.constant 0 : i32
    %14 = arith.cmpi ne, %13, %c0_i32_8 : i32
    scf.if %14 {
      %c512_i32_9 = arith.constant 512 : i32
      %15 = arith.muli %arg0, %c512_i32_9 : i32
      %16 = tpu.assume_multiple %15, 512 : i32
      %c0_10 = arith.constant 0 : index
      %c0_11 = arith.constant 0 : index
      %17 = vector.load %arg8[%c0_10, %c0_11] : memref<512x128xf32, #tpu.memory_space<vmem>>, vector<512x128xf32>
      %c0_12 = arith.constant 0 : index
      %c0_13 = arith.constant 0 : index
      %18 = vector.load %arg4[%c0_12, %c0_13] : memref<128x128xf32, #tpu.memory_space<vmem>>, vector<128x128xf32>
      %cst_14 = arith.constant dense<0.000000e+00> : vector<512x128xf32>
      %19 = tpu.matmul %17, %18, %cst_14 {dimension_numbers = #tpu.dot_dimension_numbers<[1], [0], [0], [1], [0, 0, 1, 1], [], []>} : vector<512x128xf32>, vector<128x128xf32>, vector<512x128xf32> -> vector<512x128xf32>
      %20 = arith.index_cast %16 : i32 to index
      %c0_15 = arith.constant 0 : index
      %21 = vector.load %arg3[%20, %c0_15] : memref<512x128xbf16, #tpu.memory_space<vmem>>, vector<512x128xbf16>
      %22 = arith.extf %21 : vector<512x128xbf16> to vector<512x128xf32>
      %c0_16 = arith.constant 0 : index
      %c0_17 = arith.constant 0 : index
      %23 = vector.load %arg5[%c0_16, %c0_17] : memref<128x128xf32, #tpu.memory_space<vmem>>, vector<128x128xf32>
      %cst_18 = arith.constant dense<0.000000e+00> : vector<512x128xf32>
      %24 = tpu.matmul %22, %23, %cst_18 {dimension_numbers = #tpu.dot_dimension_numbers<[1], [0], [0], [1], [0, 0, 1, 1], [], []>} : vector<512x128xf32>, vector<128x128xf32>, vector<512x128xf32> -> vector<512x128xf32>
      %25 = arith.addf %19, %24 : vector<512x128xf32>
      %c0_19 = arith.constant 0 : index
      %c0_20 = arith.constant 0 : index
      %26 = vector.load %arg6[%c0_19, %c0_20] : memref<1x128xf32, #tpu.memory_space<vmem>>, vector<1x128xf32>
      %27 = vector.broadcast %26 : vector<1x128xf32> to vector<512x128xf32>
      %28 = arith.addf %25, %27 : vector<512x128xf32>
      %c0_21 = arith.constant 0 : index
      %c0_22 = arith.constant 0 : index
      %29 = vector.load %arg7[%c0_21, %c0_22] : memref<512x128xf32, #tpu.memory_space<vmem>>, vector<512x128xf32>
      tpu.vector_store %arg7[%c0_21, %c0_22], %28 {strides = array<i32>} : memref<512x128xf32, #tpu.memory_space<vmem>>, vector<512x128xf32>,
    } else {
    }
    return
  }
  func.func @transform_0(%arg0: i32, %arg1: i32) -> (i32, i32) {
    %c0_i32 = arith.constant 0 : i32
    return %arg0, %arg1 : i32, i32
  }
  func.func @transform_1(%arg0: i32, %arg1: i32) -> (i32, i32) {
    %c0_i32 = arith.constant 0 : i32
    %c0_i32_0 = arith.constant 0 : i32
    %c0_i32_1 = arith.constant 0 : i32
    return %c0_i32, %c0_i32_0 : i32, i32
  }
  func.func @transform_2(%arg0: i32, %arg1: i32) -> (i32, i32) {
    %c0_i32 = arith.constant 0 : i32
    %c0_i32_0 = arith.constant 0 : i32
    %c0_i32_1 = arith.constant 0 : i32
    return %c0_i32, %c0_i32_0 : i32, i32
  }
  func.func @transform_3(%arg0: i32, %arg1: i32) -> (i32, i32) {
    %c0_i32 = arith.constant 0 : i32
    %c0_i32_0 = arith.constant 0 : i32
    %c0_i32_1 = arith.constant 0 : i32
    return %c0_i32, %c0_i32_0 : i32, i32
  }
  func.func @transform_4(%arg0: i32, %arg1: i32) -> (i32, i32) {
    %c0_i32 = arith.constant 0 : i32
    %c0_i32_0 = arith.constant 0 : i32
    %c0_i32_1 = arith.constant 0 : i32
    return %c0_i32, %c0_i32_0 : i32, i32
  }
  func.func @transform_5(%arg0: i32, %arg1: i32) -> (i32, i32) {
    %c0_i32 = arith.constant 0 : i32
    %c0_i32_0 = arith.constant 0 : i32
    return %arg0, %c0_i32 : i32, i32
  }
}

</mosaic_0001>

<bundles_post_ra>
// kernel: model_forward.3
= control target key start
LH: loop header
LB: loop body
LE: loop exit
PB: predicated region body
PF: predicated region fallthrough
CT: control target
= control target key end

     0   :  { %v4250_v0 = vmov 0   ;;  %s5358_s1 = inlined_call_operand.vmem [shape: bf16[512,128], index: 1, kind: input, shape index: {}]   ;;  %s5359_s0 = inlined_call_operand.vmem [shape: bf16[512,512], index: 0, kind: input, shape index: {}]   ;;  %s5360_s3 = inlined_call_operand.vmem [shape: f32[128,128], index: 3, kind: input, shape index: {}]   ;;  %s5361_s2 = inlined_call_operand.vmem [shape: f32[128,128], index: 2, kind: input, shape index: {}]   ;;  %s5362_s4 = inlined_call_operand.vmem [shape: f32[1,128], index: 4, kind: input, shape index: {}]   ;;  %s5363_s5 = inlined_call_operand.vmem [shape: f32[512,128], index: 5, kind: output, shape index: {}]  }
   0x1   :  { %1182 = vmatprep.subr.bf16.mxu0 %v4250_v0  ;;  %v4026_v1 = vld [vmem:[%s5358_s1] sm:$0xff]   ;;  %3833 = vmatprep.subr.bf16.mxu1 %v4250_v0  ;;  %v4027_v2 = vld [vmem:[%s5358_s1 + $0x8] sm:$0xff]   ;;  %v4028_v3 = vld [vmem:[%s5358_s1 + $0x10] sm:$0xff]  }
   0x2   :  { %1183 = vmatpush1.bf16.msra.mxu0 %v4026_v1  ;;  %3849 = vmatpush1.bf16.msra.mxu1 %v4026_v1  ;;  %v4029_v4 = vld [vmem:[%s5358_s1 + $0x18] sm:$0xff]   ;;  %v4030_v5 = vld [vmem:[%s5358_s1 + $0x20] sm:$0xff]   ;;  %v4031_v7 = vld [vmem:[%s5358_s1 + $0x28] sm:$0xff]  }
   0x3   :  { %1184 = vmatprep.subr.bf16.mxu0 %v4250_v0  ;;  %3834 = vmatprep.subr.bf16.mxu1 %v4250_v0  ;;  %v4044_v6 = vld [vmem:[%s5359_s0 + $0x4] ss:$16 sps:$4 sm:$0xff]   ;;  %v4033_v9 = vld [vmem:[%s5358_s1 + $0x38] sm:$0xff]   ;;  %v4035_v11 = vld [vmem:[%s5358_s1 + $0x48] sm:$0xff]  }
   0x4   :  { %1214 = vmatprep.mubr.bf16.mxu0 %v4044_v6  ;;  %v4032_v8 = vld [vmem:[%s5358_s1 + $0x30] sm:$0xff]   ;;  %v4034_v10 = vld [vmem:[%s5358_s1 + $0x40] sm:$0xff]   ;;  %v4037_v13 = vld [vmem:[%s5358_s1 + $0x58] sm:$0xff]  }
   0x5   :  { %v4036_v12 = vld [vmem:[%s5358_s1 + $0x50] sm:$0xff]   ;;  %v4038_v15 = vld [vmem:[%s5358_s1 + $0x60] sm:$0xff]   ;;  %v4039_v16 = vld [vmem:[%s5358_s1 + $0x68] sm:$0xff]  }
   0x6   :  { %1185 = vmatpush1.bf16.msra.mxu0 %v4027_v2  ;;  %3850 = vmatpush1.bf16.msra.mxu1 %v4027_v2  ;;  %v4088_v14 = vld [vmem:[%s5359_s0 + $0x204] ss:$16 sps:$4 sm:$0xff]   ;;  %v4041_v18 = vld [vmem:[%s5358_s1 + $0x78] sm:$0xff]   ;;  %v4042_v19 = vld [vmem:[%s5359_s0] ss:$16 sps:$4 sm:$0xff]  }
   0x7   :  { %1186 = vmatprep.subr.bf16.mxu0 %v4250_v0  ;;  %3835 = vmatprep.subr.bf16.mxu1 %v4250_v0  ;;  %v4040_v17 = vld [vmem:[%s5358_s1 + $0x70] sm:$0xff]   ;;  %v4045_v20 = vld [vmem:[%s5358_s1 + $0x80] sm:$0xff]   ;;  %v4049_v24 = vld [vmem:[%s5358_s1 + $0x88] sm:$0xff]  }
   0x8   :  { %1342 = vmatprep.mubr.bf16.mxu1 %v4088_v14  ;;  %v4086_v21 = vld [vmem:[%s5359_s0 + $0x200] ss:$16 sps:$4 sm:$0xff]   ;;  %v4046_v22 = vld [vmem:[%s5359_s0 + $0x24] ss:$16 sps:$4 sm:$0xff]   ;;  %v4057_v30 = vld [vmem:[%s5358_s1 + $0x98] sm:$0xff]  }
   0x9   :  { %v4093_v23 = vld [vmem:[%s5359_s0 + $0x224] ss:$16 sps:$4 sm:$0xff]   ;;  %v4048_v25 = vld [vmem:[%s5359_s0 + $0x20] ss:$16 sps:$4 sm:$0xff]   ;;  %v4065_v36 = vld [vmem:[%s5358_s1 + $0xa8] sm:$0xff]  }
   0xa   :  { %1187 = vmatpush1.bf16.msra.mxu0 %v4028_v3  ;;  %3851 = vmatpush1.bf16.msra.mxu1 %v4028_v3  ;;  %v4095_v26 = vld [vmem:[%s5359_s0 + $0x220] ss:$16 sps:$4 sm:$0xff]   ;;  %v4050_v27 = vld [vmem:[%s5359_s0 + $0x44] ss:$16 sps:$4 sm:$0xff]   ;;  %v4073_v42 = vld [vmem:[%s5358_s1 + $0xb8] sm:$0xff]  }
   0xb   :  { %1188 = vmatprep.subr.bf16.mxu0 %v4250_v0  ;;  %3836 = vmatprep.subr.bf16.mxu1 %v4250_v0  ;;  %v4053_v28 = vld [vmem:[%s5358_s1 + $0x90] sm:$0xff]   ;;  %v4061_v34 = vld [vmem:[%s5358_s1 + $0xa0] sm:$0xff]   ;;  %v4081_v48 = vld [vmem:[%s5358_s1 + $0xc8] sm:$0xff]  }
   0xc   :  { %v4100_v29 = vld [vmem:[%s5359_s0 + $0x244] ss:$16 sps:$4 sm:$0xff]   ;;  %v4052_v31 = vld [vmem:[%s5359_s0 + $0x40] ss:$16 sps:$4 sm:$0xff]   ;;  %v4092_v54 = vld [vmem:[%s5358_s1 + $0xd8] sm:$0xff]  }
   0xd   :  { %v4102_v32 = vld [vmem:[%s5359_s0 + $0x240] ss:$16 sps:$4 sm:$0xff]   ;;  %v4054_v33 = vld [vmem:[%s5359_s0 + $0x64] ss:$16 sps:$4 sm:$0xff]   ;;  %v4106_v60 = vld [vmem:[%s5358_s1 + $0xe8] sm:$0xff]  }
   0xe   :  { %1189 = vmatpush1.bf16.msra.mxu0 %v4029_v4  ;;  %3852 = vmatpush1.bf16.msra.mxu1 %v4029_v4  ;;  %v4107_v35 = vld [vmem:[%s5359_s0 + $0x264] ss:$16 sps:$4 sm:$0xff]   ;;  %v4056_v37 = vld [vmem:[%s5359_s0 + $0x60] ss:$16 sps:$4 sm:$0xff]   ;;  %v2105_v62 = vld [vmem:[%s5360_s3 + $0x8] sm:$0xff] }
   0xf   :  { %1190 = vmatprep.subr.bf16.mxu0 %v4250_v0  ;;  %3837 = vmatprep.subr.bf16.mxu1 %v4250_v0  ;;  %v4109_v38 = vld [vmem:[%s5359_s0 + $0x260] ss:$16 sps:$4 sm:$0xff]   ;;  %v4058_v39 = vld [vmem:[%s5359_s0 + $0x84] ss:$16 sps:$4 sm:$0xff]  }
  0x10   :  { %v4069_v40 = vld [vmem:[%s5358_s1 + $0xb0] sm:$0xff]   ;;  %v4077_v46 = vld [vmem:[%s5358_s1 + $0xc0] sm:$0xff]  }
  0x11   :  { %v4114_v41 = vld [vmem:[%s5359_s0 + $0x284] ss:$16 sps:$4 sm:$0xff]   ;;  %v4060_v43 = vld [vmem:[%s5359_s0 + $0x80] ss:$16 sps:$4 sm:$0xff]  }
  0x12   :  { %1191 = vmatpush1.bf16.msra.mxu0 %v4030_v5  ;;  %3853 = vmatpush1.bf16.msra.mxu1 %v4030_v5  ;;  %v4116_v44 = vld [vmem:[%s5359_s0 + $0x280] ss:$16 sps:$4 sm:$0xff]   ;;  %v4062_v45 = vld [vmem:[%s5359_s0 + $0xa4] ss:$16 sps:$4 sm:$0xff]  }
  0x13   :  { %1192 = vmatprep.subr.bf16.mxu0 %v4250_v0  ;;  %3838 = vmatprep.subr.bf16.mxu1 %v4250_v0  ;;  %v4121_v47 = vld [vmem:[%s5359_s0 + $0x2a4] ss:$16 sps:$4 sm:$0xff]   ;;  %v4064_v49 = vld [vmem:[%s5359_s0 + $0xa0] ss:$16 sps:$4 sm:$0xff]  }
  0x14   :  { %v4123_v50 = vld [vmem:[%s5359_s0 + $0x2a0] ss:$16 sps:$4 sm:$0xff]   ;;  %v4066_v51 = vld [vmem:[%s5359_s0 + $0xc4] ss:$16 sps:$4 sm:$0xff]  }
  0x15   :  { %v4085_v52 = vld [vmem:[%s5358_s1 + $0xd0] sm:$0xff]   ;;  %v4099_v58 = vld [vmem:[%s5358_s1 + $0xe0] sm:$0xff]  }
  0x16   :  { %1193 = vmatpush1.bf16.msra.mxu0 %v4031_v7  ;;  %3854 = vmatpush1.bf16.msra.mxu1 %v4031_v7  ;;  %v4127_v53 = vld [vmem:[%s5359_s0 + $0x2c4] ss:$16 sps:$4 sm:$0xff]   ;;  %v4068_v55 = vld [vmem:[%s5359_s0 + $0xc0] ss:$16 sps:$4 sm:$0xff]   ;;  %v2107_v7 = vld [vmem:[%s5360_s3 + $0x18] sm:$0xff] }
  0x17   :  { %1194 = vmatprep.subr.bf16.mxu0 %v4250_v0  ;;  %3839 = vmatprep.subr.bf16.mxu1 %v4250_v0  ;;  %v4129_v56 = vld [vmem:[%s5359_s0 + $0x2c0] ss:$16 sps:$4 sm:$0xff]   ;;  %v4070_v57 = vld [vmem:[%s5359_s0 + $0xe4] ss:$16 sps:$4 sm:$0xff]  }
  0x18   :  { %v4133_v59 = vld [vmem:[%s5359_s0 + $0x2e4] ss:$16 sps:$4 sm:$0xff]   ;;  %v4072_v1 = vld [vmem:[%s5359_s0 + $0xe0] ss:$16 sps:$4 sm:$0xff]  }
  0x19   :  { %v2104_v61 = vld [vmem:[%s5360_s3] sm:$0xff]  ;;  %v4113_v4 = vld [vmem:[%s5358_s1 + $0xf0] sm:$0xff]  }
  0x1a   :  { %1195 = vmatpush1.bf16.msra.mxu0 %v4032_v8  ;;  %3855 = vmatpush1.bf16.msra.mxu1 %v4032_v8  ;;  %v3769_v63 = vpack.c.bf16 %v2105_v62, %v2104_v61  ;;  %v4135_v2 = vld [vmem:[%s5359_s0 + $0x2e0] ss:$16 sps:$4 sm:$0xff]   ;;  %v4074_v3 = vld [vmem:[%s5359_s0 + $0x104] ss:$16 sps:$4 sm:$0xff]   ;;  %v4124_v61 = vld [vmem:[%s5359_s0 + $0x8] ss:$16 sps:$4 sm:$0xff]  }
  0x1b   :  { %1196 = vmatprep.subr.bf16.mxu0 %v4250_v0  ;;  %3840 = vmatprep.subr.bf16.mxu1 %v4250_v0  ;;  %v4139_v5 = vld [vmem:[%s5359_s0 + $0x304] ss:$16 sps:$4 sm:$0xff]   ;;  %v4141_v14 = vld [vmem:[%s5359_s0 + $0x300] ss:$16 sps:$4 sm:$0xff]  }
  0x1c   :  { %v2106_v6 = vld [vmem:[%s5360_s3 + $0x10] sm:$0xff] }
  0x1d   :  { %v3773_v8 = vpack.c.bf16 %v2107_v7, %v2106_v6  ;;  %v4132_v6 = vld [vmem:[%s5359_s0 + $0x28] ss:$16 sps:$4 sm:$0xff]  }
  0x1e   :  { %1197 = vmatpush1.bf16.msra.mxu0 %v4033_v9  ;;  %3856 = vmatpush1.bf16.msra.mxu1 %v4033_v9  ;;  %v2108_v9 = vld [vmem:[%s5360_s3 + $0x20] sm:$0xff] }
  0x1f   :  { %1198 = vmatprep.subr.bf16.mxu0 %v4250_v0  ;;  %3841 = vmatprep.subr.bf16.mxu1 %v4250_v0 }
  0x22   :  { %1199 = vmatpush1.bf16.msra.mxu0 %v4034_v10  ;;  %3857 = vmatpush1.bf16.msra.mxu1 %v4034_v10  ;;  %v4120_v10 = vld [vmem:[%s5358_s1 + $0xf8] sm:$0xff]  }
  0x23   :  { %1200 = vmatprep.subr.bf16.mxu0 %v4250_v0  ;;  %3842 = vmatprep.subr.bf16.mxu1 %v4250_v0 }
  0x26   :  { %1201 = vmatpush1.bf16.msra.mxu0 %v4035_v11  ;;  %3858 = vmatpush1.bf16.msra.mxu1 %v4035_v11  ;;  %v2109_v11 = vld [vmem:[%s5360_s3 + $0x28] sm:$0xff] }
  0x27   :  { %1202 = vmatprep.subr.bf16.mxu0 %v4250_v0  ;;  %3843 = vmatprep.subr.bf16.mxu1 %v4250_v0 }
  0x2a   :  { %1203 = vmatpush1.bf16.msra.mxu0 %v4036_v12  ;;  %3859 = vmatpush1.bf16.msra.mxu1 %v4036_v12  ;;  %v3777_v12 = vpack.c.bf16 %v2109_v11, %v2108_v9 }
  0x2b   :  { %1204 = vmatprep.subr.bf16.mxu0 %v4250_v0  ;;  %3844 = vmatprep.subr.bf16.mxu1 %v4250_v0 }
  0x2e   :  { %1205 = vmatpush1.bf16.msra.mxu0 %v4037_v13  ;;  %3860 = vmatpush1.bf16.msra.mxu1 %v4037_v13  ;;  %v4076_v13 = vld [vmem:[%s5359_s0 + $0x100] ss:$16 sps:$4 sm:$0xff]  }
  0x2f   :  { %1206 = vmatprep.subr.bf16.mxu0 %v4250_v0  ;;  %3845 = vmatprep.subr.bf16.mxu1 %v4250_v0 }
  0x32   :  { %1207 = vmatpush1.bf16.msra.mxu0 %v4038_v15  ;;  %3861 = vmatpush1.bf16.msra.mxu1 %v4038_v15  ;;  %v4078_v15 = vld [vmem:[%s5359_s0 + $0x124] ss:$16 sps:$4 sm:$0xff]  }
  0x33   :  { %1208 = vmatprep.subr.bf16.mxu0 %v4250_v0  ;;  %3846 = vmatprep.subr.bf16.mxu1 %v4250_v0 }
  0x36   :  { %1209 = vmatpush1.bf16.msra.mxu0 %v4039_v16  ;;  %3862 = vmatpush1.bf16.msra.mxu1 %v4039_v16  ;;  %v2110_v16 = vld [vmem:[%s5360_s3 + $0x30] sm:$0xff] }
  0x37   :  { %1210 = vmatprep.subr.bf16.mxu0 %v4250_v0  ;;  %3847 = vmatprep.subr.bf16.mxu1 %v4250_v0 }
  0x3a   :  { %1211 = vmatpush1.bf16.msra.mxu0 %v4040_v17  ;;  %3863 = vmatpush1.bf16.msra.mxu1 %v4040_v17  ;;  %v2111_v17 = vld [vmem:[%s5360_s3 + $0x38] sm:$0xff] }
  0x3b   :  { %1212 = vmatprep.subr.bf16.mxu0 %v4250_v0  ;;  %3848 = vmatprep.subr.bf16.mxu1 %v4250_v0 }
  0x3e   :  { %1213 = vmatpush1.bf16.msra.mxu0 %v4041_v18  ;;  %3864 = vmatpush1.bf16.msra.mxu1 %v4041_v18  ;;  %v3781_v18 = vpack.c.bf16 %v2111_v17, %v2110_v16  ;;  %v3327_v17 = vld [vmem:[%s5358_s1 + $0x30] sm:$0xff]  }
  0x3f   :  { %1471 = vmatprep.subr.bf16.mxu0 %v4250_v0  ;;  %3770 = vmatprep.subr.bf16.mxu1 %v3769_v63 }
  0x41   :  { %1215 = vmatmul.mubr.bf16.vlgmr.msra.gmra.mrb[0].mxu0 %v4042_v19  ;;  %1343 = vmatmul.mubr.bf16.vlgmr.msra.gmra.mrb[0].mxu1 %v4086_v21  ;;  %v2112_v19 = vld [vmem:[%s5360_s3 + $0x40] sm:$0xff] }
  0x42   :  { %1472 = vmatpush1.bf16.msra.mxu0 %v4045_v20  ;;  %1222 = vmatprep.mubr.bf16.mxu0 %v4046_v22  ;;  %v2113_v20 = vld [vmem:[%s5360_s3 + $0x48] sm:$0xff]  ;;  %v4080_v22 = vld [vmem:[%s5359_s0 + $0x120] ss:$16 sps:$4 sm:$0xff]  }
  0x43   :  { %1473 = vmatprep.subr.bf16.mxu0 %v4250_v0  ;;  %1350 = vmatprep.mubr.bf16.mxu1 %v4093_v23  ;;  %v3785_v21 = vpack.c.bf16 %v2113_v20, %v2112_v19  ;;  %v4147_v23 = vld [vmem:[%s5359_s0 + $0x320] ss:$16 sps:$4 sm:$0xff]   ;;  %v3220_v19 = vunpack.c.l.bf16 %v3327_v17  ;;  %v3328_v20 = vld [vmem:[%s5358_s1 + $0x38] sm:$0xff]  }
  0x44   :  { %3772 = vmatpush3.bf16.msra.mxu1 %v3769_v63  ;;  %v4130_v63 = vld [vmem:[%s5359_s0 + $0x2c] ss:$16 sps:$4 sm:$0xff]  }
  0x45   :  { %3774 = vmatprep.subr.bf16.mxu1 %v3773_v8 }
  0x46   :  { %1474 = vmatpush1.bf16.msra.mxu0 %v4049_v24  ;;  %v4082_v24 = vld [vmem:[%s5359_s0 + $0x144] ss:$16 sps:$4 sm:$0xff]  }
  0x47   :  { %1475 = vmatprep.subr.bf16.mxu0 %v4250_v0 }
  0x48   :  { %3776 = vmatpush3.bf16.msra.mxu1 %v3773_v8  ;;  %v4136_v8 = vld [vmem:[%s5359_s0 + $0x4c] ss:$16 sps:$4 sm:$0xff]  }
  0x49   :  { %1223 = vmatmul.mubr.bf16.gmra.mrb[4].mxu0 %v4048_v25  ;;  %1351 = vmatmul.mubr.bf16.gmra.mrb[4].mxu1 %v4095_v26  ;;  %v4151_v25 = vld [vmem:[%s5359_s0 + $0x344] ss:$16 sps:$4 sm:$0xff]  }
  0x4a   :  { %1230 = vmatprep.mubr.bf16.mxu0 %v4050_v27  ;;  %1476 = vmatpush1.bf16.msra.mxu0 %v4053_v28  ;;  %v2114_v26 = vld [vmem:[%s5360_s3 + $0x50] sm:$0xff]  ;;  %v2115_v27 = vld [vmem:[%s5360_s3 + $0x58] sm:$0xff] }
  0x4b   :  { %1477 = vmatprep.subr.bf16.mxu0 %v4250_v0  ;;  %1358 = vmatprep.mubr.bf16.mxu1 %v4100_v29  ;;  %v3789_v28 = vpack.c.bf16 %v2115_v27, %v2114_v26  ;;  %v2116_v29 = vld [vmem:[%s5360_s3 + $0x60] sm:$0xff]  ;;  %v3225_v26 = vunpack.c.h.bf16 %v3328_v20 }
  0x4c   :  { %3778 = vmatprep.subr.bf16.mxu1 %v3777_v12 }
  0x4d   :  { %3780 = vmatpush3.bf16.msra.mxu1 %v3777_v12 }
  0x4e   :  { %1478 = vmatpush1.bf16.msra.mxu0 %v4057_v30  ;;  %3782 = vmatprep.subr.bf16.mxu1 %v3781_v18  ;;  %v2117_v30 = vld [vmem:[%s5360_s3 + $0x68] sm:$0xff] }
  0x4f   :  { %1479 = vmatprep.subr.bf16.mxu0 %v4250_v0 }
  0x51   :  { %1231 = vmatmul.mubr.bf16.gmra.mrb[8].mxu0 %v4052_v31  ;;  %1359 = vmatmul.mubr.bf16.gmra.mrb[8].mxu1 %v4102_v32  ;;  %v3793_v31 = vpack.c.bf16 %v2117_v30, %v2116_v29  ;;  %v4084_v32 = vld [vmem:[%s5359_s0 + $0x140] ss:$16 sps:$4 sm:$0xff]   ;;  %v4150_v29 = vld [vmem:[%s5359_s0 + $0x88] ss:$16 sps:$4 sm:$0xff]  }
  0x52   :  { %1238 = vmatprep.mubr.bf16.mxu0 %v4054_v33  ;;  %1480 = vmatpush1.bf16.msra.mxu0 %v4061_v34  ;;  %v4153_v33 = vld [vmem:[%s5359_s0 + $0x340] ss:$16 sps:$4 sm:$0xff]   ;;  %v4089_v34 = vld [vmem:[%s5359_s0 + $0x164] ss:$16 sps:$4 sm:$0xff]  }
  0x53   :  { %1481 = vmatprep.subr.bf16.mxu0 %v4250_v0  ;;  %1366 = vmatprep.mubr.bf16.mxu1 %v4107_v35  ;;  %v4157_v35 = vld [vmem:[%s5359_s0 + $0x364] ss:$16 sps:$4 sm:$0xff]  }
  0x54   :  { %3784 = vmatpush3.bf16.msra.mxu1 %v3781_v18 }
  0x55   :  { %3786 = vmatprep.subr.bf16.mxu1 %v3785_v21 }
  0x56   :  { %1482 = vmatpush1.bf16.msra.mxu0 %v4065_v36  ;;  %v2118_v36 = vld [vmem:[%s5360_s3 + $0x70] sm:$0xff] }
  0x57   :  { %1483 = vmatprep.subr.bf16.mxu0 %v4250_v0 }
  0x58   :  { %3788 = vmatpush3.bf16.msra.mxu1 %v3785_v21  ;;  %v4144_v21 = vld [vmem:[%s5359_s0 + $0x68] ss:$16 sps:$4 sm:$0xff]  }
  0x59   :  { %1239 = vmatmul.mubr.bf16.gmra.mrb[12].mxu0 %v4056_v37  ;;  %1367 = vmatmul.mubr.bf16.gmra.mrb[12].mxu1 %v4109_v38  ;;  %v2119_v37 = vld [vmem:[%s5360_s3 + $0x78] sm:$0xff] }
  0x5a   :  { %1246 = vmatprep.mubr.bf16.mxu0 %v4058_v39  ;;  %1484 = vmatpush1.bf16.msra.mxu0 %v4069_v40  ;;  %v3797_v38 = vpack.c.bf16 %v2119_v37, %v2118_v36  ;;  %v4091_v39 = vld [vmem:[%s5359_s0 + $0x160] ss:$16 sps:$4 sm:$0xff]   ;;  %v3332_v36 = vld [vmem:[%s5358_s1 + $0x58] sm:$0xff]  }
  0x5b   :  { %1485 = vmatprep.subr.bf16.mxu0 %v4250_v0  ;;  %1374 = vmatprep.mubr.bf16.mxu1 %v4114_v41  ;;  %v4159_v40 = vld [vmem:[%s5359_s0 + $0x360] ss:$16 sps:$4 sm:$0xff]   ;;  %v4096_v41 = vld [vmem:[%s5359_s0 + $0x184] ss:$16 sps:$4 sm:$0xff]   ;;  %v4156_v37 = vld [vmem:[%s5359_s0 + $0xa8] ss:$16 sps:$4 sm:$0xff]  }
  0x5c   :  { %3790 = vmatprep.subr.bf16.mxu1 %v3789_v28 }
  0x5d   :  { %3792 = vmatpush3.bf16.msra.mxu1 %v3789_v28  ;;  %v3330_v28 = vld [vmem:[%s5358_s1 + $0x48] sm:$0xff]  }
  0x5e   :  { %1486 = vmatpush1.bf16.msra.mxu0 %v4073_v42  ;;  %3794 = vmatprep.subr.bf16.mxu1 %v3793_v31  ;;  %v4163_v42 = vld [vmem:[%s5359_s0 + $0x384] ss:$16 sps:$4 sm:$0xff]  }
  0x5f   :  { %1487 = vmatprep.subr.bf16.mxu0 %v4250_v0 }
  0x61   :  { %1247 = vmatmul.mubr.bf16.gmra.mrb[16].mxu0 %v4060_v43  ;;  %1375 = vmatmul.mubr.bf16.gmra.mrb[16].mxu1 %v4116_v44  ;;  %v4098_v43 = vld [vmem:[%s5359_s0 + $0x180] ss:$16 sps:$4 sm:$0xff]  }
  0x62   :  { %1254 = vmatprep.mubr.bf16.mxu0 %v4062_v45  ;;  %1488 = vmatpush1.bf16.msra.mxu0 %v4077_v46  ;;  %v4165_v44 = vld [vmem:[%s5359_s0 + $0x380] ss:$16 sps:$4 sm:$0xff]   ;;  %v4103_v45 = vld [vmem:[%s5359_s0 + $0x1a4] ss:$16 sps:$4 sm:$0xff]  }
  0x63   :  { %1489 = vmatprep.subr.bf16.mxu0 %v4250_v0  ;;  %1382 = vmatprep.mubr.bf16.mxu1 %v4121_v47  ;;  %v4169_v46 = vld [vmem:[%s5359_s0 + $0x3a4] ss:$16 sps:$4 sm:$0xff]   ;;  %v4105_v47 = vld [vmem:[%s5359_s0 + $0x1a0] ss:$16 sps:$4 sm:$0xff]  }
  0x64   :  { %3796 = vmatpush3.bf16.msra.mxu1 %v3793_v31  ;;  %v4154_v31 = vld [vmem:[%s5359_s0 + $0xac] ss:$16 sps:$4 sm:$0xff]  }
  0x65   :  { %3798 = vmatprep.subr.bf16.mxu1 %v3797_v38 }
  0x66   :  { %1490 = vmatpush1.bf16.msra.mxu0 %v4081_v48  ;;  %v4171_v48 = vld [vmem:[%s5359_s0 + $0x3a0] ss:$16 sps:$4 sm:$0xff]  }
  0x67   :  { %1491 = vmatprep.subr.bf16.mxu0 %v4250_v0 }
  0x68   :  { %3800 = vmatpush3.bf16.msra.mxu1 %v3797_v38 }
  0x69   :  { %1255 = vmatmul.mubr.bf16.gmra.mrb[20].mxu0 %v4064_v49  ;;  %1383 = vmatmul.mubr.bf16.gmra.mrb[20].mxu1 %v4123_v50  ;;  %v4110_v49 = vld [vmem:[%s5359_s0 + $0x1c4] ss:$16 sps:$4 sm:$0xff]  }
  0x6a   :  { %1262 = vmatprep.mubr.bf16.mxu0 %v4066_v51  ;;  %1492 = vmatpush1.bf16.msra.mxu0 %v4085_v52  ;;  %v4175_v50 = vld [vmem:[%s5359_s0 + $0x3c4] ss:$16 sps:$4 sm:$0xff]   ;;  %v4112_v51 = vld [vmem:[%s5359_s0 + $0x1c0] ss:$16 sps:$4 sm:$0xff]  }
  0x6b   :  { %1493 = vmatprep.subr.bf16.mxu0 %v4250_v0  ;;  %1390 = vmatprep.mubr.bf16.mxu1 %v4127_v53  ;;  %v4177_v52 = vld [vmem:[%s5359_s0 + $0x3c0] ss:$16 sps:$4 sm:$0xff]   ;;  %v4117_v53 = vld [vmem:[%s5359_s0 + $0x1e4] ss:$16 sps:$4 sm:$0xff]  }
  0x6e   :  { %1494 = vmatpush1.bf16.msra.mxu0 %v4092_v54  ;;  %v4181_v54 = vld [vmem:[%s5359_s0 + $0x3e4] ss:$16 sps:$4 sm:$0xff]  }
  0x6f   :  { %1495 = vmatprep.subr.bf16.mxu0 %v4250_v0 }
  0x71   :  { %1263 = vmatmul.mubr.bf16.gmra.mrb[24].mxu0 %v4068_v55  ;;  %1391 = vmatmul.mubr.bf16.gmra.mrb[24].mxu1 %v4129_v56  ;;  %v3195_v55 = vld [vmem:[%s5358_s1] sm:$0xff]  }
  0x72   :  { %1270 = vmatprep.mubr.bf16.mxu0 %v4070_v57  ;;  %1496 = vmatpush1.bf16.msra.mxu0 %v4099_v58  ;;  %v4119_v56 = vld [vmem:[%s5359_s0 + $0x1e0] ss:$16 sps:$4 sm:$0xff]   ;;  %v4126_v58 = vld [vmem:[%s5359_s0 + $0xc] ss:$16 sps:$4 sm:$0xff]   ;;  %v3197_v62 = vunpack.c.h.bf16 %v3195_v55 }
  0x73   :  { %1497 = vmatprep.subr.bf16.mxu0 %v4250_v0  ;;  %1398 = vmatprep.mubr.bf16.mxu1 %v4133_v59  ;;  %v4183_v57 = vld [vmem:[%s5359_s0 + $0x3e0] ss:$16 sps:$4 sm:$0xff]   ;;  %v3196_v59 = vunpack.c.l.bf16 %v3195_v55 }
  0x76   :  { %1498 = vmatpush1.bf16.msra.mxu0 %v4106_v60  ;;  %v3322_v60 = vld [vmem:[%s5358_s1 + $0x8] sm:$0xff]  }
  0x77   :  { %1499 = vmatprep.subr.bf16.mxu0 %v4250_v0 }
  0x79   :  { %1271 = vmatmul.mubr.bf16.gmra.mrb[28].mxu0 %v4072_v1  ;;  %1399 = vmatmul.mubr.bf16.gmra.mrb[28].mxu1 %v4135_v2  ;;  %v3200_v1 = vunpack.c.l.bf16 %v3322_v60  ;;  %v3323_v2 = vld [vmem:[%s5358_s1 + $0x10] sm:$0xff]  }
  0x7a   :  { %1278 = vmatprep.mubr.bf16.mxu0 %v4074_v3  ;;  %1500 = vmatpush1.bf16.msra.mxu0 %v4113_v4  ;;  %v3201_v3 = vunpack.c.h.bf16 %v3322_v60  ;;  %v3204_v4 = vunpack.c.l.bf16 %v3323_v2  ;;  %v3205_v7 = vunpack.c.h.bf16 %v3323_v2  ;;  %v3337_v60 = vld [vmem:[%s5358_s1 + $0x80] sm:$0xff]  }
  0x7b   :  { %1501 = vmatprep.subr.bf16.mxu0 %v4250_v0  ;;  %1406 = vmatprep.mubr.bf16.mxu1 %v4139_v5  ;;  %v4145_v0 = vld [vmem:[%s5359_s0 + $0x324] ss:$16 sps:$4 sm:$0xff]   ;;  %v3324_v5 = vld [vmem:[%s5358_s1 + $0x18] sm:$0xff]  }
  0x7c   :  { %v3208_v9 = vunpack.c.l.bf16 %v3324_v5  ;;  %v3209_v11 = vunpack.c.h.bf16 %v3324_v5  ;;  %v1960_v2 = vld [vmem:[%s5361_s2 + $0x20] sm:$0xff] }
  0x7e   :  { %1502 = vmatpush1.bf16.msra.mxu0 %v4120_v10  ;;  %v3325_v10 = vld [vmem:[%s5358_s1 + $0x20] sm:$0xff]  }
  0x7f   :  { %v3212_v12 = vunpack.c.l.bf16 %v3325_v10 }
  0x81   :  { %1279 = vmatmul.mubr.bf16.gmra.mrb[32].mxu0 %v4076_v13  ;;  %1407 = vmatmul.mubr.bf16.gmra.mrb[32].mxu1 %v4141_v14  ;;  %v3326_v13 = vld [vmem:[%s5358_s1 + $0x28] sm:$0xff]  }
  0x82   :  { %1286 = vmatprep.mubr.bf16.mxu0 %v4078_v15  ;;  %1414 = vmatprep.mubr.bf16.mxu1 %v4145_v0  ;;  %v4138_v14 = vld [vmem:[%s5359_s0 + $0x48] ss:$16 sps:$4 sm:$0xff]   ;;  %v3213_v15 = vunpack.c.h.bf16 %v3325_v10  ;;  %v4142_v0 = vld [vmem:[%s5359_s0 + $0x6c] ss:$16 sps:$4 sm:$0xff]   ;;  %v3216_v16 = vunpack.c.l.bf16 %v3326_v13  ;;  %v3217_v18 = vunpack.c.h.bf16 %v3326_v13 }
  0x83   :  { %v1963_v13 = vld [vmem:[%s5361_s2 + $0x38] sm:$0xff] }
  0x89   :  { %1287 = vmatmul.mubr.bf16.gmra.mrb[36].mxu0 %v4080_v22  ;;  %1415 = vmatmul.mubr.bf16.gmra.mrb[36].mxu1 %v4147_v23  ;;  %v3221_v22 = vunpack.c.h.bf16 %v3327_v17  ;;  %v4148_v23 = vld [vmem:[%s5359_s0 + $0x8c] ss:$16 sps:$4 sm:$0xff]  }
  0x8a   :  { %1294 = vmatprep.mubr.bf16.mxu0 %v4082_v24  ;;  %1422 = vmatprep.mubr.bf16.mxu1 %v4151_v25  ;;  %v3224_v24 = vunpack.c.l.bf16 %v3328_v20  ;;  %v3329_v25 = vld [vmem:[%s5358_s1 + $0x40] sm:$0xff]   ;;  %v4180_v20 = vld [vmem:[%s5359_s0 + $0x128] ss:$16 sps:$4 sm:$0xff]  }
  0x8b   :  { %v3228_v27 = vunpack.c.l.bf16 %v3329_v25  ;;  %v3229_v30 = vunpack.c.h.bf16 %v3329_v25  ;;  %v1966_v25 = vld [vmem:[%s5361_s2 + $0x50] sm:$0xff] }
  0x91   :  { %1295 = vmatmul.mubr.bf16.gmra.mrb[40].mxu0 %v4084_v32  ;;  %1423 = vmatmul.mubr.bf16.gmra.mrb[40].mxu1 %v4153_v33  ;;  %v3232_v32 = vunpack.c.l.bf16 %v3330_v28  ;;  %v3331_v33 = vld [vmem:[%s5358_s1 + $0x50] sm:$0xff]  }
  0x92   :  { %1302 = vmatprep.mubr.bf16.mxu0 %v4089_v34  ;;  %1430 = vmatprep.mubr.bf16.mxu1 %v4157_v35  ;;  %v3233_v34 = vunpack.c.h.bf16 %v3330_v28  ;;  %v3236_v35 = vunpack.c.l.bf16 %v3331_v33  ;;  %v3237_v38 = vunpack.c.h.bf16 %v3331_v33  ;;  %v3342_v33 = vld [vmem:[%s5358_s1 + $0xa8] sm:$0xff]  }
  0x99   :  { %1303 = vmatmul.mubr.bf16.gmra.mrb[44].mxu0 %v4091_v39  ;;  %1431 = vmatmul.mubr.bf16.gmra.mrb[44].mxu1 %v4159_v40  ;;  %v4160_v39 = vld [vmem:[%s5359_s0 + $0xcc] ss:$16 sps:$4 sm:$0xff]   ;;  %v3240_v40 = vunpack.c.l.bf16 %v3332_v36 }
  0x9a   :  { %1310 = vmatprep.mubr.bf16.mxu0 %v4096_v41  ;;  %1438 = vmatprep.mubr.bf16.mxu1 %v4163_v42  ;;  %v3333_v41 = vld [vmem:[%s5358_s1 + $0x60] sm:$0xff]   ;;  %v3241_v42 = vunpack.c.h.bf16 %v3332_v36  ;;  %v4187_v36 = vld [vmem:[%s5359_s0 + $0x16c] ss:$16 sps:$4 sm:$0xff]  }
  0xa1   :  { %1311 = vmatmul.mubr.bf16.gmra.mrb[48].mxu0 %v4098_v43  ;;  %1439 = vmatmul.mubr.bf16.gmra.mrb[48].mxu1 %v4165_v44  ;;  %v3244_v43 = vunpack.c.l.bf16 %v3333_v41  ;;  %v3334_v44 = vld [vmem:[%s5358_s1 + $0x68] sm:$0xff]  }
  0xa2   :  { %1318 = vmatprep.mubr.bf16.mxu0 %v4103_v45  ;;  %1446 = vmatprep.mubr.bf16.mxu1 %v4169_v46  ;;  %v4162_v45 = vld [vmem:[%s5359_s0 + $0xc8] ss:$16 sps:$4 sm:$0xff]   ;;  %v3245_v46 = vunpack.c.h.bf16 %v3333_v41  ;;  %v3281_v41 = vunpack.c.h.bf16 %v3342_v33 }
  0xa9   :  { %1319 = vmatmul.mubr.bf16.gmra.mrb[52].mxu0 %v4105_v47  ;;  %1447 = vmatmul.mubr.bf16.gmra.mrb[52].mxu1 %v4171_v48  ;;  %v4166_v47 = vld [vmem:[%s5359_s0 + $0xec] ss:$16 sps:$4 sm:$0xff]   ;;  %v3248_v48 = vunpack.c.l.bf16 %v3334_v44 }
  0xaa   :  { %1326 = vmatprep.mubr.bf16.mxu0 %v4110_v49  ;;  %1454 = vmatprep.mubr.bf16.mxu1 %v4175_v50  ;;  %v3335_v49 = vld [vmem:[%s5358_s1 + $0x70] sm:$0xff]   ;;  %v3249_v50 = vunpack.c.h.bf16 %v3334_v44  ;;  %v3344_v44 = vld [vmem:[%s5358_s1 + $0xb8] sm:$0xff]  }
  0xb1   :  { %1327 = vmatmul.mubr.bf16.gmra.mrb[56].mxu0 %v4112_v51  ;;  %1455 = vmatmul.mubr.bf16.gmra.mrb[56].mxu1 %v4177_v52  ;;  %v3252_v51 = vunpack.c.l.bf16 %v3335_v49  ;;  %v1956_v52 = vld [vmem:[%s5361_s2] sm:$0xff] }
  0xb2   :  { %1334 = vmatprep.mubr.bf16.mxu0 %v4117_v53  ;;  %1462 = vmatprep.mubr.bf16.mxu1 %v4181_v54  ;;  %v1957_v53 = vld [vmem:[%s5361_s2 + $0x8] sm:$0xff]  ;;  %v3336_v54 = vld [vmem:[%s5358_s1 + $0x78] sm:$0xff]  }
  0xb3   :  { %v3801_v55 = vpack.c.bf16 %v1957_v53, %v1956_v52  ;;  %v3346_v52 = vld [vmem:[%s5358_s1 + $0xc8] sm:$0xff]  }
  0xb4   :  { %v4192_v53 = vld [vmem:[%s5359_s0 + $0x188] ss:$16 sps:$4 sm:$0xff]  }
  0xb5   :  { %3802 = vmatprep.subr.bf16.mxu1 %v3801_v55 }
  0xb9   :  { %1335 = vmatmul.mubr.bf16.gmra.mrb[60].mxu0 %v4119_v56  ;;  %1463 = vmatmul.mubr.bf16.gmra.mrb[60].mxu1 %v4183_v57  ;;  %v4168_v56 = vld [vmem:[%s5359_s0 + $0xe8] ss:$16 sps:$4 sm:$0xff]   ;;  %v3253_v57 = vunpack.c.h.bf16 %v3335_v49  ;;  %v3345_v49 = vld [vmem:[%s5358_s1 + $0xc0] sm:$0xff]  }
  0xba   :  { %1503 = vmatprep.mubr.bf16.mxu0 %v4126_v58  ;;  %3545 = vmatprep.mubr.f32.mxu1 %v3196_v59  ;;  %v4172_v58 = vld [vmem:[%s5359_s0 + $0x10c] ss:$16 sps:$4 sm:$0xff]   ;;  %v3256_v59 = vunpack.c.l.bf16 %v3336_v54 }
  0xc1   :  { %1504 = vmatmul.mubr.bf16.vlgmr.msra.gmra.mrb[0].mxu0 %v4124_v61  ;;  %3546 = vmatmul.mubr.f32.vlgmr.msra.gmra.mrb[64].mxu1 %v3197_v62  ;;  %v1958_v61 = vld [vmem:[%s5361_s2 + $0x10] sm:$0xff]  ;;  %v1959_v62 = vld [vmem:[%s5361_s2 + $0x18] sm:$0xff] }
  0xc2   :  { %1511 = vmatprep.mubr.bf16.mxu0 %v4130_v63  ;;  %3548 = vmatprep.mubr.f32.mxu1 %v3200_v1  ;;  %v3257_v63 = vunpack.c.h.bf16 %v3336_v54  ;;  %v3805_v1 = vpack.c.bf16 %v1959_v62, %v1958_v61  ;;  %v3293_v54 = vunpack.c.h.bf16 %v3345_v49  ;;  %v4195_v61 = vld [vmem:[%s5359_s0 + $0x1a8] ss:$16 sps:$4 sm:$0xff]  }
  0xc3   :  { %3804 = vmatpush3.bf16.msra.mxu1 %v3801_v55  ;;  %v4193_v55 = vld [vmem:[%s5359_s0 + $0x1ac] ss:$16 sps:$4 sm:$0xff]  }
  0xc4   :  { %3806 = vmatprep.subr.bf16.mxu1 %v3805_v1 }
  0xc5   :  { %3549 = vmatmul.mubr.f32.gmra.mrb[66].mxu1 %v3201_v3  ;;  %v1961_v3 = vld [vmem:[%s5361_s2 + $0x28] sm:$0xff] }
  0xc6   :  { %3551 = vmatprep.mubr.f32.mxu1 %v3204_v4  ;;  %v3260_v4 = vunpack.c.l.bf16 %v3337_v60  ;;  %v3809_v5 = vpack.c.bf16 %v1961_v3, %v1960_v2  ;;  %v3349_v2 = vld [vmem:[%s5358_s1 + $0xe0] sm:$0xff]  }
  0xc7   :  { %3808 = vmatpush3.bf16.msra.mxu1 %v3805_v1 }
  0xc8   :  { %3810 = vmatprep.subr.bf16.mxu1 %v3809_v5 }
  0xc9   :  { %1512 = vmatmul.mubr.bf16.gmra.mrb[4].mxu0 %v4132_v6  ;;  %3552 = vmatmul.mubr.f32.gmra.mrb[68].mxu1 %v3205_v7  ;;  %v3338_v6 = vld [vmem:[%s5358_s1 + $0x88] sm:$0xff]  }
  0xca   :  { %1519 = vmatprep.mubr.bf16.mxu0 %v4136_v8  ;;  %3554 = vmatprep.mubr.f32.mxu1 %v3208_v9  ;;  %v4174_v7 = vld [vmem:[%s5359_s0 + $0x108] ss:$16 sps:$4 sm:$0xff]   ;;  %v3261_v8 = vunpack.c.h.bf16 %v3337_v60  ;;  %v4178_v9 = vld [vmem:[%s5359_s0 + $0x12c] ss:$16 sps:$4 sm:$0xff]   ;;  %v3264_v10 = vunpack.c.l.bf16 %v3338_v6 }
  0xcb   :  { %3812 = vmatpush3.bf16.msra.mxu1 %v3809_v5  ;;  %v3348_v60 = vld [vmem:[%s5358_s1 + $0xd8] sm:$0xff]   ;;  %v3350_v5 = vld [vmem:[%s5358_s1 + $0xe8] sm:$0xff]  }
  0xcc   :  { %v3304_v1 = vunpack.c.l.bf16 %v3348_v60  ;;  %v3305_v3 = vunpack.c.h.bf16 %v3348_v60  ;;  %v4235_v60 = vld [vmem:[%s5359_s0 + $0x36c] ss:$16 sps:$4 sm:$0xff]  }
  0xcd   :  { %3555 = vmatmul.mubr.f32.gmra.mrb[70].mxu1 %v3209_v11  ;;  %v3339_v11 = vld [vmem:[%s5358_s1 + $0x90] sm:$0xff]  }
  0xce   :  { %3557 = vmatprep.mubr.f32.mxu1 %v3212_v12  ;;  %v1962_v12 = vld [vmem:[%s5361_s2 + $0x30] sm:$0xff]  ;;  %v3268_v17 = vunpack.c.l.bf16 %v3339_v11 }
  0xd1   :  { %1520 = vmatmul.mubr.bf16.gmra.mrb[8].mxu0 %v4138_v14  ;;  %3558 = vmatmul.mubr.f32.gmra.mrb[72].mxu1 %v3213_v15  ;;  %v3265_v14 = vunpack.c.h.bf16 %v3338_v6  ;;  %v3813_v15 = vpack.c.bf16 %v1963_v13, %v1962_v12  ;;  %v4198_v6 = vld [vmem:[%s5359_s0 + $0x1c8] ss:$16 sps:$4 sm:$0xff]  }
  0xd2   :  { %1527 = vmatprep.mubr.bf16.mxu0 %v4142_v0  ;;  %3560 = vmatprep.mubr.f32.mxu1 %v3216_v16  ;;  %v1964_v0 = vld [vmem:[%s5361_s2 + $0x40] sm:$0xff]  ;;  %v1965_v16 = vld [vmem:[%s5361_s2 + $0x48] sm:$0xff]  ;;  %v3352_v13 = vld [vmem:[%s5358_s1 + $0xf8] sm:$0xff]  }
  0xd3   :  { %3814 = vmatprep.subr.bf16.mxu1 %v3813_v15 }
  0xd4   :  { %3816 = vmatpush3.bf16.msra.mxu1 %v3813_v15 }
  0xd5   :  { %3561 = vmatmul.mubr.f32.gmra.mrb[74].mxu1 %v3217_v18  ;;  %v3817_v18 = vpack.c.bf16 %v1965_v16, %v1964_v0  ;;  %v4202_v0 = vld [vmem:[%s5359_s0 + $0x20c] ss:$16 sps:$4 sm:$0xff]   ;;  %v3320_v16 = vunpack.c.l.bf16 %v3352_v13 }
  0xd6   :  { %3563 = vmatprep.mubr.f32.mxu1 %v3220_v19  ;;  %v3340_v19 = vld [vmem:[%s5358_s1 + $0x98] sm:$0xff]  }
  0xd7   :  { %3818 = vmatprep.subr.bf16.mxu1 %v3817_v18 }
  0xd8   :  { %3820 = vmatpush3.bf16.msra.mxu1 %v3817_v18  ;;  %v4204_v18 = vld [vmem:[%s5359_s0 + $0x208] ss:$16 sps:$4 sm:$0xff]  }
  0xd9   :  { %1528 = vmatmul.mubr.bf16.gmra.mrb[12].mxu0 %v4144_v21  ;;  %3564 = vmatmul.mubr.f32.gmra.mrb[76].mxu1 %v3221_v22  ;;  %v3269_v21 = vunpack.c.h.bf16 %v3339_v11  ;;  %v4184_v22 = vld [vmem:[%s5359_s0 + $0x14c] ss:$16 sps:$4 sm:$0xff]   ;;  %v3313_v11 = vunpack.c.h.bf16 %v3350_v5 }
  0xda   :  { %1535 = vmatprep.mubr.bf16.mxu0 %v4148_v23  ;;  %3566 = vmatprep.mubr.f32.mxu1 %v3224_v24  ;;  %v3272_v23 = vunpack.c.l.bf16 %v3340_v19  ;;  %v3341_v24 = vld [vmem:[%s5358_s1 + $0xa0] sm:$0xff]  }
  0xdd   :  { %3567 = vmatmul.mubr.f32.gmra.mrb[78].mxu1 %v3225_v26  ;;  %v1967_v26 = vld [vmem:[%s5361_s2 + $0x58] sm:$0xff] }
  0xde   :  { %3569 = vmatprep.mubr.f32.mxu1 %v3228_v27  ;;  %v3273_v27 = vunpack.c.h.bf16 %v3340_v19  ;;  %v3821_v28 = vpack.c.bf16 %v1967_v26, %v1966_v25  ;;  %v4205_v19 = vld [vmem:[%s5359_s0 + $0x22c] ss:$16 sps:$4 sm:$0xff]   ;;  %v4216_v26 = vld [vmem:[%s5359_s0 + $0x288] ss:$16 sps:$4 sm:$0xff]  }
  0xdf   :  { %v4214_v25 = vld [vmem:[%s5359_s0 + $0x28c] ss:$16 sps:$4 sm:$0xff]  }
  0xe0   :  { %3822 = vmatprep.subr.bf16.mxu1 %v3821_v28 }
  0xe1   :  { %1536 = vmatmul.mubr.bf16.gmra.mrb[16].mxu0 %v4150_v29  ;;  %3570 = vmatmul.mubr.f32.gmra.mrb[80].mxu1 %v3229_v30  ;;  %v1968_v29 = vld [vmem:[%s5361_s2 + $0x60] sm:$0xff]  ;;  %v1969_v30 = vld [vmem:[%s5361_s2 + $0x68] sm:$0xff] }
  0xe2   :  { %1543 = vmatprep.mubr.bf16.mxu0 %v4154_v31  ;;  %3572 = vmatprep.mubr.f32.mxu1 %v3232_v32  ;;  %v3276_v31 = vunpack.c.l.bf16 %v3341_v24  ;;  %v3825_v32 = vpack.c.bf16 %v1969_v30, %v1968_v29  ;;  %v4220_v30 = vld [vmem:[%s5359_s0 + $0x2cc] ss:$16 sps:$4 sm:$0xff]  }
  0xe3   :  { %3824 = vmatpush3.bf16.msra.mxu1 %v3821_v28  ;;  %v4219_v28 = vld [vmem:[%s5359_s0 + $0x2a8] ss:$16 sps:$4 sm:$0xff]  }
  0xe4   :  { %3826 = vmatprep.subr.bf16.mxu1 %v3825_v32 }
  0xe5   :  { %3573 = vmatmul.mubr.f32.gmra.mrb[82].mxu1 %v3233_v34  ;;  %v4186_v34 = vld [vmem:[%s5359_s0 + $0x148] ss:$16 sps:$4 sm:$0xff]  }
  0xe6   :  { %3575 = vmatprep.mubr.f32.mxu1 %v3236_v35  ;;  %v3277_v35 = vunpack.c.h.bf16 %v3341_v24  ;;  %v4213_v24 = vld [vmem:[%s5359_s0 + $0x268] ss:$16 sps:$4 sm:$0xff]  }
  0xe7   :  { %3828 = vmatpush3.bf16.msra.mxu1 %v3825_v32 }
  0xe9   :  { %1544 = vmatmul.mubr.bf16.gmra.mrb[20].mxu0 %v4156_v37  ;;  %3576 = vmatmul.mubr.f32.gmra.mrb[84].mxu1 %v3237_v38  ;;  %v3280_v37 = vunpack.c.l.bf16 %v3342_v33  ;;  %v3343_v38 = vld [vmem:[%s5358_s1 + $0xb0] sm:$0xff]  }
  0xea   :  { %1551 = vmatprep.mubr.bf16.mxu0 %v4160_v39  ;;  %3578 = vmatprep.mubr.f32.mxu1 %v3240_v40  ;;  %v1970_v39 = vld [vmem:[%s5361_s2 + $0x70] sm:$0xff]  ;;  %v1971_v40 = vld [vmem:[%s5361_s2 + $0x78] sm:$0xff] }
  0xed   :  { %3579 = vmatmul.mubr.f32.gmra.mrb[86].mxu1 %v3241_v42  ;;  %v3829_v42 = vpack.c.bf16 %v1971_v40, %v1970_v39  ;;  %v4225_v40 = vld [vmem:[%s5359_s0 + $0x2e8] ss:$16 sps:$4 sm:$0xff]  }
  0xee   :  { %3581 = vmatprep.mubr.f32.mxu1 %v3244_v43  ;;  %v3284_v43 = vunpack.c.l.bf16 %v3343_v38 }
  0xef   :  { %3830 = vmatprep.subr.bf16.mxu1 %v3829_v42 }
  0xf0   :  { %3832 = vmatpush3.bf16.msra.mxu1 %v3829_v42  ;;  %v4226_v42 = vld [vmem:[%s5359_s0 + $0x30c] ss:$16 sps:$4 sm:$0xff]  }
  0xf1   :  { %1552 = vmatmul.mubr.bf16.gmra.mrb[24].mxu0 %v4162_v45  ;;  %3582 = vmatmul.mubr.f32.gmra.mrb[88].mxu1 %v3245_v46  ;;  %v4189_v45 = vld [vmem:[%s5359_s0 + $0x168] ss:$16 sps:$4 sm:$0xff]   ;;  %v3285_v46 = vunpack.c.h.bf16 %v3343_v38 }
  0xf2   :  { %1559 = vmatprep.mubr.bf16.mxu0 %v4166_v47  ;;  %3584 = vmatprep.mubr.f32.mxu1 %v3248_v48  ;;  %v4190_v47 = vld [vmem:[%s5359_s0 + $0x18c] ss:$16 sps:$4 sm:$0xff]   ;;  %v3288_v48 = vunpack.c.l.bf16 %v3344_v44 }
  0xf5   :  { %3585 = vmatmul.mubr.f32.gmra.mrb[90].mxu1 %v3249_v50  ;;  %v3289_v50 = vunpack.c.h.bf16 %v3344_v44 }
  0xf6   :  { %3587 = vmatprep.mubr.f32.mxu1 %v3252_v51  ;;  %v3292_v51 = vunpack.c.l.bf16 %v3345_v49 }
  0xf9   :  { %1560 = vmatmul.mubr.bf16.gmra.mrb[28].mxu0 %v4168_v56  ;;  %3588 = vmatmul.mubr.f32.gmra.mrb[92].mxu1 %v3253_v57  ;;  %v3296_v56 = vunpack.c.l.bf16 %v3346_v52  ;;  %v3347_v57 = vld [vmem:[%s5358_s1 + $0xd0] sm:$0xff]  }
  0xfa   :  { %1567 = vmatprep.mubr.bf16.mxu0 %v4172_v58  ;;  %3590 = vmatprep.mubr.f32.mxu1 %v3256_v59  ;;  %v3297_v58 = vunpack.c.h.bf16 %v3346_v52  ;;  %v3300_v59 = vunpack.c.l.bf16 %v3347_v57  ;;  %v3301_v62 = vunpack.c.h.bf16 %v3347_v57  ;;  %v4231_v52 = vld [vmem:[%s5359_s0 + $0x328] ss:$16 sps:$4 sm:$0xff]  }
  0xfd   :  { %3591 = vmatmul.mubr.f32.gmra.mrb[94].mxu1 %v3257_v63  ;;  %v4196_v63 = vld [vmem:[%s5359_s0 + $0x1cc] ss:$16 sps:$4 sm:$0xff]  }
  0xfe   :  { %3593 = vmatprep.mubr.f32.mxu1 %v3260_v4  ;;  %v3308_v4 = vunpack.c.l.bf16 %v3349_v2 }
 0x101   :  { %1568 = vmatmul.mubr.bf16.gmra.mrb[32].mxu0 %v4174_v7  ;;  %3594 = vmatmul.mubr.f32.gmra.mrb[96].mxu1 %v3261_v8  ;;  %v3309_v7 = vunpack.c.h.bf16 %v3349_v2  ;;  %v4199_v8 = vld [vmem:[%s5359_s0 + $0x1ec] ss:$16 sps:$4 sm:$0xff]  }
 0x102   :  { %1575 = vmatprep.mubr.bf16.mxu0 %v4178_v9  ;;  %3596 = vmatprep.mubr.f32.mxu1 %v3264_v10  ;;  %v3312_v9 = vunpack.c.l.bf16 %v3350_v5  ;;  %v3351_v10 = vld [vmem:[%s5358_s1 + $0xf0] sm:$0xff]  }
 0x103   :  { %v3316_v12 = vunpack.c.l.bf16 %v3351_v10  ;;  %v3317_v15 = vunpack.c.h.bf16 %v3351_v10 }
 0x105   :  { %3597 = vmatmul.mubr.f32.gmra.mrb[98].mxu1 %v3265_v14  ;;  %v4201_v14 = vld [vmem:[%s5359_s0 + $0x1e8] ss:$16 sps:$4 sm:$0xff]  }
 0x106   :  { %3599 = vmatprep.mubr.f32.mxu1 %v3268_v17  ;;  %v3321_v17 = vunpack.c.h.bf16 %v3352_v13  ;;  %v4240_v13 = vld [vmem:[%s5359_s0 + $0x388] ss:$16 sps:$4 sm:$0xff]  }
 0x109   :  { %1576 = vmatmul.mubr.bf16.gmra.mrb[36].mxu0 %v4180_v20  ;;  %3600 = vmatmul.mubr.f32.gmra.mrb[100].mxu1 %v3269_v21  ;;  %v4207_v20 = vld [vmem:[%s5359_s0 + $0x228] ss:$16 sps:$4 sm:$0xff]   ;;  %v4208_v21 = vld [vmem:[%s5359_s0 + $0x24c] ss:$16 sps:$4 sm:$0xff]  }
 0x10a   :  { %1583 = vmatprep.mubr.bf16.mxu0 %v4184_v22  ;;  %3602 = vmatprep.mubr.f32.mxu1 %v3272_v23  ;;  %v4210_v22 = vld [vmem:[%s5359_s0 + $0x248] ss:$16 sps:$4 sm:$0xff]   ;;  %v4211_v23 = vld [vmem:[%s5359_s0 + $0x26c] ss:$16 sps:$4 sm:$0xff]  }
 0x10d   :  { %3603 = vmatmul.mubr.f32.gmra.mrb[102].mxu1 %v3273_v27  ;;  %v4217_v27 = vld [vmem:[%s5359_s0 + $0x2ac] ss:$16 sps:$4 sm:$0xff]  }
 0x10e   :  { %3605 = vmatprep.mubr.f32.mxu1 %v3276_v31 }
 0x111   :  { %1584 = vmatmul.mubr.bf16.gmra.mrb[40].mxu0 %v4186_v34  ;;  %3606 = vmatmul.mubr.f32.gmra.mrb[104].mxu1 %v3277_v35  ;;  %v4222_v34 = vld [vmem:[%s5359_s0 + $0x2c8] ss:$16 sps:$4 sm:$0xff]  }
 0x112   :  { %1591 = vmatprep.mubr.bf16.mxu0 %v4187_v36  ;;  %3608 = vmatprep.mubr.f32.mxu1 %v3280_v37  ;;  %v4223_v36 = vld [vmem:[%s5359_s0 + $0x2ec] ss:$16 sps:$4 sm:$0xff]  }
 0x114   :  { %v4941_v29 = vpop.f32.mrb[0].mxu1 }
 0x115   :  { %3609 = vmatmul.mubr.f32.gmra.mrb[106].mxu1 %v3281_v41  ;;  %v1346_v31 = vpop.f32.mrb[1].mxu1 }
 0x116   :  { %3611 = vmatprep.mubr.f32.mxu1 %v3284_v43  ;;  %v4946_v32 = vpop.f32.mrb[2].mxu1 }
 0x117   :  { %v1349_v33 = vpop.f32.mrb[3].mxu1 }
 0x119   :  { %1592 = vmatmul.mubr.bf16.gmra.mrb[44].mxu0 %v4189_v45  ;;  %3612 = vmatmul.mubr.f32.gmra.mrb[108].mxu1 %v3285_v46  ;;  %v4228_v46 = vld [vmem:[%s5359_s0 + $0x308] ss:$16 sps:$4 sm:$0xff]  }
 0x11a   :  { %1599 = vmatprep.mubr.bf16.mxu0 %v4190_v47  ;;  %3614 = vmatprep.mubr.f32.mxu1 %v3288_v48  ;;  %v4229_v48 = vld [vmem:[%s5359_s0 + $0x32c] ss:$16 sps:$4 sm:$0xff]  }
 0x11c   :  { %v4951_v35 = vpop.f32.mrb[4].mxu1 }
 0x11d   :  { %3615 = vmatmul.mubr.f32.gmra.mrb[110].mxu1 %v3289_v50  ;;  %v1354_v37 = vpop.f32.mrb[5].mxu1 }
 0x11e   :  { %3617 = vmatprep.mubr.f32.mxu1 %v3292_v51  ;;  %v4956_v38 = vpop.f32.mrb[6].mxu1 }
 0x11f   :  { %v1357_v39 = vpop.f32.mrb[7].mxu1 }
 0x120   :  { %v4247_v39 = vld [vmem:[%s5359_s0 + $0x3ec] ss:$16 sps:$4 sm:$0xff]  }
 0x121   :  { %1600 = vmatmul.mubr.bf16.gmra.mrb[48].mxu0 %v4192_v53  ;;  %3618 = vmatmul.mubr.f32.gmra.mrb[112].mxu1 %v3293_v54  ;;  %v4232_v54 = vld [vmem:[%s5359_s0 + $0x34c] ss:$16 sps:$4 sm:$0xff]  }
 0x122   :  { %1607 = vmatprep.mubr.bf16.mxu0 %v4193_v55  ;;  %3620 = vmatprep.mubr.f32.mxu1 %v3296_v56 }
 0x124   :  { %v4961_v41 = vpop.f32.mrb[8].mxu1 }
 0x125   :  { %3621 = vmatmul.mubr.f32.gmra.mrb[114].mxu1 %v3297_v58  ;;  %v1362_v43 = vpop.f32.mrb[9].mxu1  ;;  %v4234_v58 = vld [vmem:[%s5359_s0 + $0x348] ss:$16 sps:$4 sm:$0xff]  }
 0x126   :  { %3623 = vmatprep.mubr.f32.mxu1 %v3300_v59  ;;  %v4966_v44 = vpop.f32.mrb[10].mxu1 }
 0x127   :  { %v1365_v45 = vpop.f32.mrb[11].mxu1 }
 0x129   :  { %1608 = vmatmul.mubr.bf16.gmra.mrb[52].mxu0 %v4195_v61  ;;  %3624 = vmatmul.mubr.f32.gmra.mrb[116].mxu1 %v3301_v62 }
 0x12a   :  { %1615 = vmatprep.mubr.bf16.mxu0 %v4196_v63  ;;  %3626 = vmatprep.mubr.f32.mxu1 %v3304_v1 }
 0x12c   :  { %v4971_v47 = vpop.f32.mrb[12].mxu1 }
 0x12d   :  { %3627 = vmatmul.mubr.f32.gmra.mrb[118].mxu1 %v3305_v3  ;;  %v1370_v49 = vpop.f32.mrb[13].mxu1  ;;  %v4237_v3 = vld [vmem:[%s5359_s0 + $0x368] ss:$16 sps:$4 sm:$0xff]  }
 0x12e   :  { %3629 = vmatprep.mubr.f32.mxu1 %v3308_v4  ;;  %v4976_v50 = vpop.f32.mrb[14].mxu1  ;;  %v4249_v49 = vld [vmem:[%s5359_s0 + $0x3e8] ss:$16 sps:$4 sm:$0xff]  }
 0x12f   :  { %v1373_v51 = vpop.f32.mrb[15].mxu1 }
 0x131   :  { %1616 = vmatmul.mubr.bf16.gmra.mrb[56].mxu0 %v4198_v6  ;;  %3630 = vmatmul.mubr.f32.gmra.mrb[120].mxu1 %v3309_v7  ;;  %v4238_v6 = vld [vmem:[%s5359_s0 + $0x38c] ss:$16 sps:$4 sm:$0xff]  }
 0x132   :  { %1623 = vmatprep.mubr.bf16.mxu0 %v4199_v8  ;;  %3632 = vmatprep.mubr.f32.mxu1 %v3312_v9 }
 0x134   :  { %v4981_v53 = vpop.f32.mrb[16].mxu1 }
 0x135   :  { %3633 = vmatmul.mubr.f32.gmra.mrb[122].mxu1 %v3313_v11  ;;  %v1378_v55 = vpop.f32.mrb[17].mxu1 }
 0x136   :  { %3635 = vmatprep.mubr.f32.mxu1 %v3316_v12  ;;  %v4986_v56 = vpop.f32.mrb[18].mxu1 }
 0x137   :  { %v1381_v57 = vpop.f32.mrb[19].mxu1 }
 0x139   :  { %1624 = vmatmul.mubr.bf16.gmra.mrb[60].mxu0 %v4201_v14  ;;  %3636 = vmatmul.mubr.f32.gmra.mrb[124].mxu1 %v3317_v15 }
 0x13a   :  { %1631 = vmatprep.mubr.bf16.mxu0 %v4202_v0  ;;  %3638 = vmatprep.mubr.f32.mxu1 %v3320_v16  ;;  %v4241_v0 = vld [vmem:[%s5359_s0 + $0x3ac] ss:$16 sps:$4 sm:$0xff]  }
 0x13c   :  { %v4991_v59 = vpop.f32.mrb[20].mxu1 }
 0x13d   :  { %3639 = vmatmul.mubr.f32.gmra.mrb[126].mxu1 %v3321_v17  ;;  %v1386_v61 = vpop.f32.mrb[21].mxu1 }
 0x13e   :  { %v4996_v62 = vpop.f32.mrb[22].mxu1 }
 0x13f   :  { %v1389_v63 = vpop.f32.mrb[23].mxu1 }
 0x141   :  { %1632 = vmatmul.mubr.bf16.gmra.mrb[64].mxu0 %v4204_v18 }
 0x142   :  { %1639 = vmatprep.mubr.bf16.mxu0 %v4205_v19 }
 0x144   :  { %v5001_v4 = vpop.f32.mrb[24].mxu1 }
 0x145   :  { %v1394_v7 = vpop.f32.mrb[25].mxu1 }
 0x146   :  { %v5006_v9 = vpop.f32.mrb[26].mxu1 }
 0x147   :  { %v1397_v10 = vpop.f32.mrb[27].mxu1 }
 0x149   :  { %1640 = vmatmul.mubr.bf16.gmra.mrb[68].mxu0 %v4207_v20 }
 0x14a   :  { %1647 = vmatprep.mubr.bf16.mxu0 %v4208_v21 }
 0x14c   :  { %v5011_v14 = vpop.f32.mrb[28].mxu1 }
 0x14d   :  { %v1402_v16 = vpop.f32.mrb[29].mxu1 }
 0x14e   :  { %v5016_v18 = vpop.f32.mrb[30].mxu1 }
 0x14f   :  { %v1405_v19 = vpop.f32.mrb[31].mxu1 }
 0x151   :  { %1648 = vmatmul.mubr.bf16.gmra.mrb[72].mxu0 %v4210_v22  ;;  %v4243_v22 = vld [vmem:[%s5359_s0 + $0x3a8] ss:$16 sps:$4 sm:$0xff]  }
 0x152   :  { %1655 = vmatprep.mubr.bf16.mxu0 %v4211_v23 }
 0x154   :  { %v5021_v23 = vpop.f32.mrb[32].mxu1 }
 0x159   :  { %1656 = vmatmul.mubr.bf16.gmra.mrb[76].mxu0 %v4213_v24 }
 0x15a   :  { %1663 = vmatprep.mubr.bf16.mxu0 %v4214_v25  ;;  %v4244_v25 = vld [vmem:[%s5359_s0 + $0x3cc] ss:$16 sps:$4 sm:$0xff]  }
 0x161   :  { %1664 = vmatmul.mubr.bf16.gmra.mrb[80].mxu0 %v4216_v26  ;;  %v1410_v26 = vpop.f32.mrb[33].mxu1 }
 0x162   :  { %1671 = vmatprep.mubr.bf16.mxu0 %v4217_v27 }
 0x169   :  { %1672 = vmatmul.mubr.bf16.gmra.mrb[84].mxu0 %v4219_v28  ;;  %v5026_v28 = vpop.f32.mrb[34].mxu1 }
 0x16a   :  { %1679 = vmatprep.mubr.bf16.mxu0 %v4220_v30  ;;  %v1413_v30 = vpop.f32.mrb[35].mxu1 }
 0x171   :  { %1680 = vmatmul.mubr.bf16.gmra.mrb[88].mxu0 %v4222_v34  ;;  %v4246_v34 = vld [vmem:[%s5359_s0 + $0x3c8] ss:$16 sps:$4 sm:$0xff]  }
 0x172   :  { %1687 = vmatprep.mubr.bf16.mxu0 %v4223_v36  ;;  %v5031_v36 = vpop.f32.mrb[36].mxu1 }
 0x179   :  { %1688 = vmatmul.mubr.bf16.gmra.mrb[92].mxu0 %v4225_v40  ;;  %v1418_v40 = vpop.f32.mrb[37].mxu1 }
 0x17a   :  { %1695 = vmatprep.mubr.bf16.mxu0 %v4226_v42  ;;  %v5036_v43 = vpop.f32.mrb[38].mxu1 }
 0x17b   :  { %v1421_v45 = vpop.f32.mrb[39].mxu1 }
 0x17c   :  { %v5041_v51 = vpop.f32.mrb[40].mxu1 }
 0x181   :  { %1696 = vmatmul.mubr.bf16.gmra.mrb[96].mxu0 %v4228_v46 }
 0x182   :  { %1703 = vmatprep.mubr.bf16.mxu0 %v4229_v48 }
 0x189   :  { %1704 = vmatmul.mubr.bf16.gmra.mrb[100].mxu0 %v4231_v52 }
 0x18a   :  { %1711 = vmatprep.mubr.bf16.mxu0 %v4232_v54  ;;  %v1426_v54 = vpop.f32.mrb[41].mxu1 }
 0x18b   :  { %v5043_v57 = vpop.f32.mrb[42].mxu1 }
 0x191   :  { %1712 = vmatmul.mubr.bf16.gmra.mrb[104].mxu0 %v4234_v58  ;;  %v1429_v58 = vpop.f32.mrb[43].mxu1 }
 0x192   :  { %1719 = vmatprep.mubr.bf16.mxu0 %v4235_v60  ;;  %v5045_v63 = vpop.f32.mrb[44].mxu1 }
 0x194   :  { %v1505_v1 = vpop.f32.mrb[0].mxu0 }
 0x195   :  { %v1507_v2 = vpop.f32.mrb[1].mxu0  ;;  %3673 = vmatprep.mubr.f32.mxu1 %v1505_v1 }
 0x196   :  { %v1508_v5 = vpop.f32.mrb[2].mxu0  ;;  %v1434_v2 = vpop.f32.mrb[45].mxu1 }
 0x197   :  { %v1510_v8 = vpop.f32.mrb[3].mxu0  ;;  %3674 = vmatmul.mubr.f32.vlgmr.msra.gmra.mrb[64].mxu1 %v1508_v5  ;;  %v5047_v5 = vpop.f32.mrb[46].mxu1 }
 0x199   :  { %1720 = vmatmul.mubr.bf16.gmra.mrb[108].mxu0 %v4237_v3 }
 0x19a   :  { %1727 = vmatprep.mubr.bf16.mxu0 %v4238_v6  ;;  %v1437_v6 = vpop.f32.mrb[47].mxu1 }
 0x19b   :  { %v5049_v10 = vpop.f32.mrb[48].mxu1 }
 0x19c   :  { %v1513_v11 = vpop.f32.mrb[4].mxu0 }
 0x19d   :  { %v1515_v12 = vpop.f32.mrb[5].mxu0  ;;  %3676 = vmatprep.mubr.f32.mxu1 %v1513_v11 }
 0x19e   :  { %v1516_v15 = vpop.f32.mrb[6].mxu0  ;;  %v1442_v12 = vpop.f32.mrb[49].mxu1 }
 0x19f   :  { %v1518_v17 = vpop.f32.mrb[7].mxu0  ;;  %3677 = vmatmul.mubr.f32.gmra.mrb[66].mxu1 %v1516_v15  ;;  %v5051_v15 = vpop.f32.mrb[50].mxu1 }
 0x1a1   :  { %1728 = vmatmul.mubr.bf16.gmra.mrb[112].mxu0 %v4240_v13 }
 0x1a2   :  { %1735 = vmatprep.mubr.bf16.mxu0 %v4241_v0  ;;  %v1445_v0 = vpop.f32.mrb[51].mxu1 }
 0x1a3   :  { %v5053_v19 = vpop.f32.mrb[52].mxu1 }
 0x1a4   :  { %v1521_v20 = vpop.f32.mrb[8].mxu0 }
 0x1a5   :  { %v1523_v21 = vpop.f32.mrb[9].mxu0  ;;  %3679 = vmatprep.mubr.f32.mxu1 %v1521_v20 }
 0x1a6   :  { %v1524_v24 = vpop.f32.mrb[10].mxu0  ;;  %v1450_v21 = vpop.f32.mrb[53].mxu1 }
 0x1a7   :  { %v1526_v27 = vpop.f32.mrb[11].mxu0  ;;  %3680 = vmatmul.mubr.f32.gmra.mrb[68].mxu1 %v1524_v24  ;;  %v5055_v24 = vpop.f32.mrb[54].mxu1 }
 0x1a9   :  { %1736 = vmatmul.mubr.bf16.gmra.mrb[116].mxu0 %v4243_v22 }
 0x1aa   :  { %1743 = vmatprep.mubr.bf16.mxu0 %v4244_v25  ;;  %v1453_v25 = vpop.f32.mrb[55].mxu1 }
 0x1ab   :  { %v5057_v30 = vpop.f32.mrb[56].mxu1 }
 0x1ac   :  { %v1529_v31 = vpop.f32.mrb[12].mxu0 }
 0x1ad   :  { %v1531_v33 = vpop.f32.mrb[13].mxu0  ;;  %3682 = vmatprep.mubr.f32.mxu1 %v1529_v31 }
 0x1ae   :  { %v1532_v37 = vpop.f32.mrb[14].mxu0  ;;  %v1458_v33 = vpop.f32.mrb[57].mxu1 }
 0x1af   :  { %v1534_v42 = vpop.f32.mrb[15].mxu0  ;;  %3683 = vmatmul.mubr.f32.gmra.mrb[70].mxu1 %v1532_v37  ;;  %v5059_v37 = vpop.f32.mrb[58].mxu1 }
 0x1b1   :  { %1744 = vmatmul.mubr.bf16.gmra.mrb[120].mxu0 %v4246_v34 }
 0x1b2   :  { %1751 = vmatprep.mubr.bf16.mxu0 %v4247_v39  ;;  %v1461_v39 = vpop.f32.mrb[59].mxu1 }
 0x1b3   :  { %v5061_v45 = vpop.f32.mrb[60].mxu1 }
 0x1b4   :  { %v1537_v46 = vpop.f32.mrb[16].mxu0 }
 0x1b5   :  { %v1539_v48 = vpop.f32.mrb[17].mxu0  ;;  %3685 = vmatprep.mubr.f32.mxu1 %v1537_v46 }
 0x1b6   :  { %v1540_v52 = vpop.f32.mrb[18].mxu0  ;;  %v1466_v48 = vpop.f32.mrb[61].mxu1 }
 0x1b7   :  { %v1542_v55 = vpop.f32.mrb[19].mxu0  ;;  %3686 = vmatmul.mubr.f32.gmra.mrb[72].mxu1 %v1540_v52  ;;  %v5063_v52 = vpop.f32.mrb[62].mxu1 }
 0x1b8   :  { %v1469_v54 = vpop.f32.mrb[63].mxu1 }
 0x1b9   :  { %1752 = vmatmul.mubr.bf16.gmra.mrb[124].mxu0 %v4249_v49 }
 0x1bc   :  { %v1545_v60 = vpop.f32.mrb[20].mxu0 }
 0x1bd   :  { %v1547_v61 = vpop.f32.mrb[21].mxu0  ;;  %3688 = vmatprep.mubr.f32.mxu1 %v1545_v60 }
 0x1be   :  { %v1548_v1 = vpop.f32.mrb[22].mxu0 }
 0x1bf   :  { %v1550_v3 = vpop.f32.mrb[23].mxu0  ;;  %3689 = vmatmul.mubr.f32.gmra.mrb[74].mxu1 %v1548_v1 }
 0x1c4   :  { %v1553_v7 = vpop.f32.mrb[24].mxu0 }
 0x1c5   :  { %v1555_v8 = vpop.f32.mrb[25].mxu0  ;;  %3691 = vmatprep.mubr.f32.mxu1 %v1553_v7 }
 0x1c6   :  { %v1556_v11 = vpop.f32.mrb[26].mxu0 }
 0x1c7   :  { %v1558_v13 = vpop.f32.mrb[27].mxu0  ;;  %3692 = vmatmul.mubr.f32.gmra.mrb[76].mxu1 %v1556_v11 }
 0x1cc   :  { %v1561_v16 = vpop.f32.mrb[28].mxu0 }
 0x1cd   :  { %v1563_v17 = vpop.f32.mrb[29].mxu0  ;;  %3694 = vmatprep.mubr.f32.mxu1 %v1561_v16 }
 0x1ce   :  { %v1564_v20 = vpop.f32.mrb[30].mxu0 }
 0x1cf   :  { %v1566_v22 = vpop.f32.mrb[31].mxu0  ;;  %3695 = vmatmul.mubr.f32.gmra.mrb[78].mxu1 %v1564_v20 }
 0x1d4   :  { %v1569_v26 = vpop.f32.mrb[32].mxu0 }
 0x1d5   :  { %v1571_v27 = vpop.f32.mrb[33].mxu0  ;;  %3697 = vmatprep.mubr.f32.mxu1 %v1569_v26 }
 0x1d6   :  { %v1572_v31 = vpop.f32.mrb[34].mxu0 }
 0x1d7   :  { %v1574_v34 = vpop.f32.mrb[35].mxu0  ;;  %3698 = vmatmul.mubr.f32.gmra.mrb[80].mxu1 %v1572_v31 }
 0x1dc   :  { %v1577_v40 = vpop.f32.mrb[36].mxu0 }
 0x1dd   :  { %v1579_v42 = vpop.f32.mrb[37].mxu0  ;;  %3700 = vmatprep.mubr.f32.mxu1 %v1577_v40 }
 0x1de   :  { %v1580_v46 = vpop.f32.mrb[38].mxu0 }
 0x1df   :  { %v1582_v49 = vpop.f32.mrb[39].mxu0  ;;  %3701 = vmatmul.mubr.f32.gmra.mrb[82].mxu1 %v1580_v46 }
 0x1e4   :  { %v1585_v55 = vpop.f32.mrb[40].mxu0 }
 0x1e5   :  { %v1587_v58 = vpop.f32.mrb[41].mxu0  ;;  %3703 = vmatprep.mubr.f32.mxu1 %v1585_v55 }
 0x1e6   :  { %v1588_v60 = vpop.f32.mrb[42].mxu0 }
 0x1e7   :  { %v1590_v61 = vpop.f32.mrb[43].mxu0  ;;  %3704 = vmatmul.mubr.f32.gmra.mrb[84].mxu1 %v1588_v60 }
 0x1ec   :  { %v1593_v1 = vpop.f32.mrb[44].mxu0 }
 0x1ed   :  { %v1595_v2 = vpop.f32.mrb[45].mxu0  ;;  %3706 = vmatprep.mubr.f32.mxu1 %v1593_v1 }
 0x1ee   :  { %v1596_v3 = vpop.f32.mrb[46].mxu0 }
 0x1ef   :  { %v1598_v6 = vpop.f32.mrb[47].mxu0  ;;  %3707 = vmatmul.mubr.f32.gmra.mrb[86].mxu1 %v1596_v3 }
 0x1f4   :  { %v1601_v7 = vpop.f32.mrb[48].mxu0 }
 0x1f5   :  { %v1603_v8 = vpop.f32.mrb[49].mxu0  ;;  %3709 = vmatprep.mubr.f32.mxu1 %v1601_v7 }
 0x1f6   :  { %v1604_v11 = vpop.f32.mrb[50].mxu0 }
 0x1f7   :  { %v1606_v12 = vpop.f32.mrb[51].mxu0  ;;  %3710 = vmatmul.mubr.f32.gmra.mrb[88].mxu1 %v1604_v11 }
 0x1fc   :  { %v1609_v13 = vpop.f32.mrb[52].mxu0 }
 0x1fd   :  { %v1611_v0 = vpop.f32.mrb[53].mxu0  ;;  %3712 = vmatprep.mubr.f32.mxu1 %v1609_v13 }
 0x1fe   :  { %v1612_v16 = vpop.f32.mrb[54].mxu0 }
 0x1ff   :  { %v1614_v17 = vpop.f32.mrb[55].mxu0  ;;  %3713 = vmatmul.mubr.f32.gmra.mrb[90].mxu1 %v1612_v16 }
 0x204   :  { %v1617_v20 = vpop.f32.mrb[56].mxu0 }
 0x205   :  { %v1619_v21 = vpop.f32.mrb[57].mxu0  ;;  %3715 = vmatprep.mubr.f32.mxu1 %v1617_v20 }
 0x206   :  { %v1620_v22 = vpop.f32.mrb[58].mxu0 }
 0x207   :  { %v1622_v25 = vpop.f32.mrb[59].mxu0  ;;  %3716 = vmatmul.mubr.f32.gmra.mrb[92].mxu1 %v1620_v22 }
 0x20c   :  { %v1625_v26 = vpop.f32.mrb[60].mxu0 }
 0x20d   :  { %v1627_v27 = vpop.f32.mrb[61].mxu0  ;;  %3718 = vmatprep.mubr.f32.mxu1 %v1625_v26 }
 0x20e   :  { %v1628_v31 = vpop.f32.mrb[62].mxu0 }
 0x20f   :  { %v1630_v33 = vpop.f32.mrb[63].mxu0  ;;  %3719 = vmatmul.mubr.f32.gmra.mrb[94].mxu1 %v1628_v31 }
 0x214   :  { %v1633_v34 = vpop.f32.mrb[64].mxu0 }
 0x215   :  { %v1634_v39 = vadd.f32 %v1633_v34, %v4941_v29  ;;  %v1635_v40 = vpop.f32.mrb[65].mxu0 }
 0x216   :  { %v1636_v42 = vpop.f32.mrb[66].mxu0 }
 0x217   :  { %v1637_v46 = vadd.f32 %v1636_v42, %v4946_v32  ;;  %v1638_v48 = vpop.f32.mrb[67].mxu0  ;;  %3721 = vmatprep.mubr.f32.mxu1 %v1634_v39 }
 0x219   :  { %3722 = vmatmul.mubr.f32.gmra.mrb[96].mxu1 %v1637_v46 }
 0x21c   :  { %v1641_v49 = vpop.f32.mrb[68].mxu0 }
 0x21d   :  { %v1642_v54 = vadd.f32 %v1641_v49, %v4951_v35  ;;  %v1643_v55 = vpop.f32.mrb[69].mxu0 }
 0x21e   :  { %v1644_v58 = vpop.f32.mrb[70].mxu0 }
 0x21f   :  { %v1645_v60 = vadd.f32 %v1644_v58, %v4956_v38  ;;  %v1646_v61 = vpop.f32.mrb[71].mxu0  ;;  %3724 = vmatprep.mubr.f32.mxu1 %v1642_v54 }
 0x221   :  { %3725 = vmatmul.mubr.f32.gmra.mrb[98].mxu1 %v1645_v60 }
 0x224   :  { %v1649_v1 = vpop.f32.mrb[72].mxu0 }
 0x225   :  { %v1650_v29 = vadd.f32 %v1649_v1, %v4961_v41  ;;  %v1651_v2 = vpop.f32.mrb[73].mxu0 }
 0x226   :  { %v1652_v3 = vpop.f32.mrb[74].mxu0 }
 0x227   :  { %v1653_v32 = vadd.f32 %v1652_v3, %v4966_v44  ;;  %v1654_v6 = vpop.f32.mrb[75].mxu0  ;;  %3727 = vmatprep.mubr.f32.mxu1 %v1650_v29 }
 0x229   :  { %3728 = vmatmul.mubr.f32.gmra.mrb[100].mxu1 %v1653_v32 }
 0x22c   :  { %v1657_v7 = vpop.f32.mrb[76].mxu0 }
 0x22d   :  { %v1658_v35 = vadd.f32 %v1657_v7, %v4971_v47  ;;  %v1659_v8 = vpop.f32.mrb[77].mxu0 }
 0x22e   :  { %v1660_v11 = vpop.f32.mrb[78].mxu0 }
 0x22f   :  { %v1661_v38 = vadd.f32 %v1660_v11, %v4976_v50  ;;  %v1662_v12 = vpop.f32.mrb[79].mxu0  ;;  %3730 = vmatprep.mubr.f32.mxu1 %v1658_v35 }
 0x231   :  { %3731 = vmatmul.mubr.f32.gmra.mrb[102].mxu1 %v1661_v38 }
 0x234   :  { %v1665_v13 = vpop.f32.mrb[80].mxu0 }
 0x235   :  { %v1666_v41 = vadd.f32 %v1665_v13, %v4981_v53  ;;  %v1667_v0 = vpop.f32.mrb[81].mxu0 }
 0x236   :  { %v1668_v16 = vpop.f32.mrb[82].mxu0 }
 0x237   :  { %v1669_v44 = vadd.f32 %v1668_v16, %v4986_v56  ;;  %v1670_v17 = vpop.f32.mrb[83].mxu0  ;;  %3733 = vmatprep.mubr.f32.mxu1 %v1666_v41 }
 0x239   :  { %3734 = vmatmul.mubr.f32.gmra.mrb[104].mxu1 %v1669_v44 }
 0x23c   :  { %v1673_v20 = vpop.f32.mrb[84].mxu0 }
 0x23d   :  { %v1674_v47 = vadd.f32 %v1673_v20, %v4991_v59  ;;  %v1675_v21 = vpop.f32.mrb[85].mxu0 }
 0x23e   :  { %v1676_v22 = vpop.f32.mrb[86].mxu0 }
 0x23f   :  { %v1677_v50 = vadd.f32 %v1676_v22, %v4996_v62  ;;  %v1678_v25 = vpop.f32.mrb[87].mxu0  ;;  %3736 = vmatprep.mubr.f32.mxu1 %v1674_v47 }
 0x241   :  { %3737 = vmatmul.mubr.f32.gmra.mrb[106].mxu1 %v1677_v50 }
 0x244   :  { %v1681_v26 = vpop.f32.mrb[88].mxu0 }
 0x245   :  { %v1682_v53 = vadd.f32 %v1681_v26, %v5001_v4  ;;  %v1683_v27 = vpop.f32.mrb[89].mxu0 }
 0x246   :  { %v1684_v31 = vpop.f32.mrb[90].mxu0 }
 0x247   :  { %v1685_v56 = vadd.f32 %v1684_v31, %v5006_v9  ;;  %v1686_v33 = vpop.f32.mrb[91].mxu0  ;;  %3739 = vmatprep.mubr.f32.mxu1 %v1682_v53 }
 0x249   :  { %3740 = vmatmul.mubr.f32.gmra.mrb[108].mxu1 %v1685_v56 }
 0x24c   :  { %v1689_v34 = vpop.f32.mrb[92].mxu0 }
 0x24d   :  { %v1690_v59 = vadd.f32 %v1689_v34, %v5011_v14  ;;  %v1691_v39 = vpop.f32.mrb[93].mxu0 }
 0x24e   :  { %v1692_v40 = vpop.f32.mrb[94].mxu0 }
 0x24f   :  { %v1693_v62 = vadd.f32 %v1692_v40, %v5016_v18  ;;  %v1694_v42 = vpop.f32.mrb[95].mxu0  ;;  %3742 = vmatprep.mubr.f32.mxu1 %v1690_v59 }
 0x251   :  { %3743 = vmatmul.mubr.f32.gmra.mrb[110].mxu1 %v1693_v62 }
 0x254   :  { %v1697_v46 = vpop.f32.mrb[96].mxu0 }
 0x255   :  { %v1698_v4 = vadd.f32 %v1697_v46, %v5021_v23  ;;  %v1699_v48 = vpop.f32.mrb[97].mxu0 }
 0x256   :  { %v1700_v49 = vpop.f32.mrb[98].mxu0 }
 0x257   :  { %v1701_v9 = vadd.f32 %v1700_v49, %v5026_v28  ;;  %v1702_v54 = vpop.f32.mrb[99].mxu0  ;;  %3745 = vmatprep.mubr.f32.mxu1 %v1698_v4 }
 0x259   :  { %3746 = vmatmul.mubr.f32.gmra.mrb[112].mxu1 %v1701_v9 }
 0x25c   :  { %v1705_v55 = vpop.f32.mrb[100].mxu0 }
 0x25d   :  { %v1706_v14 = vadd.f32 %v1705_v55, %v5031_v36  ;;  %v1707_v58 = vpop.f32.mrb[101].mxu0  ;;  %v5090_v36 = vld [vmem:[%s5362_s4] ss:$0 sm:$0xff] }
 0x25e   :  { %v1708_v60 = vpop.f32.mrb[102].mxu0 }
 0x25f   :  { %v1709_v18 = vadd.f32 %v1708_v60, %v5036_v43  ;;  %v1710_v61 = vpop.f32.mrb[103].mxu0  ;;  %3748 = vmatprep.mubr.f32.mxu1 %v1706_v14 }
 0x261   :  { %3749 = vmatmul.mubr.f32.gmra.mrb[114].mxu1 %v1709_v18 }
 0x264   :  { %v1713_v1 = vpop.f32.mrb[104].mxu0 }
 0x265   :  { %v1714_v23 = vadd.f32 %v1713_v1, %v5041_v51  ;;  %v1715_v29 = vpop.f32.mrb[105].mxu0 }
 0x266   :  { %v1716_v2 = vpop.f32.mrb[106].mxu0 }
 0x267   :  { %v1717_v28 = vadd.f32 %v1716_v2, %v5043_v57  ;;  %v1718_v3 = vpop.f32.mrb[107].mxu0  ;;  %3751 = vmatprep.mubr.f32.mxu1 %v1714_v23 }
 0x269   :  { %3752 = vmatmul.mubr.f32.gmra.mrb[116].mxu1 %v1717_v28 }
 0x26a   :  { %v3675_v32 = vpop.f32.mrb[64].mxu1 }
 0x26b   :  { %v2898_v43 = vadd.f32 %v3675_v32, %v5090_v36  ;;  %v2571_v6 = vpop.f32.mrb[65].mxu1 }
 0x26c   :  { %v2897_v7 = vadd.f32 %v5090_v36, %v2571_v6  ;;  %v1721_v35 = vpop.f32.mrb[108].mxu0 }
 0x26d   :  { %2962 = vst [vmem:[%s5363_s5 + $0x8] sm:$0xff] %v2898_v43  ;;  %v1722_v51 = vadd.f32 %v1721_v35, %v5045_v63  ;;  %v1723_v57 = vpop.f32.mrb[109].mxu0 }
 0x26e   :  { %2961 = vst [vmem:[%s5363_s5] sm:$0xff] %v2897_v7  ;;  %v1724_v8 = vpop.f32.mrb[110].mxu0 }
 0x26f   :  { %v1725_v11 = vadd.f32 %v1724_v8, %v5047_v5  ;;  %v1726_v38 = vpop.f32.mrb[111].mxu0  ;;  %3754 = vmatprep.mubr.f32.mxu1 %v1722_v51 }
 0x271   :  { %3755 = vmatmul.mubr.f32.gmra.mrb[118].mxu1 %v1725_v11 }
 0x272   :  { %v3678_v12 = vpop.f32.mrb[66].mxu1 }
 0x273   :  { %v2900_v13 = vadd.f32 %v3678_v12, %v5090_v36  ;;  %v2581_v41 = vpop.f32.mrb[67].mxu1 }
 0x274   :  { %v2899_v0 = vadd.f32 %v5090_v36, %v2581_v41  ;;  %v1729_v16 = vpop.f32.mrb[112].mxu0 }
 0x275   :  { %2964 = vst [vmem:[%s5363_s5 + $0x18] sm:$0xff] %v2900_v13  ;;  %v1730_v63 = vadd.f32 %v1729_v16, %v5049_v10  ;;  %v1731_v44 = vpop.f32.mrb[113].mxu0 }
 0x276   :  { %2963 = vst [vmem:[%s5363_s5 + $0x10] sm:$0xff] %v2899_v0  ;;  %v1732_v5 = vpop.f32.mrb[114].mxu0 }
 0x277   :  { %v1733_v17 = vadd.f32 %v1732_v5, %v5051_v15  ;;  %v1734_v20 = vpop.f32.mrb[115].mxu0  ;;  %3757 = vmatprep.mubr.f32.mxu1 %v1730_v63 }
 0x279   :  { %3758 = vmatmul.mubr.f32.gmra.mrb[120].mxu1 %v1733_v17 }
 0x27a   :  { %v3681_v47 = vpop.f32.mrb[68].mxu1 }
 0x27b   :  { %v2902_v21 = vadd.f32 %v3681_v47, %v5090_v36  ;;  %v2591_v22 = vpop.f32.mrb[69].mxu1 }
 0x27c   :  { %v2901_v50 = vadd.f32 %v5090_v36, %v2591_v22  ;;  %v1737_v25 = vpop.f32.mrb[116].mxu0 }
 0x27d   :  { %2966 = vst [vmem:[%s5363_s5 + $0x28] sm:$0xff] %v2902_v21  ;;  %v1738_v10 = vadd.f32 %v1737_v25, %v5053_v19  ;;  %v1739_v26 = vpop.f32.mrb[117].mxu0 }
 0x27e   :  { %2965 = vst [vmem:[%s5363_s5 + $0x20] sm:$0xff] %v2901_v50  ;;  %v1740_v15 = vpop.f32.mrb[118].mxu0 }
 0x27f   :  { %v1741_v53 = vadd.f32 %v1740_v15, %v5055_v24  ;;  %v1742_v27 = vpop.f32.mrb[119].mxu0  ;;  %3760 = vmatprep.mubr.f32.mxu1 %v1738_v10 }
 0x281   :  { %3761 = vmatmul.mubr.f32.gmra.mrb[122].mxu1 %v1741_v53 }
 0x282   :  { %v3684_v31 = vpop.f32.mrb[70].mxu1 }
 0x283   :  { %v2904_v56 = vadd.f32 %v3684_v31, %v5090_v36  ;;  %v2601_v33 = vpop.f32.mrb[71].mxu1 }
 0x284   :  { %v2903_v34 = vadd.f32 %v5090_v36, %v2601_v33  ;;  %v1745_v59 = vpop.f32.mrb[120].mxu0 }
 0x285   :  { %2968 = vst [vmem:[%s5363_s5 + $0x38] sm:$0xff] %v2904_v56  ;;  %v1746_v19 = vadd.f32 %v1745_v59, %v5057_v30  ;;  %v1747_v39 = vpop.f32.mrb[121].mxu0 }
 0x286   :  { %2967 = vst [vmem:[%s5363_s5 + $0x30] sm:$0xff] %v2903_v34  ;;  %v1748_v24 = vpop.f32.mrb[122].mxu0 }
 0x287   :  { %v1749_v40 = vadd.f32 %v1748_v24, %v5059_v37  ;;  %v1750_v62 = vpop.f32.mrb[123].mxu0  ;;  %3763 = vmatprep.mubr.f32.mxu1 %v1746_v19 }
 0x289   :  { %3764 = vmatmul.mubr.f32.gmra.mrb[124].mxu1 %v1749_v40 }
 0x28a   :  { %v3687_v42 = vpop.f32.mrb[72].mxu1 }
 0x28b   :  { %v2906_v46 = vadd.f32 %v3687_v42, %v5090_v36  ;;  %v2611_v4 = vpop.f32.mrb[73].mxu1 }
 0x28c   :  { %v2905_v48 = vadd.f32 %v5090_v36, %v2611_v4  ;;  %v1753_v49 = vpop.f32.mrb[124].mxu0 }
 0x28d   :  { %2970 = vst [vmem:[%s5363_s5 + $0x48] sm:$0xff] %v2906_v46  ;;  %v1754_v30 = vadd.f32 %v1753_v49, %v5061_v45  ;;  %v1755_v9 = vpop.f32.mrb[125].mxu0 }
 0x28e   :  { %2969 = vst [vmem:[%s5363_s5 + $0x40] sm:$0xff] %v2905_v48  ;;  %v1756_v37 = vpop.f32.mrb[126].mxu0 }
 0x28f   :  { %v1757_v54 = vadd.f32 %v1756_v37, %v5063_v52  ;;  %v1758_v55 = vpop.f32.mrb[127].mxu0  ;;  %3766 = vmatprep.mubr.f32.mxu1 %v1754_v30 }
 0x291   :  { %3767 = vmatmul.mubr.f32.gmra.mrb[126].mxu1 %v1757_v54 }
 0x292   :  { %v3690_v14 = vpop.f32.mrb[74].mxu1 }
 0x293   :  { %v2908_v58 = vadd.f32 %v3690_v14, %v5090_v36  ;;  %v2621_v60 = vpop.f32.mrb[75].mxu1 }
 0x294   :  { %v2907_v18 = vadd.f32 %v5090_v36, %v2621_v60 }
 0x295   :  { %2972 = vst [vmem:[%s5363_s5 + $0x58] sm:$0xff] %v2908_v58 }
 0x296   :  { %2971 = vst [vmem:[%s5363_s5 + $0x50] sm:$0xff] %v2907_v18 }
 0x29a   :  { %v3693_v45 = vpop.f32.mrb[76].mxu1 }
 0x29b   :  { %v2910_v52 = vadd.f32 %v3693_v45, %v5090_v36  ;;  %v2631_v61 = vpop.f32.mrb[77].mxu1 }
 0x29c   :  { %v2909_v1 = vadd.f32 %v5090_v36, %v2631_v61 }
 0x29d   :  { %2974 = vst [vmem:[%s5363_s5 + $0x68] sm:$0xff] %v2910_v52 }
 0x29e   :  { %2973 = vst [vmem:[%s5363_s5 + $0x60] sm:$0xff] %v2909_v1 }
 0x2a2   :  { %v3696_v23 = vpop.f32.mrb[78].mxu1 }
 0x2a3   :  { %v2912_v29 = vadd.f32 %v3696_v23, %v5090_v36  ;;  %v2641_v2 = vpop.f32.mrb[79].mxu1 }
 0x2a4   :  { %v2911_v28 = vadd.f32 %v5090_v36, %v2641_v2 }
 0x2a5   :  { %2976 = vst [vmem:[%s5363_s5 + $0x78] sm:$0xff] %v2912_v29 }
 0x2a6   :  { %2975 = vst [vmem:[%s5363_s5 + $0x70] sm:$0xff] %v2911_v28 }
 0x2aa   :  { %v3699_v3 = vpop.f32.mrb[80].mxu1 }
 0x2ab   :  { %v2914_v32 = vadd.f32 %v3699_v3, %v5090_v36  ;;  %v2651_v43 = vpop.f32.mrb[81].mxu1 }
 0x2ac   :  { %v2913_v6 = vadd.f32 %v5090_v36, %v2651_v43 }
 0x2ad   :  { %2978 = vst [vmem:[%s5363_s5 + $0x88] sm:$0xff] %v2914_v32 }
 0x2ae   :  { %2977 = vst [vmem:[%s5363_s5 + $0x80] sm:$0xff] %v2913_v6 }
 0x2b2   :  { %v3702_v7 = vpop.f32.mrb[82].mxu1 }
 0x2b3   :  { %v2916_v35 = vadd.f32 %v3702_v7, %v5090_v36  ;;  %v2661_v51 = vpop.f32.mrb[83].mxu1 }
 0x2b4   :  { %v2915_v57 = vadd.f32 %v5090_v36, %v2661_v51 }
 0x2b5   :  { %2980 = vst [vmem:[%s5363_s5 + $0x98] sm:$0xff] %v2916_v35 }
 0x2b6   :  { %2979 = vst [vmem:[%s5363_s5 + $0x90] sm:$0xff] %v2915_v57 }
 0x2ba   :  { %v3705_v8 = vpop.f32.mrb[84].mxu1 }
 0x2bb   :  { %v2918_v11 = vadd.f32 %v3705_v8, %v5090_v36  ;;  %v2671_v38 = vpop.f32.mrb[85].mxu1 }
 0x2bc   :  { %v2917_v12 = vadd.f32 %v5090_v36, %v2671_v38 }
 0x2bd   :  { %2982 = vst [vmem:[%s5363_s5 + $0xa8] sm:$0xff] %v2918_v11 }
 0x2be   :  { %2981 = vst [vmem:[%s5363_s5 + $0xa0] sm:$0xff] %v2917_v12 }
 0x2c2   :  { %v3708_v13 = vpop.f32.mrb[86].mxu1 }
 0x2c3   :  { %v2920_v41 = vadd.f32 %v3708_v13, %v5090_v36  ;;  %v2681_v0 = vpop.f32.mrb[87].mxu1 }
 0x2c4   :  { %v2919_v16 = vadd.f32 %v5090_v36, %v2681_v0 }
 0x2c5   :  { %2984 = vst [vmem:[%s5363_s5 + $0xb8] sm:$0xff] %v2920_v41 }
 0x2c6   :  { %2983 = vst [vmem:[%s5363_s5 + $0xb0] sm:$0xff] %v2919_v16 }
 0x2ca   :  { %v3711_v63 = vpop.f32.mrb[88].mxu1 }
 0x2cb   :  { %v2922_v44 = vadd.f32 %v3711_v63, %v5090_v36  ;;  %v2691_v5 = vpop.f32.mrb[89].mxu1 }
 0x2cc   :  { %v2921_v17 = vadd.f32 %v5090_v36, %v2691_v5 }
 0x2cd   :  { %2986 = vst [vmem:[%s5363_s5 + $0xc8] sm:$0xff] %v2922_v44 }
 0x2ce   :  { %2985 = vst [vmem:[%s5363_s5 + $0xc0] sm:$0xff] %v2921_v17 }
 0x2d2   :  { %v3714_v20 = vpop.f32.mrb[90].mxu1 }
 0x2d3   :  { %v2924_v47 = vadd.f32 %v3714_v20, %v5090_v36  ;;  %v2701_v21 = vpop.f32.mrb[91].mxu1 }
 0x2d4   :  { %v2923_v22 = vadd.f32 %v5090_v36, %v2701_v21 }
 0x2d5   :  { %2988 = vst [vmem:[%s5363_s5 + $0xd8] sm:$0xff] %v2924_v47 }
 0x2d6   :  { %2987 = vst [vmem:[%s5363_s5 + $0xd0] sm:$0xff] %v2923_v22 }
 0x2da   :  { %v3717_v50 = vpop.f32.mrb[92].mxu1 }
 0x2db   :  { %v2926_v25 = vadd.f32 %v3717_v50, %v5090_v36  ;;  %v2711_v10 = vpop.f32.mrb[93].mxu1 }
 0x2dc   :  { %v2925_v26 = vadd.f32 %v5090_v36, %v2711_v10 }
 0x2dd   :  { %2990 = vst [vmem:[%s5363_s5 + $0xe8] sm:$0xff] %v2926_v25 }
 0x2de   :  { %2989 = vst [vmem:[%s5363_s5 + $0xe0] sm:$0xff] %v2925_v26 }
 0x2e2   :  { %v3720_v15 = vpop.f32.mrb[94].mxu1 }
 0x2e3   :  { %v2928_v53 = vadd.f32 %v3720_v15, %v5090_v36  ;;  %v2721_v27 = vpop.f32.mrb[95].mxu1 }
 0x2e4   :  { %v2927_v31 = vadd.f32 %v5090_v36, %v2721_v27 }
 0x2e5   :  { %2992 = vst [vmem:[%s5363_s5 + $0xf8] sm:$0xff] %v2928_v53 }
 0x2e6   :  { %2991 = vst [vmem:[%s5363_s5 + $0xf0] sm:$0xff] %v2927_v31 }
 0x2ec   :  { %v3723_v56 = vpop.f32.mrb[96].mxu1 }
 0x2ed   :  { %v2930_v33 = vadd.f32 %v3723_v56, %v5090_v36  ;;  %v2731_v34 = vpop.f32.mrb[97].mxu1 }
 0x2ee   :  { %v2929_v59 = vadd.f32 %v5090_v36, %v2731_v34 }
 0x2ef   :  { %2994 = vst [vmem:[%s5363_s5 + $0x108] sm:$0xff] %v2930_v33 }
 0x2f0   :  { %2993 = vst [vmem:[%s5363_s5 + $0x100] sm:$0xff] %v2929_v59 }
 0x2f4   :  { %v3726_v19 = vpop.f32.mrb[98].mxu1 }
 0x2f5   :  { %v2932_v39 = vadd.f32 %v3726_v19, %v5090_v36  ;;  %v2741_v24 = vpop.f32.mrb[99].mxu1 }
 0x2f6   :  { %v2931_v40 = vadd.f32 %v5090_v36, %v2741_v24 }
 0x2f7   :  { %2996 = vst [vmem:[%s5363_s5 + $0x118] sm:$0xff] %v2932_v39 }
 0x2f8   :  { %2995 = vst [vmem:[%s5363_s5 + $0x110] sm:$0xff] %v2931_v40 }
 0x2fc   :  { %v3729_v62 = vpop.f32.mrb[100].mxu1 }
 0x2fd   :  { %v2934_v42 = vadd.f32 %v3729_v62, %v5090_v36  ;;  %v2751_v46 = vpop.f32.mrb[101].mxu1 }
 0x2fe   :  { %v2933_v4 = vadd.f32 %v5090_v36, %v2751_v46 }
 0x2ff   :  { %2998 = vst [vmem:[%s5363_s5 + $0x128] sm:$0xff] %v2934_v42 }
 0x300   :  { %2997 = vst [vmem:[%s5363_s5 + $0x120] sm:$0xff] %v2933_v4 }
 0x304   :  { %v3732_v48 = vpop.f32.mrb[102].mxu1 }
 0x305   :  { %v2936_v49 = vadd.f32 %v3732_v48, %v5090_v36  ;;  %v2761_v30 = vpop.f32.mrb[103].mxu1 }
 0x306   :  { %v2935_v9 = vadd.f32 %v5090_v36, %v2761_v30 }
 0x307   :  { %3000 = vst [vmem:[%s5363_s5 + $0x138] sm:$0xff] %v2936_v49 }
 0x308   :  { %2999 = vst [vmem:[%s5363_s5 + $0x130] sm:$0xff] %v2935_v9 }
 0x30c   :  { %v3735_v37 = vpop.f32.mrb[104].mxu1 }
 0x30d   :  { %v2938_v54 = vadd.f32 %v3735_v37, %v5090_v36  ;;  %v2771_v55 = vpop.f32.mrb[105].mxu1 }
 0x30e   :  { %v2937_v14 = vadd.f32 %v5090_v36, %v2771_v55 }
 0x30f   :  { %3002 = vst [vmem:[%s5363_s5 + $0x148] sm:$0xff] %v2938_v54 }
 0x310   :  { %3001 = vst [vmem:[%s5363_s5 + $0x140] sm:$0xff] %v2937_v14 }
 0x314   :  { %v3738_v58 = vpop.f32.mrb[106].mxu1 }
 0x315   :  { %v2940_v60 = vadd.f32 %v3738_v58, %v5090_v36  ;;  %v2781_v18 = vpop.f32.mrb[107].mxu1 }
 0x316   :  { %v2939_v45 = vadd.f32 %v5090_v36, %v2781_v18 }
 0x317   :  { %3004 = vst [vmem:[%s5363_s5 + $0x158] sm:$0xff] %v2940_v60 }
 0x318   :  { %3003 = vst [vmem:[%s5363_s5 + $0x150] sm:$0xff] %v2939_v45 }
 0x31c   :  { %v3741_v52 = vpop.f32.mrb[108].mxu1 }
 0x31d   :  { %v2942_v61 = vadd.f32 %v3741_v52, %v5090_v36  ;;  %v2791_v1 = vpop.f32.mrb[109].mxu1 }
 0x31e   :  { %v2941_v23 = vadd.f32 %v5090_v36, %v2791_v1 }
 0x31f   :  { %3006 = vst [vmem:[%s5363_s5 + $0x168] sm:$0xff] %v2942_v61 }
 0x320   :  { %3005 = vst [vmem:[%s5363_s5 + $0x160] sm:$0xff] %v2941_v23 }
 0x324   :  { %v3744_v29 = vpop.f32.mrb[110].mxu1 }
 0x325   :  { %v2944_v2 = vadd.f32 %v3744_v29, %v5090_v36  ;;  %v2801_v28 = vpop.f32.mrb[111].mxu1 }
 0x326   :  { %v2943_v3 = vadd.f32 %v5090_v36, %v2801_v28 }
 0x327   :  { %3008 = vst [vmem:[%s5363_s5 + $0x178] sm:$0xff] %v2944_v2 }
 0x328   :  { %3007 = vst [vmem:[%s5363_s5 + $0x170] sm:$0xff] %v2943_v3 }
 0x32c   :  { %v3747_v32 = vpop.f32.mrb[112].mxu1 }
 0x32d   :  { %v2946_v43 = vadd.f32 %v3747_v32, %v5090_v36  ;;  %v2811_v6 = vpop.f32.mrb[113].mxu1 }
 0x32e   :  { %v2945_v7 = vadd.f32 %v5090_v36, %v2811_v6 }
 0x32f   :  { %3010 = vst [vmem:[%s5363_s5 + $0x188] sm:$0xff] %v2946_v43 }
 0x330   :  { %3009 = vst [vmem:[%s5363_s5 + $0x180] sm:$0xff] %v2945_v7 }
 0x334   :  { %v3750_v35 = vpop.f32.mrb[114].mxu1 }
 0x335   :  { %v2948_v51 = vadd.f32 %v3750_v35, %v5090_v36  ;;  %v2821_v57 = vpop.f32.mrb[115].mxu1 }
 0x336   :  { %v2947_v8 = vadd.f32 %v5090_v36, %v2821_v57 }
 0x337   :  { %3012 = vst [vmem:[%s5363_s5 + $0x198] sm:$0xff] %v2948_v51 }
 0x338   :  { %3011 = vst [vmem:[%s5363_s5 + $0x190] sm:$0xff] %v2947_v8 }
 0x33c   :  { %v3753_v11 = vpop.f32.mrb[116].mxu1 }
 0x33d   :  { %v2950_v38 = vadd.f32 %v3753_v11, %v5090_v36  ;;  %v2831_v12 = vpop.f32.mrb[117].mxu1 }
 0x33e   :  { %v2949_v13 = vadd.f32 %v5090_v36, %v2831_v12 }
 0x33f   :  { %3014 = vst [vmem:[%s5363_s5 + $0x1a8] sm:$0xff] %v2950_v38 }
 0x340   :  { %3013 = vst [vmem:[%s5363_s5 + $0x1a0] sm:$0xff] %v2949_v13 }
 0x344   :  { %v3756_v41 = vpop.f32.mrb[118].mxu1 }
 0x345   :  { %v2952_v0 = vadd.f32 %v3756_v41, %v5090_v36  ;;  %v2841_v16 = vpop.f32.mrb[119].mxu1 }
 0x346   :  { %v2951_v63 = vadd.f32 %v5090_v36, %v2841_v16 }
 0x347   :  { %3016 = vst [vmem:[%s5363_s5 + $0x1b8] sm:$0xff] %v2952_v0 }
 0x348   :  { %3015 = vst [vmem:[%s5363_s5 + $0x1b0] sm:$0xff] %v2951_v63 }
 0x34c   :  { %v3759_v44 = vpop.f32.mrb[120].mxu1 }
 0x34d   :  { %v2954_v5 = vadd.f32 %v3759_v44, %v5090_v36  ;;  %v2851_v17 = vpop.f32.mrb[121].mxu1 }
 0x34e   :  { %v2953_v20 = vadd.f32 %v5090_v36, %v2851_v17 }
 0x34f   :  { %3018 = vst [vmem:[%s5363_s5 + $0x1c8] sm:$0xff] %v2954_v5 }
 0x350   :  { %3017 = vst [vmem:[%s5363_s5 + $0x1c0] sm:$0xff] %v2953_v20 }
 0x354   :  { %v3762_v47 = vpop.f32.mrb[122].mxu1 }
 0x355   :  { %v2956_v21 = vadd.f32 %v3762_v47, %v5090_v36  ;;  %v2861_v22 = vpop.f32.mrb[123].mxu1 }
 0x356   :  { %v2955_v50 = vadd.f32 %v5090_v36, %v2861_v22 }
 0x357   :  { %3020 = vst [vmem:[%s5363_s5 + $0x1d8] sm:$0xff] %v2956_v21 }
 0x358   :  { %3019 = vst [vmem:[%s5363_s5 + $0x1d0] sm:$0xff] %v2955_v50 }
 0x35c   :  { %v3765_v25 = vpop.f32.mrb[124].mxu1 }
 0x35d   :  { %v2958_v10 = vadd.f32 %v3765_v25, %v5090_v36  ;;  %v2871_v26 = vpop.f32.mrb[125].mxu1 }
 0x35e   :  { %v2957_v15 = vadd.f32 %v5090_v36, %v2871_v26 }
 0x35f   :  { %3022 = vst [vmem:[%s5363_s5 + $0x1e8] sm:$0xff] %v2958_v10 }
 0x360   :  { %3021 = vst [vmem:[%s5363_s5 + $0x1e0] sm:$0xff] %v2957_v15 }
 0x364   :  { %v3768_v53 = vpop.f32.mrb[126].mxu1 }
 0x365   :  { %v2960_v27 = vadd.f32 %v3768_v53, %v5090_v36  ;;  %v2881_v31 = vpop.f32.mrb[127].mxu1 }
 0x366   :  { %v2959_v56 = vadd.f32 %v5090_v36, %v2881_v31 }
 0x367   :  { %3024 = vst [vmem:[%s5363_s5 + $0x1f8] sm:$0xff] %v2960_v27 }
 0x368   :  { %3023 = vst [vmem:[%s5363_s5 + $0x1f0] sm:$0xff] %v2959_v56 }

// kernel: model_forward.2
= control target key start
LH: loop header
LB: loop body
LE: loop exit
PB: predicated region body
PF: predicated region fallthrough
CT: control target
= control target key end

     0   :  { %v4889_v0 = vmov 0   ;;  %s5901_s1 = inlined_call_operand.vmem [shape: bf16[512,128], index: 1, kind: input, shape index: {}]   ;;  %s5902_s0 = inlined_call_operand.vmem [shape: bf16[512,512], index: 0, kind: input, shape index: {}]   ;;  %s5903_s3 = inlined_call_operand.vmem [shape: f32[128,128], index: 3, kind: input, shape index: {}]   ;;  %s5904_s2 = inlined_call_operand.vmem [shape: f32[128,128], index: 2, kind: input, shape index: {}]   ;;  %s5905_s4 = inlined_call_operand.vmem [shape: f32[1,128], index: 4, kind: input, shape index: {}]   ;;  %s5906_s5 = inlined_call_operand.vmem [shape: bf16[512,128], index: 5, kind: output, shape index: {}]  }
   0x1   :  { %1182 = vmatprep.subr.bf16.mxu0 %v4889_v0  ;;  %v4665_v1 = vld [vmem:[%s5901_s1] sm:$0xff]   ;;  %4472 = vmatprep.subr.bf16.mxu1 %v4889_v0  ;;  %v4666_v2 = vld [vmem:[%s5901_s1 + $0x8] sm:$0xff]   ;;  %v4667_v3 = vld [vmem:[%s5901_s1 + $0x10] sm:$0xff]  }
   0x2   :  { %1183 = vmatpush1.bf16.msra.mxu0 %v4665_v1  ;;  %4488 = vmatpush1.bf16.msra.mxu1 %v4665_v1  ;;  %v4668_v4 = vld [vmem:[%s5901_s1 + $0x18] sm:$0xff]   ;;  %v4669_v5 = vld [vmem:[%s5901_s1 + $0x20] sm:$0xff]   ;;  %v4670_v7 = vld [vmem:[%s5901_s1 + $0x28] sm:$0xff]  }
   0x3   :  { %1184 = vmatprep.subr.bf16.mxu0 %v4889_v0  ;;  %4473 = vmatprep.subr.bf16.mxu1 %v4889_v0  ;;  %v4683_v6 = vld [vmem:[%s5902_s0 + $0x4] ss:$16 sps:$4 sm:$0xff]   ;;  %v4672_v9 = vld [vmem:[%s5901_s1 + $0x38] sm:$0xff]   ;;  %v4674_v11 = vld [vmem:[%s5901_s1 + $0x48] sm:$0xff]  }
   0x4   :  { %1214 = vmatprep.mubr.bf16.mxu0 %v4683_v6  ;;  %v4671_v8 = vld [vmem:[%s5901_s1 + $0x30] sm:$0xff]   ;;  %v4673_v10 = vld [vmem:[%s5901_s1 + $0x40] sm:$0xff]   ;;  %v4676_v13 = vld [vmem:[%s5901_s1 + $0x58] sm:$0xff]  }
   0x5   :  { %v4675_v12 = vld [vmem:[%s5901_s1 + $0x50] sm:$0xff]   ;;  %v4677_v15 = vld [vmem:[%s5901_s1 + $0x60] sm:$0xff]   ;;  %v4678_v16 = vld [vmem:[%s5901_s1 + $0x68] sm:$0xff]  }
   0x6   :  { %1185 = vmatpush1.bf16.msra.mxu0 %v4666_v2  ;;  %4489 = vmatpush1.bf16.msra.mxu1 %v4666_v2  ;;  %v4727_v14 = vld [vmem:[%s5902_s0 + $0x204] ss:$16 sps:$4 sm:$0xff]   ;;  %v4680_v18 = vld [vmem:[%s5901_s1 + $0x78] sm:$0xff]   ;;  %v4681_v19 = vld [vmem:[%s5902_s0] ss:$16 sps:$4 sm:$0xff]  }
   0x7   :  { %1186 = vmatprep.subr.bf16.mxu0 %v4889_v0  ;;  %4474 = vmatprep.subr.bf16.mxu1 %v4889_v0  ;;  %v4679_v17 = vld [vmem:[%s5901_s1 + $0x70] sm:$0xff]   ;;  %v4684_v20 = vld [vmem:[%s5901_s1 + $0x80] sm:$0xff]   ;;  %v4688_v24 = vld [vmem:[%s5901_s1 + $0x88] sm:$0xff]  }
   0x8   :  { %1342 = vmatprep.mubr.bf16.mxu1 %v4727_v14  ;;  %v4725_v21 = vld [vmem:[%s5902_s0 + $0x200] ss:$16 sps:$4 sm:$0xff]   ;;  %v4685_v22 = vld [vmem:[%s5902_s0 + $0x24] ss:$16 sps:$4 sm:$0xff]   ;;  %v4696_v30 = vld [vmem:[%s5901_s1 + $0x98] sm:$0xff]  }
   0x9   :  { %v4732_v23 = vld [vmem:[%s5902_s0 + $0x224] ss:$16 sps:$4 sm:$0xff]   ;;  %v4687_v25 = vld [vmem:[%s5902_s0 + $0x20] ss:$16 sps:$4 sm:$0xff]   ;;  %v4704_v36 = vld [vmem:[%s5901_s1 + $0xa8] sm:$0xff]  }
   0xa   :  { %1187 = vmatpush1.bf16.msra.mxu0 %v4667_v3  ;;  %4490 = vmatpush1.bf16.msra.mxu1 %v4667_v3  ;;  %v4734_v26 = vld [vmem:[%s5902_s0 + $0x220] ss:$16 sps:$4 sm:$0xff]   ;;  %v4689_v27 = vld [vmem:[%s5902_s0 + $0x44] ss:$16 sps:$4 sm:$0xff]   ;;  %v4712_v42 = vld [vmem:[%s5901_s1 + $0xb8] sm:$0xff]  }
   0xb   :  { %1188 = vmatprep.subr.bf16.mxu0 %v4889_v0  ;;  %4475 = vmatprep.subr.bf16.mxu1 %v4889_v0  ;;  %v4692_v28 = vld [vmem:[%s5901_s1 + $0x90] sm:$0xff]   ;;  %v4700_v34 = vld [vmem:[%s5901_s1 + $0xa0] sm:$0xff]   ;;  %v4720_v48 = vld [vmem:[%s5901_s1 + $0xc8] sm:$0xff]  }
   0xc   :  { %v4739_v29 = vld [vmem:[%s5902_s0 + $0x244] ss:$16 sps:$4 sm:$0xff]   ;;  %v4691_v31 = vld [vmem:[%s5902_s0 + $0x40] ss:$16 sps:$4 sm:$0xff]   ;;  %v4731_v54 = vld [vmem:[%s5901_s1 + $0xd8] sm:$0xff]  }
   0xd   :  { %v4741_v32 = vld [vmem:[%s5902_s0 + $0x240] ss:$16 sps:$4 sm:$0xff]   ;;  %v4693_v33 = vld [vmem:[%s5902_s0 + $0x64] ss:$16 sps:$4 sm:$0xff]   ;;  %v4745_v60 = vld [vmem:[%s5901_s1 + $0xe8] sm:$0xff]  }
   0xe   :  { %1189 = vmatpush1.bf16.msra.mxu0 %v4668_v4  ;;  %4491 = vmatpush1.bf16.msra.mxu1 %v4668_v4  ;;  %v4746_v35 = vld [vmem:[%s5902_s0 + $0x264] ss:$16 sps:$4 sm:$0xff]   ;;  %v4695_v37 = vld [vmem:[%s5902_s0 + $0x60] ss:$16 sps:$4 sm:$0xff]   ;;  %v2105_v62 = vld [vmem:[%s5903_s3 + $0x8] sm:$0xff] }
   0xf   :  { %1190 = vmatprep.subr.bf16.mxu0 %v4889_v0  ;;  %4476 = vmatprep.subr.bf16.mxu1 %v4889_v0  ;;  %v4748_v38 = vld [vmem:[%s5902_s0 + $0x260] ss:$16 sps:$4 sm:$0xff]   ;;  %v4697_v39 = vld [vmem:[%s5902_s0 + $0x84] ss:$16 sps:$4 sm:$0xff]  }
  0x10   :  { %v4708_v40 = vld [vmem:[%s5901_s1 + $0xb0] sm:$0xff]   ;;  %v4716_v46 = vld [vmem:[%s5901_s1 + $0xc0] sm:$0xff]  }
  0x11   :  { %v4753_v41 = vld [vmem:[%s5902_s0 + $0x284] ss:$16 sps:$4 sm:$0xff]   ;;  %v4699_v43 = vld [vmem:[%s5902_s0 + $0x80] ss:$16 sps:$4 sm:$0xff]  }
  0x12   :  { %1191 = vmatpush1.bf16.msra.mxu0 %v4669_v5  ;;  %4492 = vmatpush1.bf16.msra.mxu1 %v4669_v5  ;;  %v4755_v44 = vld [vmem:[%s5902_s0 + $0x280] ss:$16 sps:$4 sm:$0xff]   ;;  %v4701_v45 = vld [vmem:[%s5902_s0 + $0xa4] ss:$16 sps:$4 sm:$0xff]  }
  0x13   :  { %1192 = vmatprep.subr.bf16.mxu0 %v4889_v0  ;;  %4477 = vmatprep.subr.bf16.mxu1 %v4889_v0  ;;  %v4760_v47 = vld [vmem:[%s5902_s0 + $0x2a4] ss:$16 sps:$4 sm:$0xff]   ;;  %v4703_v49 = vld [vmem:[%s5902_s0 + $0xa0] ss:$16 sps:$4 sm:$0xff]  }
  0x14   :  { %v4762_v50 = vld [vmem:[%s5902_s0 + $0x2a0] ss:$16 sps:$4 sm:$0xff]   ;;  %v4705_v51 = vld [vmem:[%s5902_s0 + $0xc4] ss:$16 sps:$4 sm:$0xff]  }
  0x15   :  { %v4724_v52 = vld [vmem:[%s5901_s1 + $0xd0] sm:$0xff]   ;;  %v4738_v58 = vld [vmem:[%s5901_s1 + $0xe0] sm:$0xff]  }
  0x16   :  { %1193 = vmatpush1.bf16.msra.mxu0 %v4670_v7  ;;  %4493 = vmatpush1.bf16.msra.mxu1 %v4670_v7  ;;  %v4766_v53 = vld [vmem:[%s5902_s0 + $0x2c4] ss:$16 sps:$4 sm:$0xff]   ;;  %v4707_v55 = vld [vmem:[%s5902_s0 + $0xc0] ss:$16 sps:$4 sm:$0xff]   ;;  %v2107_v7 = vld [vmem:[%s5903_s3 + $0x18] sm:$0xff] }
  0x17   :  { %1194 = vmatprep.subr.bf16.mxu0 %v4889_v0  ;;  %4478 = vmatprep.subr.bf16.mxu1 %v4889_v0  ;;  %v4768_v56 = vld [vmem:[%s5902_s0 + $0x2c0] ss:$16 sps:$4 sm:$0xff]   ;;  %v4709_v57 = vld [vmem:[%s5902_s0 + $0xe4] ss:$16 sps:$4 sm:$0xff]  }
  0x18   :  { %v4772_v59 = vld [vmem:[%s5902_s0 + $0x2e4] ss:$16 sps:$4 sm:$0xff]   ;;  %v4711_v1 = vld [vmem:[%s5902_s0 + $0xe0] ss:$16 sps:$4 sm:$0xff]  }
  0x19   :  { %v2104_v61 = vld [vmem:[%s5903_s3] sm:$0xff]  ;;  %v4752_v4 = vld [vmem:[%s5901_s1 + $0xf0] sm:$0xff]  }
  0x1a   :  { %1195 = vmatpush1.bf16.msra.mxu0 %v4671_v8  ;;  %4494 = vmatpush1.bf16.msra.mxu1 %v4671_v8  ;;  %v4408_v63 = vpack.c.bf16 %v2105_v62, %v2104_v61  ;;  %v4774_v2 = vld [vmem:[%s5902_s0 + $0x2e0] ss:$16 sps:$4 sm:$0xff]   ;;  %v4713_v3 = vld [vmem:[%s5902_s0 + $0x104] ss:$16 sps:$4 sm:$0xff]   ;;  %v4763_v61 = vld [vmem:[%s5902_s0 + $0x8] ss:$16 sps:$4 sm:$0xff]  }
  0x1b   :  { %1196 = vmatprep.subr.bf16.mxu0 %v4889_v0  ;;  %4479 = vmatprep.subr.bf16.mxu1 %v4889_v0  ;;  %v4778_v5 = vld [vmem:[%s5902_s0 + $0x304] ss:$16 sps:$4 sm:$0xff]   ;;  %v4780_v14 = vld [vmem:[%s5902_s0 + $0x300] ss:$16 sps:$4 sm:$0xff]  }
  0x1c   :  { %v2106_v6 = vld [vmem:[%s5903_s3 + $0x10] sm:$0xff] }
  0x1d   :  { %v4412_v8 = vpack.c.bf16 %v2107_v7, %v2106_v6  ;;  %v4771_v6 = vld [vmem:[%s5902_s0 + $0x28] ss:$16 sps:$4 sm:$0xff]  }
  0x1e   :  { %1197 = vmatpush1.bf16.msra.mxu0 %v4672_v9  ;;  %4495 = vmatpush1.bf16.msra.mxu1 %v4672_v9  ;;  %v2108_v9 = vld [vmem:[%s5903_s3 + $0x20] sm:$0xff] }
  0x1f   :  { %1198 = vmatprep.subr.bf16.mxu0 %v4889_v0  ;;  %4480 = vmatprep.subr.bf16.mxu1 %v4889_v0 }
  0x22   :  { %1199 = vmatpush1.bf16.msra.mxu0 %v4673_v10  ;;  %4496 = vmatpush1.bf16.msra.mxu1 %v4673_v10  ;;  %v4759_v10 = vld [vmem:[%s5901_s1 + $0xf8] sm:$0xff]  }
  0x23   :  { %1200 = vmatprep.subr.bf16.mxu0 %v4889_v0  ;;  %4481 = vmatprep.subr.bf16.mxu1 %v4889_v0 }
  0x26   :  { %1201 = vmatpush1.bf16.msra.mxu0 %v4674_v11  ;;  %4497 = vmatpush1.bf16.msra.mxu1 %v4674_v11  ;;  %v2109_v11 = vld [vmem:[%s5903_s3 + $0x28] sm:$0xff] }
  0x27   :  { %1202 = vmatprep.subr.bf16.mxu0 %v4889_v0  ;;  %4482 = vmatprep.subr.bf16.mxu1 %v4889_v0 }
  0x2a   :  { %1203 = vmatpush1.bf16.msra.mxu0 %v4675_v12  ;;  %4498 = vmatpush1.bf16.msra.mxu1 %v4675_v12  ;;  %v4416_v12 = vpack.c.bf16 %v2109_v11, %v2108_v9 }
  0x2b   :  { %1204 = vmatprep.subr.bf16.mxu0 %v4889_v0  ;;  %4483 = vmatprep.subr.bf16.mxu1 %v4889_v0 }
  0x2e   :  { %1205 = vmatpush1.bf16.msra.mxu0 %v4676_v13  ;;  %4499 = vmatpush1.bf16.msra.mxu1 %v4676_v13  ;;  %v4715_v13 = vld [vmem:[%s5902_s0 + $0x100] ss:$16 sps:$4 sm:$0xff]  }
  0x2f   :  { %1206 = vmatprep.subr.bf16.mxu0 %v4889_v0  ;;  %4484 = vmatprep.subr.bf16.mxu1 %v4889_v0 }
  0x32   :  { %1207 = vmatpush1.bf16.msra.mxu0 %v4677_v15  ;;  %4500 = vmatpush1.bf16.msra.mxu1 %v4677_v15  ;;  %v4717_v15 = vld [vmem:[%s5902_s0 + $0x124] ss:$16 sps:$4 sm:$0xff]  }
  0x33   :  { %1208 = vmatprep.subr.bf16.mxu0 %v4889_v0  ;;  %4485 = vmatprep.subr.bf16.mxu1 %v4889_v0 }
  0x36   :  { %1209 = vmatpush1.bf16.msra.mxu0 %v4678_v16  ;;  %4501 = vmatpush1.bf16.msra.mxu1 %v4678_v16  ;;  %v2110_v16 = vld [vmem:[%s5903_s3 + $0x30] sm:$0xff] }
  0x37   :  { %1210 = vmatprep.subr.bf16.mxu0 %v4889_v0  ;;  %4486 = vmatprep.subr.bf16.mxu1 %v4889_v0 }
  0x3a   :  { %1211 = vmatpush1.bf16.msra.mxu0 %v4679_v17  ;;  %4502 = vmatpush1.bf16.msra.mxu1 %v4679_v17  ;;  %v2111_v17 = vld [vmem:[%s5903_s3 + $0x38] sm:$0xff] }
  0x3b   :  { %1212 = vmatprep.subr.bf16.mxu0 %v4889_v0  ;;  %4487 = vmatprep.subr.bf16.mxu1 %v4889_v0 }
  0x3e   :  { %1213 = vmatpush1.bf16.msra.mxu0 %v4680_v18  ;;  %4503 = vmatpush1.bf16.msra.mxu1 %v4680_v18  ;;  %v4420_v18 = vpack.c.bf16 %v2111_v17, %v2110_v16  ;;  %v3935_v17 = vld [vmem:[%s5901_s1 + $0x30] sm:$0xff]  }
  0x3f   :  { %1471 = vmatprep.subr.bf16.mxu0 %v4889_v0  ;;  %4409 = vmatprep.subr.bf16.mxu1 %v4408_v63 }
  0x41   :  { %1215 = vmatmul.mubr.bf16.vlgmr.msra.gmra.mrb[0].mxu0 %v4681_v19  ;;  %1343 = vmatmul.mubr.bf16.vlgmr.msra.gmra.mrb[0].mxu1 %v4725_v21  ;;  %v2112_v19 = vld [vmem:[%s5903_s3 + $0x40] sm:$0xff] }
  0x42   :  { %1472 = vmatpush1.bf16.msra.mxu0 %v4684_v20  ;;  %1222 = vmatprep.mubr.bf16.mxu0 %v4685_v22  ;;  %v2113_v20 = vld [vmem:[%s5903_s3 + $0x48] sm:$0xff]  ;;  %v4719_v22 = vld [vmem:[%s5902_s0 + $0x120] ss:$16 sps:$4 sm:$0xff]  }
  0x43   :  { %1473 = vmatprep.subr.bf16.mxu0 %v4889_v0  ;;  %1350 = vmatprep.mubr.bf16.mxu1 %v4732_v23  ;;  %v4424_v21 = vpack.c.bf16 %v2113_v20, %v2112_v19  ;;  %v4786_v23 = vld [vmem:[%s5902_s0 + $0x320] ss:$16 sps:$4 sm:$0xff]   ;;  %v3668_v19 = vunpack.c.l.bf16 %v3935_v17  ;;  %v3936_v20 = vld [vmem:[%s5901_s1 + $0x38] sm:$0xff]  }
  0x44   :  { %4411 = vmatpush3.bf16.msra.mxu1 %v4408_v63  ;;  %v4769_v63 = vld [vmem:[%s5902_s0 + $0x2c] ss:$16 sps:$4 sm:$0xff]  }
  0x45   :  { %4413 = vmatprep.subr.bf16.mxu1 %v4412_v8 }
  0x46   :  { %1474 = vmatpush1.bf16.msra.mxu0 %v4688_v24  ;;  %v4721_v24 = vld [vmem:[%s5902_s0 + $0x144] ss:$16 sps:$4 sm:$0xff]  }
  0x47   :  { %1475 = vmatprep.subr.bf16.mxu0 %v4889_v0 }
  0x48   :  { %4415 = vmatpush3.bf16.msra.mxu1 %v4412_v8  ;;  %v4775_v8 = vld [vmem:[%s5902_s0 + $0x4c] ss:$16 sps:$4 sm:$0xff]  }
  0x49   :  { %1223 = vmatmul.mubr.bf16.gmra.mrb[4].mxu0 %v4687_v25  ;;  %1351 = vmatmul.mubr.bf16.gmra.mrb[4].mxu1 %v4734_v26  ;;  %v4790_v25 = vld [vmem:[%s5902_s0 + $0x344] ss:$16 sps:$4 sm:$0xff]  }
  0x4a   :  { %1230 = vmatprep.mubr.bf16.mxu0 %v4689_v27  ;;  %1476 = vmatpush1.bf16.msra.mxu0 %v4692_v28  ;;  %v2114_v26 = vld [vmem:[%s5903_s3 + $0x50] sm:$0xff]  ;;  %v2115_v27 = vld [vmem:[%s5903_s3 + $0x58] sm:$0xff] }
  0x4b   :  { %1477 = vmatprep.subr.bf16.mxu0 %v4889_v0  ;;  %1358 = vmatprep.mubr.bf16.mxu1 %v4739_v29  ;;  %v4428_v28 = vpack.c.bf16 %v2115_v27, %v2114_v26  ;;  %v2116_v29 = vld [vmem:[%s5903_s3 + $0x60] sm:$0xff]  ;;  %v3673_v26 = vunpack.c.h.bf16 %v3936_v20 }
  0x4c   :  { %4417 = vmatprep.subr.bf16.mxu1 %v4416_v12 }
  0x4d   :  { %4419 = vmatpush3.bf16.msra.mxu1 %v4416_v12 }
  0x4e   :  { %1478 = vmatpush1.bf16.msra.mxu0 %v4696_v30  ;;  %4421 = vmatprep.subr.bf16.mxu1 %v4420_v18  ;;  %v2117_v30 = vld [vmem:[%s5903_s3 + $0x68] sm:$0xff] }
  0x4f   :  { %1479 = vmatprep.subr.bf16.mxu0 %v4889_v0 }
  0x51   :  { %1231 = vmatmul.mubr.bf16.gmra.mrb[8].mxu0 %v4691_v31  ;;  %1359 = vmatmul.mubr.bf16.gmra.mrb[8].mxu1 %v4741_v32  ;;  %v4432_v31 = vpack.c.bf16 %v2117_v30, %v2116_v29  ;;  %v4723_v32 = vld [vmem:[%s5902_s0 + $0x140] ss:$16 sps:$4 sm:$0xff]   ;;  %v4789_v29 = vld [vmem:[%s5902_s0 + $0x88] ss:$16 sps:$4 sm:$0xff]  }
  0x52   :  { %1238 = vmatprep.mubr.bf16.mxu0 %v4693_v33  ;;  %1480 = vmatpush1.bf16.msra.mxu0 %v4700_v34  ;;  %v4792_v33 = vld [vmem:[%s5902_s0 + $0x340] ss:$16 sps:$4 sm:$0xff]   ;;  %v4728_v34 = vld [vmem:[%s5902_s0 + $0x164] ss:$16 sps:$4 sm:$0xff]  }
  0x53   :  { %1481 = vmatprep.subr.bf16.mxu0 %v4889_v0  ;;  %1366 = vmatprep.mubr.bf16.mxu1 %v4746_v35  ;;  %v4796_v35 = vld [vmem:[%s5902_s0 + $0x364] ss:$16 sps:$4 sm:$0xff]  }
  0x54   :  { %4423 = vmatpush3.bf16.msra.mxu1 %v4420_v18 }
  0x55   :  { %4425 = vmatprep.subr.bf16.mxu1 %v4424_v21 }
  0x56   :  { %1482 = vmatpush1.bf16.msra.mxu0 %v4704_v36  ;;  %v2118_v36 = vld [vmem:[%s5903_s3 + $0x70] sm:$0xff] }
  0x57   :  { %1483 = vmatprep.subr.bf16.mxu0 %v4889_v0 }
  0x58   :  { %4427 = vmatpush3.bf16.msra.mxu1 %v4424_v21  ;;  %v4783_v21 = vld [vmem:[%s5902_s0 + $0x68] ss:$16 sps:$4 sm:$0xff]  }
  0x59   :  { %1239 = vmatmul.mubr.bf16.gmra.mrb[12].mxu0 %v4695_v37  ;;  %1367 = vmatmul.mubr.bf16.gmra.mrb[12].mxu1 %v4748_v38  ;;  %v2119_v37 = vld [vmem:[%s5903_s3 + $0x78] sm:$0xff] }
  0x5a   :  { %1246 = vmatprep.mubr.bf16.mxu0 %v4697_v39  ;;  %1484 = vmatpush1.bf16.msra.mxu0 %v4708_v40  ;;  %v4436_v38 = vpack.c.bf16 %v2119_v37, %v2118_v36  ;;  %v4730_v39 = vld [vmem:[%s5902_s0 + $0x160] ss:$16 sps:$4 sm:$0xff]   ;;  %v3940_v36 = vld [vmem:[%s5901_s1 + $0x58] sm:$0xff]  }
  0x5b   :  { %1485 = vmatprep.subr.bf16.mxu0 %v4889_v0  ;;  %1374 = vmatprep.mubr.bf16.mxu1 %v4753_v41  ;;  %v4798_v40 = vld [vmem:[%s5902_s0 + $0x360] ss:$16 sps:$4 sm:$0xff]   ;;  %v4735_v41 = vld [vmem:[%s5902_s0 + $0x184] ss:$16 sps:$4 sm:$0xff]   ;;  %v4795_v37 = vld [vmem:[%s5902_s0 + $0xa8] ss:$16 sps:$4 sm:$0xff]  }
  0x5c   :  { %4429 = vmatprep.subr.bf16.mxu1 %v4428_v28 }
  0x5d   :  { %4431 = vmatpush3.bf16.msra.mxu1 %v4428_v28  ;;  %v3938_v28 = vld [vmem:[%s5901_s1 + $0x48] sm:$0xff]  }
  0x5e   :  { %1486 = vmatpush1.bf16.msra.mxu0 %v4712_v42  ;;  %4433 = vmatprep.subr.bf16.mxu1 %v4432_v31  ;;  %v4802_v42 = vld [vmem:[%s5902_s0 + $0x384] ss:$16 sps:$4 sm:$0xff]  }
  0x5f   :  { %1487 = vmatprep.subr.bf16.mxu0 %v4889_v0 }
  0x61   :  { %1247 = vmatmul.mubr.bf16.gmra.mrb[16].mxu0 %v4699_v43  ;;  %1375 = vmatmul.mubr.bf16.gmra.mrb[16].mxu1 %v4755_v44  ;;  %v4737_v43 = vld [vmem:[%s5902_s0 + $0x180] ss:$16 sps:$4 sm:$0xff]  }
  0x62   :  { %1254 = vmatprep.mubr.bf16.mxu0 %v4701_v45  ;;  %1488 = vmatpush1.bf16.msra.mxu0 %v4716_v46  ;;  %v4804_v44 = vld [vmem:[%s5902_s0 + $0x380] ss:$16 sps:$4 sm:$0xff]   ;;  %v4742_v45 = vld [vmem:[%s5902_s0 + $0x1a4] ss:$16 sps:$4 sm:$0xff]  }
  0x63   :  { %1489 = vmatprep.subr.bf16.mxu0 %v4889_v0  ;;  %1382 = vmatprep.mubr.bf16.mxu1 %v4760_v47  ;;  %v4808_v46 = vld [vmem:[%s5902_s0 + $0x3a4] ss:$16 sps:$4 sm:$0xff]   ;;  %v4744_v47 = vld [vmem:[%s5902_s0 + $0x1a0] ss:$16 sps:$4 sm:$0xff]  }
  0x64   :  { %4435 = vmatpush3.bf16.msra.mxu1 %v4432_v31  ;;  %v4793_v31 = vld [vmem:[%s5902_s0 + $0xac] ss:$16 sps:$4 sm:$0xff]  }
  0x65   :  { %4437 = vmatprep.subr.bf16.mxu1 %v4436_v38 }
  0x66   :  { %1490 = vmatpush1.bf16.msra.mxu0 %v4720_v48  ;;  %v4810_v48 = vld [vmem:[%s5902_s0 + $0x3a0] ss:$16 sps:$4 sm:$0xff]  }
  0x67   :  { %1491 = vmatprep.subr.bf16.mxu0 %v4889_v0 }
  0x68   :  { %4439 = vmatpush3.bf16.msra.mxu1 %v4436_v38 }
  0x69   :  { %1255 = vmatmul.mubr.bf16.gmra.mrb[20].mxu0 %v4703_v49  ;;  %1383 = vmatmul.mubr.bf16.gmra.mrb[20].mxu1 %v4762_v50  ;;  %v4749_v49 = vld [vmem:[%s5902_s0 + $0x1c4] ss:$16 sps:$4 sm:$0xff]  }
  0x6a   :  { %1262 = vmatprep.mubr.bf16.mxu0 %v4705_v51  ;;  %1492 = vmatpush1.bf16.msra.mxu0 %v4724_v52  ;;  %v4814_v50 = vld [vmem:[%s5902_s0 + $0x3c4] ss:$16 sps:$4 sm:$0xff]   ;;  %v4751_v51 = vld [vmem:[%s5902_s0 + $0x1c0] ss:$16 sps:$4 sm:$0xff]  }
  0x6b   :  { %1493 = vmatprep.subr.bf16.mxu0 %v4889_v0  ;;  %1390 = vmatprep.mubr.bf16.mxu1 %v4766_v53  ;;  %v4816_v52 = vld [vmem:[%s5902_s0 + $0x3c0] ss:$16 sps:$4 sm:$0xff]   ;;  %v4756_v53 = vld [vmem:[%s5902_s0 + $0x1e4] ss:$16 sps:$4 sm:$0xff]  }
  0x6e   :  { %1494 = vmatpush1.bf16.msra.mxu0 %v4731_v54  ;;  %v4820_v54 = vld [vmem:[%s5902_s0 + $0x3e4] ss:$16 sps:$4 sm:$0xff]  }
  0x6f   :  { %1495 = vmatprep.subr.bf16.mxu0 %v4889_v0 }
  0x71   :  { %1263 = vmatmul.mubr.bf16.gmra.mrb[24].mxu0 %v4707_v55  ;;  %1391 = vmatmul.mubr.bf16.gmra.mrb[24].mxu1 %v4768_v56  ;;  %v3643_v55 = vld [vmem:[%s5901_s1] sm:$0xff]  }
  0x72   :  { %1270 = vmatprep.mubr.bf16.mxu0 %v4709_v57  ;;  %1496 = vmatpush1.bf16.msra.mxu0 %v4738_v58  ;;  %v4758_v56 = vld [vmem:[%s5902_s0 + $0x1e0] ss:$16 sps:$4 sm:$0xff]   ;;  %v4765_v58 = vld [vmem:[%s5902_s0 + $0xc] ss:$16 sps:$4 sm:$0xff]   ;;  %v3645_v62 = vunpack.c.h.bf16 %v3643_v55 }
  0x73   :  { %1497 = vmatprep.subr.bf16.mxu0 %v4889_v0  ;;  %1398 = vmatprep.mubr.bf16.mxu1 %v4772_v59  ;;  %v4822_v57 = vld [vmem:[%s5902_s0 + $0x3e0] ss:$16 sps:$4 sm:$0xff]   ;;  %v3644_v59 = vunpack.c.l.bf16 %v3643_v55 }
  0x76   :  { %1498 = vmatpush1.bf16.msra.mxu0 %v4745_v60  ;;  %v3930_v60 = vld [vmem:[%s5901_s1 + $0x8] sm:$0xff]  }
  0x77   :  { %1499 = vmatprep.subr.bf16.mxu0 %v4889_v0 }
  0x79   :  { %1271 = vmatmul.mubr.bf16.gmra.mrb[28].mxu0 %v4711_v1  ;;  %1399 = vmatmul.mubr.bf16.gmra.mrb[28].mxu1 %v4774_v2  ;;  %v3648_v1 = vunpack.c.l.bf16 %v3930_v60  ;;  %v3931_v2 = vld [vmem:[%s5901_s1 + $0x10] sm:$0xff]  }
  0x7a   :  { %1278 = vmatprep.mubr.bf16.mxu0 %v4713_v3  ;;  %1500 = vmatpush1.bf16.msra.mxu0 %v4752_v4  ;;  %v3649_v3 = vunpack.c.h.bf16 %v3930_v60  ;;  %v3652_v4 = vunpack.c.l.bf16 %v3931_v2  ;;  %v3653_v7 = vunpack.c.h.bf16 %v3931_v2  ;;  %v3945_v60 = vld [vmem:[%s5901_s1 + $0x80] sm:$0xff]  }
  0x7b   :  { %1501 = vmatprep.subr.bf16.mxu0 %v4889_v0  ;;  %1406 = vmatprep.mubr.bf16.mxu1 %v4778_v5  ;;  %v4784_v0 = vld [vmem:[%s5902_s0 + $0x324] ss:$16 sps:$4 sm:$0xff]   ;;  %v3932_v5 = vld [vmem:[%s5901_s1 + $0x18] sm:$0xff]  }
  0x7c   :  { %v3656_v9 = vunpack.c.l.bf16 %v3932_v5  ;;  %v3657_v11 = vunpack.c.h.bf16 %v3932_v5  ;;  %v1960_v2 = vld [vmem:[%s5904_s2 + $0x20] sm:$0xff] }
  0x7e   :  { %1502 = vmatpush1.bf16.msra.mxu0 %v4759_v10  ;;  %v3933_v10 = vld [vmem:[%s5901_s1 + $0x20] sm:$0xff]  }
  0x7f   :  { %v3660_v12 = vunpack.c.l.bf16 %v3933_v10 }
  0x81   :  { %1279 = vmatmul.mubr.bf16.gmra.mrb[32].mxu0 %v4715_v13  ;;  %1407 = vmatmul.mubr.bf16.gmra.mrb[32].mxu1 %v4780_v14  ;;  %v3934_v13 = vld [vmem:[%s5901_s1 + $0x28] sm:$0xff]  }
  0x82   :  { %1286 = vmatprep.mubr.bf16.mxu0 %v4717_v15  ;;  %1414 = vmatprep.mubr.bf16.mxu1 %v4784_v0  ;;  %v4777_v14 = vld [vmem:[%s5902_s0 + $0x48] ss:$16 sps:$4 sm:$0xff]   ;;  %v3661_v15 = vunpack.c.h.bf16 %v3933_v10  ;;  %v4781_v0 = vld [vmem:[%s5902_s0 + $0x6c] ss:$16 sps:$4 sm:$0xff]   ;;  %v3664_v16 = vunpack.c.l.bf16 %v3934_v13  ;;  %v3665_v18 = vunpack.c.h.bf16 %v3934_v13 }
  0x83   :  { %v1963_v13 = vld [vmem:[%s5904_s2 + $0x38] sm:$0xff] }
  0x89   :  { %1287 = vmatmul.mubr.bf16.gmra.mrb[36].mxu0 %v4719_v22  ;;  %1415 = vmatmul.mubr.bf16.gmra.mrb[36].mxu1 %v4786_v23  ;;  %v3669_v22 = vunpack.c.h.bf16 %v3935_v17  ;;  %v4787_v23 = vld [vmem:[%s5902_s0 + $0x8c] ss:$16 sps:$4 sm:$0xff]  }
  0x8a   :  { %1294 = vmatprep.mubr.bf16.mxu0 %v4721_v24  ;;  %1422 = vmatprep.mubr.bf16.mxu1 %v4790_v25  ;;  %v3672_v24 = vunpack.c.l.bf16 %v3936_v20  ;;  %v3937_v25 = vld [vmem:[%s5901_s1 + $0x40] sm:$0xff]   ;;  %v4819_v20 = vld [vmem:[%s5902_s0 + $0x128] ss:$16 sps:$4 sm:$0xff]  }
  0x8b   :  { %v3676_v27 = vunpack.c.l.bf16 %v3937_v25  ;;  %v3677_v30 = vunpack.c.h.bf16 %v3937_v25  ;;  %v1966_v25 = vld [vmem:[%s5904_s2 + $0x50] sm:$0xff] }
  0x91   :  { %1295 = vmatmul.mubr.bf16.gmra.mrb[40].mxu0 %v4723_v32  ;;  %1423 = vmatmul.mubr.bf16.gmra.mrb[40].mxu1 %v4792_v33  ;;  %v3680_v32 = vunpack.c.l.bf16 %v3938_v28  ;;  %v3939_v33 = vld [vmem:[%s5901_s1 + $0x50] sm:$0xff]  }
  0x92   :  { %1302 = vmatprep.mubr.bf16.mxu0 %v4728_v34  ;;  %1430 = vmatprep.mubr.bf16.mxu1 %v4796_v35  ;;  %v3681_v34 = vunpack.c.h.bf16 %v3938_v28  ;;  %v3684_v35 = vunpack.c.l.bf16 %v3939_v33  ;;  %v3685_v38 = vunpack.c.h.bf16 %v3939_v33  ;;  %v3950_v33 = vld [vmem:[%s5901_s1 + $0xa8] sm:$0xff]  }
  0x99   :  { %1303 = vmatmul.mubr.bf16.gmra.mrb[44].mxu0 %v4730_v39  ;;  %1431 = vmatmul.mubr.bf16.gmra.mrb[44].mxu1 %v4798_v40  ;;  %v4799_v39 = vld [vmem:[%s5902_s0 + $0xcc] ss:$16 sps:$4 sm:$0xff]   ;;  %v3688_v40 = vunpack.c.l.bf16 %v3940_v36 }
  0x9a   :  { %1310 = vmatprep.mubr.bf16.mxu0 %v4735_v41  ;;  %1438 = vmatprep.mubr.bf16.mxu1 %v4802_v42  ;;  %v3941_v41 = vld [vmem:[%s5901_s1 + $0x60] sm:$0xff]   ;;  %v3689_v42 = vunpack.c.h.bf16 %v3940_v36  ;;  %v4826_v36 = vld [vmem:[%s5902_s0 + $0x16c] ss:$16 sps:$4 sm:$0xff]  }
  0xa1   :  { %1311 = vmatmul.mubr.bf16.gmra.mrb[48].mxu0 %v4737_v43  ;;  %1439 = vmatmul.mubr.bf16.gmra.mrb[48].mxu1 %v4804_v44  ;;  %v3692_v43 = vunpack.c.l.bf16 %v3941_v41  ;;  %v3942_v44 = vld [vmem:[%s5901_s1 + $0x68] sm:$0xff]  }
  0xa2   :  { %1318 = vmatprep.mubr.bf16.mxu0 %v4742_v45  ;;  %1446 = vmatprep.mubr.bf16.mxu1 %v4808_v46  ;;  %v4801_v45 = vld [vmem:[%s5902_s0 + $0xc8] ss:$16 sps:$4 sm:$0xff]   ;;  %v3693_v46 = vunpack.c.h.bf16 %v3941_v41  ;;  %v3729_v41 = vunpack.c.h.bf16 %v3950_v33 }
  0xa9   :  { %1319 = vmatmul.mubr.bf16.gmra.mrb[52].mxu0 %v4744_v47  ;;  %1447 = vmatmul.mubr.bf16.gmra.mrb[52].mxu1 %v4810_v48  ;;  %v4805_v47 = vld [vmem:[%s5902_s0 + $0xec] ss:$16 sps:$4 sm:$0xff]   ;;  %v3696_v48 = vunpack.c.l.bf16 %v3942_v44 }
  0xaa   :  { %1326 = vmatprep.mubr.bf16.mxu0 %v4749_v49  ;;  %1454 = vmatprep.mubr.bf16.mxu1 %v4814_v50  ;;  %v3943_v49 = vld [vmem:[%s5901_s1 + $0x70] sm:$0xff]   ;;  %v3697_v50 = vunpack.c.h.bf16 %v3942_v44  ;;  %v3952_v44 = vld [vmem:[%s5901_s1 + $0xb8] sm:$0xff]  }
  0xb1   :  { %1327 = vmatmul.mubr.bf16.gmra.mrb[56].mxu0 %v4751_v51  ;;  %1455 = vmatmul.mubr.bf16.gmra.mrb[56].mxu1 %v4816_v52  ;;  %v3700_v51 = vunpack.c.l.bf16 %v3943_v49  ;;  %v1956_v52 = vld [vmem:[%s5904_s2] sm:$0xff] }
  0xb2   :  { %1334 = vmatprep.mubr.bf16.mxu0 %v4756_v53  ;;  %1462 = vmatprep.mubr.bf16.mxu1 %v4820_v54  ;;  %v1957_v53 = vld [vmem:[%s5904_s2 + $0x8] sm:$0xff]  ;;  %v3944_v54 = vld [vmem:[%s5901_s1 + $0x78] sm:$0xff]  }
  0xb3   :  { %v4440_v55 = vpack.c.bf16 %v1957_v53, %v1956_v52  ;;  %v3954_v52 = vld [vmem:[%s5901_s1 + $0xc8] sm:$0xff]  }
  0xb4   :  { %v4831_v53 = vld [vmem:[%s5902_s0 + $0x188] ss:$16 sps:$4 sm:$0xff]  }
  0xb5   :  { %4441 = vmatprep.subr.bf16.mxu1 %v4440_v55 }
  0xb9   :  { %1335 = vmatmul.mubr.bf16.gmra.mrb[60].mxu0 %v4758_v56  ;;  %1463 = vmatmul.mubr.bf16.gmra.mrb[60].mxu1 %v4822_v57  ;;  %v4807_v56 = vld [vmem:[%s5902_s0 + $0xe8] ss:$16 sps:$4 sm:$0xff]   ;;  %v3701_v57 = vunpack.c.h.bf16 %v3943_v49  ;;  %v3953_v49 = vld [vmem:[%s5901_s1 + $0xc0] sm:$0xff]  }
  0xba   :  { %1503 = vmatprep.mubr.bf16.mxu0 %v4765_v58  ;;  %4184 = vmatprep.mubr.f32.mxu1 %v3644_v59  ;;  %v4811_v58 = vld [vmem:[%s5902_s0 + $0x10c] ss:$16 sps:$4 sm:$0xff]   ;;  %v3704_v59 = vunpack.c.l.bf16 %v3944_v54 }
  0xc1   :  { %1504 = vmatmul.mubr.bf16.vlgmr.msra.gmra.mrb[0].mxu0 %v4763_v61  ;;  %4185 = vmatmul.mubr.f32.vlgmr.msra.gmra.mrb[64].mxu1 %v3645_v62  ;;  %v1958_v61 = vld [vmem:[%s5904_s2 + $0x10] sm:$0xff]  ;;  %v1959_v62 = vld [vmem:[%s5904_s2 + $0x18] sm:$0xff] }
  0xc2   :  { %1511 = vmatprep.mubr.bf16.mxu0 %v4769_v63  ;;  %4187 = vmatprep.mubr.f32.mxu1 %v3648_v1  ;;  %v3705_v63 = vunpack.c.h.bf16 %v3944_v54  ;;  %v4444_v1 = vpack.c.bf16 %v1959_v62, %v1958_v61  ;;  %v3741_v54 = vunpack.c.h.bf16 %v3953_v49  ;;  %v4834_v61 = vld [vmem:[%s5902_s0 + $0x1a8] ss:$16 sps:$4 sm:$0xff]  }
  0xc3   :  { %4443 = vmatpush3.bf16.msra.mxu1 %v4440_v55  ;;  %v4832_v55 = vld [vmem:[%s5902_s0 + $0x1ac] ss:$16 sps:$4 sm:$0xff]  }
  0xc4   :  { %4445 = vmatprep.subr.bf16.mxu1 %v4444_v1 }
  0xc5   :  { %4188 = vmatmul.mubr.f32.gmra.mrb[66].mxu1 %v3649_v3  ;;  %v1961_v3 = vld [vmem:[%s5904_s2 + $0x28] sm:$0xff] }
  0xc6   :  { %4190 = vmatprep.mubr.f32.mxu1 %v3652_v4  ;;  %v3708_v4 = vunpack.c.l.bf16 %v3945_v60  ;;  %v4448_v5 = vpack.c.bf16 %v1961_v3, %v1960_v2  ;;  %v3957_v2 = vld [vmem:[%s5901_s1 + $0xe0] sm:$0xff]  }
  0xc7   :  { %4447 = vmatpush3.bf16.msra.mxu1 %v4444_v1 }
  0xc8   :  { %4449 = vmatprep.subr.bf16.mxu1 %v4448_v5 }
  0xc9   :  { %1512 = vmatmul.mubr.bf16.gmra.mrb[4].mxu0 %v4771_v6  ;;  %4191 = vmatmul.mubr.f32.gmra.mrb[68].mxu1 %v3653_v7  ;;  %v3946_v6 = vld [vmem:[%s5901_s1 + $0x88] sm:$0xff]  }
  0xca   :  { %1519 = vmatprep.mubr.bf16.mxu0 %v4775_v8  ;;  %4193 = vmatprep.mubr.f32.mxu1 %v3656_v9  ;;  %v4813_v7 = vld [vmem:[%s5902_s0 + $0x108] ss:$16 sps:$4 sm:$0xff]   ;;  %v3709_v8 = vunpack.c.h.bf16 %v3945_v60  ;;  %v4817_v9 = vld [vmem:[%s5902_s0 + $0x12c] ss:$16 sps:$4 sm:$0xff]   ;;  %v3712_v10 = vunpack.c.l.bf16 %v3946_v6 }
  0xcb   :  { %4451 = vmatpush3.bf16.msra.mxu1 %v4448_v5  ;;  %v3956_v60 = vld [vmem:[%s5901_s1 + $0xd8] sm:$0xff]   ;;  %v3958_v5 = vld [vmem:[%s5901_s1 + $0xe8] sm:$0xff]  }
  0xcc   :  { %v3752_v1 = vunpack.c.l.bf16 %v3956_v60  ;;  %v3753_v3 = vunpack.c.h.bf16 %v3956_v60  ;;  %v4874_v60 = vld [vmem:[%s5902_s0 + $0x36c] ss:$16 sps:$4 sm:$0xff]  }
  0xcd   :  { %4194 = vmatmul.mubr.f32.gmra.mrb[70].mxu1 %v3657_v11  ;;  %v3947_v11 = vld [vmem:[%s5901_s1 + $0x90] sm:$0xff]  }
  0xce   :  { %4196 = vmatprep.mubr.f32.mxu1 %v3660_v12  ;;  %v1962_v12 = vld [vmem:[%s5904_s2 + $0x30] sm:$0xff]  ;;  %v3716_v17 = vunpack.c.l.bf16 %v3947_v11 }
  0xd1   :  { %1520 = vmatmul.mubr.bf16.gmra.mrb[8].mxu0 %v4777_v14  ;;  %4197 = vmatmul.mubr.f32.gmra.mrb[72].mxu1 %v3661_v15  ;;  %v3713_v14 = vunpack.c.h.bf16 %v3946_v6  ;;  %v4452_v15 = vpack.c.bf16 %v1963_v13, %v1962_v12  ;;  %v4837_v6 = vld [vmem:[%s5902_s0 + $0x1c8] ss:$16 sps:$4 sm:$0xff]  }
  0xd2   :  { %1527 = vmatprep.mubr.bf16.mxu0 %v4781_v0  ;;  %4199 = vmatprep.mubr.f32.mxu1 %v3664_v16  ;;  %v1964_v0 = vld [vmem:[%s5904_s2 + $0x40] sm:$0xff]  ;;  %v1965_v16 = vld [vmem:[%s5904_s2 + $0x48] sm:$0xff]  ;;  %v3960_v13 = vld [vmem:[%s5901_s1 + $0xf8] sm:$0xff]  }
  0xd3   :  { %4453 = vmatprep.subr.bf16.mxu1 %v4452_v15 }
  0xd4   :  { %4455 = vmatpush3.bf16.msra.mxu1 %v4452_v15 }
  0xd5   :  { %4200 = vmatmul.mubr.f32.gmra.mrb[74].mxu1 %v3665_v18  ;;  %v4456_v18 = vpack.c.bf16 %v1965_v16, %v1964_v0  ;;  %v4841_v0 = vld [vmem:[%s5902_s0 + $0x20c] ss:$16 sps:$4 sm:$0xff]   ;;  %v3768_v16 = vunpack.c.l.bf16 %v3960_v13 }
  0xd6   :  { %4202 = vmatprep.mubr.f32.mxu1 %v3668_v19  ;;  %v3948_v19 = vld [vmem:[%s5901_s1 + $0x98] sm:$0xff]  }
  0xd7   :  { %4457 = vmatprep.subr.bf16.mxu1 %v4456_v18 }
  0xd8   :  { %4459 = vmatpush3.bf16.msra.mxu1 %v4456_v18  ;;  %v4843_v18 = vld [vmem:[%s5902_s0 + $0x208] ss:$16 sps:$4 sm:$0xff]  }
  0xd9   :  { %1528 = vmatmul.mubr.bf16.gmra.mrb[12].mxu0 %v4783_v21  ;;  %4203 = vmatmul.mubr.f32.gmra.mrb[76].mxu1 %v3669_v22  ;;  %v3717_v21 = vunpack.c.h.bf16 %v3947_v11  ;;  %v4823_v22 = vld [vmem:[%s5902_s0 + $0x14c] ss:$16 sps:$4 sm:$0xff]   ;;  %v3761_v11 = vunpack.c.h.bf16 %v3958_v5 }
  0xda   :  { %1535 = vmatprep.mubr.bf16.mxu0 %v4787_v23  ;;  %4205 = vmatprep.mubr.f32.mxu1 %v3672_v24  ;;  %v3720_v23 = vunpack.c.l.bf16 %v3948_v19  ;;  %v3949_v24 = vld [vmem:[%s5901_s1 + $0xa0] sm:$0xff]  }
  0xdd   :  { %4206 = vmatmul.mubr.f32.gmra.mrb[78].mxu1 %v3673_v26  ;;  %v1967_v26 = vld [vmem:[%s5904_s2 + $0x58] sm:$0xff] }
  0xde   :  { %4208 = vmatprep.mubr.f32.mxu1 %v3676_v27  ;;  %v3721_v27 = vunpack.c.h.bf16 %v3948_v19  ;;  %v4460_v28 = vpack.c.bf16 %v1967_v26, %v1966_v25  ;;  %v4844_v19 = vld [vmem:[%s5902_s0 + $0x22c] ss:$16 sps:$4 sm:$0xff]   ;;  %v4855_v26 = vld [vmem:[%s5902_s0 + $0x288] ss:$16 sps:$4 sm:$0xff]  }
  0xdf   :  { %v4853_v25 = vld [vmem:[%s5902_s0 + $0x28c] ss:$16 sps:$4 sm:$0xff]  }
  0xe0   :  { %4461 = vmatprep.subr.bf16.mxu1 %v4460_v28 }
  0xe1   :  { %1536 = vmatmul.mubr.bf16.gmra.mrb[16].mxu0 %v4789_v29  ;;  %4209 = vmatmul.mubr.f32.gmra.mrb[80].mxu1 %v3677_v30  ;;  %v1968_v29 = vld [vmem:[%s5904_s2 + $0x60] sm:$0xff]  ;;  %v1969_v30 = vld [vmem:[%s5904_s2 + $0x68] sm:$0xff] }
  0xe2   :  { %1543 = vmatprep.mubr.bf16.mxu0 %v4793_v31  ;;  %4211 = vmatprep.mubr.f32.mxu1 %v3680_v32  ;;  %v3724_v31 = vunpack.c.l.bf16 %v3949_v24  ;;  %v4464_v32 = vpack.c.bf16 %v1969_v30, %v1968_v29  ;;  %v4859_v30 = vld [vmem:[%s5902_s0 + $0x2cc] ss:$16 sps:$4 sm:$0xff]  }
  0xe3   :  { %4463 = vmatpush3.bf16.msra.mxu1 %v4460_v28  ;;  %v4858_v28 = vld [vmem:[%s5902_s0 + $0x2a8] ss:$16 sps:$4 sm:$0xff]  }
  0xe4   :  { %4465 = vmatprep.subr.bf16.mxu1 %v4464_v32 }
  0xe5   :  { %4212 = vmatmul.mubr.f32.gmra.mrb[82].mxu1 %v3681_v34  ;;  %v4825_v34 = vld [vmem:[%s5902_s0 + $0x148] ss:$16 sps:$4 sm:$0xff]  }
  0xe6   :  { %4214 = vmatprep.mubr.f32.mxu1 %v3684_v35  ;;  %v3725_v35 = vunpack.c.h.bf16 %v3949_v24  ;;  %v4852_v24 = vld [vmem:[%s5902_s0 + $0x268] ss:$16 sps:$4 sm:$0xff]  }
  0xe7   :  { %4467 = vmatpush3.bf16.msra.mxu1 %v4464_v32 }
  0xe9   :  { %1544 = vmatmul.mubr.bf16.gmra.mrb[20].mxu0 %v4795_v37  ;;  %4215 = vmatmul.mubr.f32.gmra.mrb[84].mxu1 %v3685_v38  ;;  %v3728_v37 = vunpack.c.l.bf16 %v3950_v33  ;;  %v3951_v38 = vld [vmem:[%s5901_s1 + $0xb0] sm:$0xff]  }
  0xea   :  { %1551 = vmatprep.mubr.bf16.mxu0 %v4799_v39  ;;  %4217 = vmatprep.mubr.f32.mxu1 %v3688_v40  ;;  %v1970_v39 = vld [vmem:[%s5904_s2 + $0x70] sm:$0xff]  ;;  %v1971_v40 = vld [vmem:[%s5904_s2 + $0x78] sm:$0xff] }
  0xed   :  { %4218 = vmatmul.mubr.f32.gmra.mrb[86].mxu1 %v3689_v42  ;;  %v4468_v42 = vpack.c.bf16 %v1971_v40, %v1970_v39  ;;  %v4864_v40 = vld [vmem:[%s5902_s0 + $0x2e8] ss:$16 sps:$4 sm:$0xff]  }
  0xee   :  { %4220 = vmatprep.mubr.f32.mxu1 %v3692_v43  ;;  %v3732_v43 = vunpack.c.l.bf16 %v3951_v38 }
  0xef   :  { %4469 = vmatprep.subr.bf16.mxu1 %v4468_v42 }
  0xf0   :  { %4471 = vmatpush3.bf16.msra.mxu1 %v4468_v42  ;;  %v4865_v42 = vld [vmem:[%s5902_s0 + $0x30c] ss:$16 sps:$4 sm:$0xff]  }
  0xf1   :  { %1552 = vmatmul.mubr.bf16.gmra.mrb[24].mxu0 %v4801_v45  ;;  %4221 = vmatmul.mubr.f32.gmra.mrb[88].mxu1 %v3693_v46  ;;  %v4828_v45 = vld [vmem:[%s5902_s0 + $0x168] ss:$16 sps:$4 sm:$0xff]   ;;  %v3733_v46 = vunpack.c.h.bf16 %v3951_v38 }
  0xf2   :  { %1559 = vmatprep.mubr.bf16.mxu0 %v4805_v47  ;;  %4223 = vmatprep.mubr.f32.mxu1 %v3696_v48  ;;  %v4829_v47 = vld [vmem:[%s5902_s0 + $0x18c] ss:$16 sps:$4 sm:$0xff]   ;;  %v3736_v48 = vunpack.c.l.bf16 %v3952_v44 }
  0xf5   :  { %4224 = vmatmul.mubr.f32.gmra.mrb[90].mxu1 %v3697_v50  ;;  %v3737_v50 = vunpack.c.h.bf16 %v3952_v44 }
  0xf6   :  { %4226 = vmatprep.mubr.f32.mxu1 %v3700_v51  ;;  %v3740_v51 = vunpack.c.l.bf16 %v3953_v49 }
  0xf9   :  { %1560 = vmatmul.mubr.bf16.gmra.mrb[28].mxu0 %v4807_v56  ;;  %4227 = vmatmul.mubr.f32.gmra.mrb[92].mxu1 %v3701_v57  ;;  %v3744_v56 = vunpack.c.l.bf16 %v3954_v52  ;;  %v3955_v57 = vld [vmem:[%s5901_s1 + $0xd0] sm:$0xff]  }
  0xfa   :  { %1567 = vmatprep.mubr.bf16.mxu0 %v4811_v58  ;;  %4229 = vmatprep.mubr.f32.mxu1 %v3704_v59  ;;  %v3745_v58 = vunpack.c.h.bf16 %v3954_v52  ;;  %v3748_v59 = vunpack.c.l.bf16 %v3955_v57  ;;  %v3749_v62 = vunpack.c.h.bf16 %v3955_v57  ;;  %v4870_v52 = vld [vmem:[%s5902_s0 + $0x328] ss:$16 sps:$4 sm:$0xff]  }
  0xfd   :  { %4230 = vmatmul.mubr.f32.gmra.mrb[94].mxu1 %v3705_v63  ;;  %v4835_v63 = vld [vmem:[%s5902_s0 + $0x1cc] ss:$16 sps:$4 sm:$0xff]  }
  0xfe   :  { %4232 = vmatprep.mubr.f32.mxu1 %v3708_v4  ;;  %v3756_v4 = vunpack.c.l.bf16 %v3957_v2 }
 0x101   :  { %1568 = vmatmul.mubr.bf16.gmra.mrb[32].mxu0 %v4813_v7  ;;  %4233 = vmatmul.mubr.f32.gmra.mrb[96].mxu1 %v3709_v8  ;;  %v3757_v7 = vunpack.c.h.bf16 %v3957_v2  ;;  %v4838_v8 = vld [vmem:[%s5902_s0 + $0x1ec] ss:$16 sps:$4 sm:$0xff]  }
 0x102   :  { %1575 = vmatprep.mubr.bf16.mxu0 %v4817_v9  ;;  %4235 = vmatprep.mubr.f32.mxu1 %v3712_v10  ;;  %v3760_v9 = vunpack.c.l.bf16 %v3958_v5  ;;  %v3959_v10 = vld [vmem:[%s5901_s1 + $0xf0] sm:$0xff]  }
 0x103   :  { %v3764_v12 = vunpack.c.l.bf16 %v3959_v10  ;;  %v3765_v15 = vunpack.c.h.bf16 %v3959_v10 }
 0x105   :  { %4236 = vmatmul.mubr.f32.gmra.mrb[98].mxu1 %v3713_v14  ;;  %v4840_v14 = vld [vmem:[%s5902_s0 + $0x1e8] ss:$16 sps:$4 sm:$0xff]  }
 0x106   :  { %4238 = vmatprep.mubr.f32.mxu1 %v3716_v17  ;;  %v3769_v17 = vunpack.c.h.bf16 %v3960_v13  ;;  %v4879_v13 = vld [vmem:[%s5902_s0 + $0x388] ss:$16 sps:$4 sm:$0xff]  }
 0x109   :  { %1576 = vmatmul.mubr.bf16.gmra.mrb[36].mxu0 %v4819_v20  ;;  %4239 = vmatmul.mubr.f32.gmra.mrb[100].mxu1 %v3717_v21  ;;  %v4846_v20 = vld [vmem:[%s5902_s0 + $0x228] ss:$16 sps:$4 sm:$0xff]   ;;  %v4847_v21 = vld [vmem:[%s5902_s0 + $0x24c] ss:$16 sps:$4 sm:$0xff]  }
 0x10a   :  { %1583 = vmatprep.mubr.bf16.mxu0 %v4823_v22  ;;  %4241 = vmatprep.mubr.f32.mxu1 %v3720_v23  ;;  %v4849_v22 = vld [vmem:[%s5902_s0 + $0x248] ss:$16 sps:$4 sm:$0xff]   ;;  %v4850_v23 = vld [vmem:[%s5902_s0 + $0x26c] ss:$16 sps:$4 sm:$0xff]  }
 0x10d   :  { %4242 = vmatmul.mubr.f32.gmra.mrb[102].mxu1 %v3721_v27  ;;  %v4856_v27 = vld [vmem:[%s5902_s0 + $0x2ac] ss:$16 sps:$4 sm:$0xff]  }
 0x10e   :  { %4244 = vmatprep.mubr.f32.mxu1 %v3724_v31 }
 0x111   :  { %1584 = vmatmul.mubr.bf16.gmra.mrb[40].mxu0 %v4825_v34  ;;  %4245 = vmatmul.mubr.f32.gmra.mrb[104].mxu1 %v3725_v35  ;;  %v4861_v34 = vld [vmem:[%s5902_s0 + $0x2c8] ss:$16 sps:$4 sm:$0xff]  }
 0x112   :  { %1591 = vmatprep.mubr.bf16.mxu0 %v4826_v36  ;;  %4247 = vmatprep.mubr.f32.mxu1 %v3728_v37  ;;  %v4862_v36 = vld [vmem:[%s5902_s0 + $0x2ec] ss:$16 sps:$4 sm:$0xff]  }
 0x114   :  { %v5580_v29 = vpop.f32.mrb[0].mxu1 }
 0x115   :  { %4248 = vmatmul.mubr.f32.gmra.mrb[106].mxu1 %v3729_v41  ;;  %v1346_v31 = vpop.f32.mrb[1].mxu1 }
 0x116   :  { %4250 = vmatprep.mubr.f32.mxu1 %v3732_v43  ;;  %v5585_v32 = vpop.f32.mrb[2].mxu1 }
 0x117   :  { %v1349_v33 = vpop.f32.mrb[3].mxu1 }
 0x119   :  { %1592 = vmatmul.mubr.bf16.gmra.mrb[44].mxu0 %v4828_v45  ;;  %4251 = vmatmul.mubr.f32.gmra.mrb[108].mxu1 %v3733_v46  ;;  %v4867_v46 = vld [vmem:[%s5902_s0 + $0x308] ss:$16 sps:$4 sm:$0xff]  }
 0x11a   :  { %1599 = vmatprep.mubr.bf16.mxu0 %v4829_v47  ;;  %4253 = vmatprep.mubr.f32.mxu1 %v3736_v48  ;;  %v4868_v48 = vld [vmem:[%s5902_s0 + $0x32c] ss:$16 sps:$4 sm:$0xff]  }
 0x11c   :  { %v5590_v35 = vpop.f32.mrb[4].mxu1 }
 0x11d   :  { %4254 = vmatmul.mubr.f32.gmra.mrb[110].mxu1 %v3737_v50  ;;  %v1354_v37 = vpop.f32.mrb[5].mxu1 }
 0x11e   :  { %4256 = vmatprep.mubr.f32.mxu1 %v3740_v51  ;;  %v5595_v38 = vpop.f32.mrb[6].mxu1 }
 0x11f   :  { %v1357_v39 = vpop.f32.mrb[7].mxu1 }
 0x120   :  { %v4886_v39 = vld [vmem:[%s5902_s0 + $0x3ec] ss:$16 sps:$4 sm:$0xff]  }
 0x121   :  { %1600 = vmatmul.mubr.bf16.gmra.mrb[48].mxu0 %v4831_v53  ;;  %4257 = vmatmul.mubr.f32.gmra.mrb[112].mxu1 %v3741_v54  ;;  %v4871_v54 = vld [vmem:[%s5902_s0 + $0x34c] ss:$16 sps:$4 sm:$0xff]  }
 0x122   :  { %1607 = vmatprep.mubr.bf16.mxu0 %v4832_v55  ;;  %4259 = vmatprep.mubr.f32.mxu1 %v3744_v56 }
 0x124   :  { %v5600_v41 = vpop.f32.mrb[8].mxu1 }
 0x125   :  { %4260 = vmatmul.mubr.f32.gmra.mrb[114].mxu1 %v3745_v58  ;;  %v1362_v43 = vpop.f32.mrb[9].mxu1  ;;  %v4873_v58 = vld [vmem:[%s5902_s0 + $0x348] ss:$16 sps:$4 sm:$0xff]  }
 0x126   :  { %4262 = vmatprep.mubr.f32.mxu1 %v3748_v59  ;;  %v5605_v44 = vpop.f32.mrb[10].mxu1 }
 0x127   :  { %v1365_v45 = vpop.f32.mrb[11].mxu1 }
 0x129   :  { %1608 = vmatmul.mubr.bf16.gmra.mrb[52].mxu0 %v4834_v61  ;;  %4263 = vmatmul.mubr.f32.gmra.mrb[116].mxu1 %v3749_v62 }
 0x12a   :  { %1615 = vmatprep.mubr.bf16.mxu0 %v4835_v63  ;;  %4265 = vmatprep.mubr.f32.mxu1 %v3752_v1 }
 0x12c   :  { %v5610_v47 = vpop.f32.mrb[12].mxu1 }
 0x12d   :  { %4266 = vmatmul.mubr.f32.gmra.mrb[118].mxu1 %v3753_v3  ;;  %v1370_v49 = vpop.f32.mrb[13].mxu1  ;;  %v4876_v3 = vld [vmem:[%s5902_s0 + $0x368] ss:$16 sps:$4 sm:$0xff]  }
 0x12e   :  { %4268 = vmatprep.mubr.f32.mxu1 %v3756_v4  ;;  %v5615_v50 = vpop.f32.mrb[14].mxu1  ;;  %v4888_v49 = vld [vmem:[%s5902_s0 + $0x3e8] ss:$16 sps:$4 sm:$0xff]  }
 0x12f   :  { %v1373_v51 = vpop.f32.mrb[15].mxu1 }
 0x131   :  { %1616 = vmatmul.mubr.bf16.gmra.mrb[56].mxu0 %v4837_v6  ;;  %4269 = vmatmul.mubr.f32.gmra.mrb[120].mxu1 %v3757_v7  ;;  %v4877_v6 = vld [vmem:[%s5902_s0 + $0x38c] ss:$16 sps:$4 sm:$0xff]  }
 0x132   :  { %1623 = vmatprep.mubr.bf16.mxu0 %v4838_v8  ;;  %4271 = vmatprep.mubr.f32.mxu1 %v3760_v9 }
 0x134   :  { %v5620_v53 = vpop.f32.mrb[16].mxu1 }
 0x135   :  { %4272 = vmatmul.mubr.f32.gmra.mrb[122].mxu1 %v3761_v11  ;;  %v1378_v55 = vpop.f32.mrb[17].mxu1 }
 0x136   :  { %4274 = vmatprep.mubr.f32.mxu1 %v3764_v12  ;;  %v5625_v56 = vpop.f32.mrb[18].mxu1 }
 0x137   :  { %v1381_v57 = vpop.f32.mrb[19].mxu1 }
 0x139   :  { %1624 = vmatmul.mubr.bf16.gmra.mrb[60].mxu0 %v4840_v14  ;;  %4275 = vmatmul.mubr.f32.gmra.mrb[124].mxu1 %v3765_v15 }
 0x13a   :  { %1631 = vmatprep.mubr.bf16.mxu0 %v4841_v0  ;;  %4277 = vmatprep.mubr.f32.mxu1 %v3768_v16  ;;  %v4880_v0 = vld [vmem:[%s5902_s0 + $0x3ac] ss:$16 sps:$4 sm:$0xff]  }
 0x13c   :  { %v5630_v59 = vpop.f32.mrb[20].mxu1 }
 0x13d   :  { %4278 = vmatmul.mubr.f32.gmra.mrb[126].mxu1 %v3769_v17  ;;  %v1386_v61 = vpop.f32.mrb[21].mxu1 }
 0x13e   :  { %v5635_v62 = vpop.f32.mrb[22].mxu1 }
 0x13f   :  { %v1389_v63 = vpop.f32.mrb[23].mxu1 }
 0x141   :  { %1632 = vmatmul.mubr.bf16.gmra.mrb[64].mxu0 %v4843_v18 }
 0x142   :  { %1639 = vmatprep.mubr.bf16.mxu0 %v4844_v19 }
 0x144   :  { %v5640_v4 = vpop.f32.mrb[24].mxu1 }
 0x145   :  { %v1394_v7 = vpop.f32.mrb[25].mxu1 }
 0x146   :  { %v5645_v9 = vpop.f32.mrb[26].mxu1 }
 0x147   :  { %v1397_v10 = vpop.f32.mrb[27].mxu1 }
 0x149   :  { %1640 = vmatmul.mubr.bf16.gmra.mrb[68].mxu0 %v4846_v20 }
 0x14a   :  { %1647 = vmatprep.mubr.bf16.mxu0 %v4847_v21 }
 0x14c   :  { %v5650_v14 = vpop.f32.mrb[28].mxu1 }
 0x14d   :  { %v1402_v16 = vpop.f32.mrb[29].mxu1 }
 0x14e   :  { %v5655_v18 = vpop.f32.mrb[30].mxu1 }
 0x14f   :  { %v1405_v19 = vpop.f32.mrb[31].mxu1 }
 0x151   :  { %1648 = vmatmul.mubr.bf16.gmra.mrb[72].mxu0 %v4849_v22  ;;  %v4882_v22 = vld [vmem:[%s5902_s0 + $0x3a8] ss:$16 sps:$4 sm:$0xff]  }
 0x152   :  { %1655 = vmatprep.mubr.bf16.mxu0 %v4850_v23 }
 0x154   :  { %v5660_v23 = vpop.f32.mrb[32].mxu1 }
 0x159   :  { %1656 = vmatmul.mubr.bf16.gmra.mrb[76].mxu0 %v4852_v24 }
 0x15a   :  { %1663 = vmatprep.mubr.bf16.mxu0 %v4853_v25  ;;  %v4883_v25 = vld [vmem:[%s5902_s0 + $0x3cc] ss:$16 sps:$4 sm:$0xff]  }
 0x161   :  { %1664 = vmatmul.mubr.bf16.gmra.mrb[80].mxu0 %v4855_v26  ;;  %v1410_v26 = vpop.f32.mrb[33].mxu1 }
 0x162   :  { %1671 = vmatprep.mubr.bf16.mxu0 %v4856_v27 }
 0x169   :  { %1672 = vmatmul.mubr.bf16.gmra.mrb[84].mxu0 %v4858_v28  ;;  %v5665_v28 = vpop.f32.mrb[34].mxu1 }
 0x16a   :  { %1679 = vmatprep.mubr.bf16.mxu0 %v4859_v30  ;;  %v1413_v30 = vpop.f32.mrb[35].mxu1 }
 0x171   :  { %1680 = vmatmul.mubr.bf16.gmra.mrb[88].mxu0 %v4861_v34  ;;  %v4885_v34 = vld [vmem:[%s5902_s0 + $0x3c8] ss:$16 sps:$4 sm:$0xff]  }
 0x172   :  { %1687 = vmatprep.mubr.bf16.mxu0 %v4862_v36  ;;  %v5670_v36 = vpop.f32.mrb[36].mxu1 }
 0x179   :  { %1688 = vmatmul.mubr.bf16.gmra.mrb[92].mxu0 %v4864_v40  ;;  %v1418_v40 = vpop.f32.mrb[37].mxu1 }
 0x17a   :  { %1695 = vmatprep.mubr.bf16.mxu0 %v4865_v42  ;;  %v5675_v43 = vpop.f32.mrb[38].mxu1 }
 0x17b   :  { %v1421_v45 = vpop.f32.mrb[39].mxu1 }
 0x17c   :  { %v5680_v51 = vpop.f32.mrb[40].mxu1 }
 0x181   :  { %1696 = vmatmul.mubr.bf16.gmra.mrb[96].mxu0 %v4867_v46 }
 0x182   :  { %1703 = vmatprep.mubr.bf16.mxu0 %v4868_v48 }
 0x189   :  { %1704 = vmatmul.mubr.bf16.gmra.mrb[100].mxu0 %v4870_v52 }
 0x18a   :  { %1711 = vmatprep.mubr.bf16.mxu0 %v4871_v54  ;;  %v1426_v54 = vpop.f32.mrb[41].mxu1 }
 0x18b   :  { %v5682_v57 = vpop.f32.mrb[42].mxu1 }
 0x191   :  { %1712 = vmatmul.mubr.bf16.gmra.mrb[104].mxu0 %v4873_v58  ;;  %v1429_v58 = vpop.f32.mrb[43].mxu1 }
 0x192   :  { %1719 = vmatprep.mubr.bf16.mxu0 %v4874_v60  ;;  %v5684_v63 = vpop.f32.mrb[44].mxu1 }
 0x194   :  { %v1505_v1 = vpop.f32.mrb[0].mxu0 }
 0x195   :  { %v1507_v2 = vpop.f32.mrb[1].mxu0  ;;  %4312 = vmatprep.mubr.f32.mxu1 %v1505_v1 }
 0x196   :  { %v1508_v5 = vpop.f32.mrb[2].mxu0  ;;  %v1434_v2 = vpop.f32.mrb[45].mxu1 }
 0x197   :  { %v1510_v8 = vpop.f32.mrb[3].mxu0  ;;  %4313 = vmatmul.mubr.f32.vlgmr.msra.gmra.mrb[64].mxu1 %v1508_v5  ;;  %v5686_v5 = vpop.f32.mrb[46].mxu1 }
 0x199   :  { %1720 = vmatmul.mubr.bf16.gmra.mrb[108].mxu0 %v4876_v3 }
 0x19a   :  { %1727 = vmatprep.mubr.bf16.mxu0 %v4877_v6  ;;  %v1437_v6 = vpop.f32.mrb[47].mxu1 }
 0x19b   :  { %v5688_v10 = vpop.f32.mrb[48].mxu1 }
 0x19c   :  { %v1513_v11 = vpop.f32.mrb[4].mxu0 }
 0x19d   :  { %v1515_v12 = vpop.f32.mrb[5].mxu0  ;;  %4315 = vmatprep.mubr.f32.mxu1 %v1513_v11 }
 0x19e   :  { %v1516_v15 = vpop.f32.mrb[6].mxu0  ;;  %v1442_v12 = vpop.f32.mrb[49].mxu1 }
 0x19f   :  { %v1518_v17 = vpop.f32.mrb[7].mxu0  ;;  %4316 = vmatmul.mubr.f32.gmra.mrb[66].mxu1 %v1516_v15  ;;  %v5690_v15 = vpop.f32.mrb[50].mxu1 }
 0x1a1   :  { %1728 = vmatmul.mubr.bf16.gmra.mrb[112].mxu0 %v4879_v13 }
 0x1a2   :  { %1735 = vmatprep.mubr.bf16.mxu0 %v4880_v0  ;;  %v1445_v0 = vpop.f32.mrb[51].mxu1 }
 0x1a3   :  { %v5692_v19 = vpop.f32.mrb[52].mxu1 }
 0x1a4   :  { %v1521_v20 = vpop.f32.mrb[8].mxu0 }
 0x1a5   :  { %v1523_v21 = vpop.f32.mrb[9].mxu0  ;;  %4318 = vmatprep.mubr.f32.mxu1 %v1521_v20 }
 0x1a6   :  { %v1524_v24 = vpop.f32.mrb[10].mxu0  ;;  %v1450_v21 = vpop.f32.mrb[53].mxu1 }
 0x1a7   :  { %v1526_v27 = vpop.f32.mrb[11].mxu0  ;;  %4319 = vmatmul.mubr.f32.gmra.mrb[68].mxu1 %v1524_v24  ;;  %v5694_v24 = vpop.f32.mrb[54].mxu1 }
 0x1a9   :  { %1736 = vmatmul.mubr.bf16.gmra.mrb[116].mxu0 %v4882_v22 }
 0x1aa   :  { %1743 = vmatprep.mubr.bf16.mxu0 %v4883_v25  ;;  %v1453_v25 = vpop.f32.mrb[55].mxu1 }
 0x1ab   :  { %v5696_v30 = vpop.f32.mrb[56].mxu1 }
 0x1ac   :  { %v1529_v31 = vpop.f32.mrb[12].mxu0 }
 0x1ad   :  { %v1531_v33 = vpop.f32.mrb[13].mxu0  ;;  %4321 = vmatprep.mubr.f32.mxu1 %v1529_v31 }
 0x1ae   :  { %v1532_v37 = vpop.f32.mrb[14].mxu0  ;;  %v1458_v33 = vpop.f32.mrb[57].mxu1 }
 0x1af   :  { %v1534_v42 = vpop.f32.mrb[15].mxu0  ;;  %4322 = vmatmul.mubr.f32.gmra.mrb[70].mxu1 %v1532_v37  ;;  %v5698_v37 = vpop.f32.mrb[58].mxu1 }
 0x1b1   :  { %1744 = vmatmul.mubr.bf16.gmra.mrb[120].mxu0 %v4885_v34 }
 0x1b2   :  { %1751 = vmatprep.mubr.bf16.mxu0 %v4886_v39  ;;  %v1461_v39 = vpop.f32.mrb[59].mxu1 }
 0x1b3   :  { %v5700_v45 = vpop.f32.mrb[60].mxu1 }
 0x1b4   :  { %v1537_v46 = vpop.f32.mrb[16].mxu0 }
 0x1b5   :  { %v1539_v48 = vpop.f32.mrb[17].mxu0  ;;  %4324 = vmatprep.mubr.f32.mxu1 %v1537_v46 }
 0x1b6   :  { %v1540_v52 = vpop.f32.mrb[18].mxu0  ;;  %v1466_v48 = vpop.f32.mrb[61].mxu1 }
 0x1b7   :  { %v1542_v55 = vpop.f32.mrb[19].mxu0  ;;  %4325 = vmatmul.mubr.f32.gmra.mrb[72].mxu1 %v1540_v52  ;;  %v5702_v52 = vpop.f32.mrb[62].mxu1 }
 0x1b8   :  { %v1469_v54 = vpop.f32.mrb[63].mxu1 }
 0x1b9   :  { %1752 = vmatmul.mubr.bf16.gmra.mrb[124].mxu0 %v4888_v49 }
 0x1bc   :  { %v1545_v60 = vpop.f32.mrb[20].mxu0 }
 0x1bd   :  { %v1547_v61 = vpop.f32.mrb[21].mxu0  ;;  %4327 = vmatprep.mubr.f32.mxu1 %v1545_v60 }
 0x1be   :  { %v1548_v1 = vpop.f32.mrb[22].mxu0 }
 0x1bf   :  { %v1550_v3 = vpop.f32.mrb[23].mxu0  ;;  %4328 = vmatmul.mubr.f32.gmra.mrb[74].mxu1 %v1548_v1 }
 0x1c4   :  { %v1553_v7 = vpop.f32.mrb[24].mxu0 }
 0x1c5   :  { %v1555_v8 = vpop.f32.mrb[25].mxu0  ;;  %4330 = vmatprep.mubr.f32.mxu1 %v1553_v7 }
 0x1c6   :  { %v1556_v11 = vpop.f32.mrb[26].mxu0 }
 0x1c7   :  { %v1558_v13 = vpop.f32.mrb[27].mxu0  ;;  %4331 = vmatmul.mubr.f32.gmra.mrb[76].mxu1 %v1556_v11 }
 0x1cc   :  { %v1561_v16 = vpop.f32.mrb[28].mxu0 }
 0x1cd   :  { %v1563_v17 = vpop.f32.mrb[29].mxu0  ;;  %4333 = vmatprep.mubr.f32.mxu1 %v1561_v16 }
 0x1ce   :  { %v1564_v20 = vpop.f32.mrb[30].mxu0 }
 0x1cf   :  { %v1566_v22 = vpop.f32.mrb[31].mxu0  ;;  %4334 = vmatmul.mubr.f32.gmra.mrb[78].mxu1 %v1564_v20 }
 0x1d4   :  { %v1569_v26 = vpop.f32.mrb[32].mxu0 }
 0x1d5   :  { %v1571_v27 = vpop.f32.mrb[33].mxu0  ;;  %4336 = vmatprep.mubr.f32.mxu1 %v1569_v26 }
 0x1d6   :  { %v1572_v31 = vpop.f32.mrb[34].mxu0 }
 0x1d7   :  { %v1574_v34 = vpop.f32.mrb[35].mxu0  ;;  %4337 = vmatmul.mubr.f32.gmra.mrb[80].mxu1 %v1572_v31 }
 0x1dc   :  { %v1577_v40 = vpop.f32.mrb[36].mxu0 }
 0x1dd   :  { %v1579_v42 = vpop.f32.mrb[37].mxu0  ;;  %4339 = vmatprep.mubr.f32.mxu1 %v1577_v40 }
 0x1de   :  { %v1580_v46 = vpop.f32.mrb[38].mxu0 }
 0x1df   :  { %v1582_v49 = vpop.f32.mrb[39].mxu0  ;;  %4340 = vmatmul.mubr.f32.gmra.mrb[82].mxu1 %v1580_v46 }
 0x1e4   :  { %v1585_v55 = vpop.f32.mrb[40].mxu0 }
 0x1e5   :  { %v1587_v58 = vpop.f32.mrb[41].mxu0  ;;  %4342 = vmatprep.mubr.f32.mxu1 %v1585_v55 }
 0x1e6   :  { %v1588_v60 = vpop.f32.mrb[42].mxu0 }
 0x1e7   :  { %v1590_v61 = vpop.f32.mrb[43].mxu0  ;;  %4343 = vmatmul.mubr.f32.gmra.mrb[84].mxu1 %v1588_v60 }
 0x1ec   :  { %v1593_v1 = vpop.f32.mrb[44].mxu0 }
 0x1ed   :  { %v1595_v2 = vpop.f32.mrb[45].mxu0  ;;  %4345 = vmatprep.mubr.f32.mxu1 %v1593_v1 }
 0x1ee   :  { %v1596_v3 = vpop.f32.mrb[46].mxu0 }
 0x1ef   :  { %v1598_v6 = vpop.f32.mrb[47].mxu0  ;;  %4346 = vmatmul.mubr.f32.gmra.mrb[86].mxu1 %v1596_v3 }
 0x1f4   :  { %v1601_v7 = vpop.f32.mrb[48].mxu0 }
 0x1f5   :  { %v1603_v8 = vpop.f32.mrb[49].mxu0  ;;  %4348 = vmatprep.mubr.f32.mxu1 %v1601_v7 }
 0x1f6   :  { %v1604_v11 = vpop.f32.mrb[50].mxu0 }
 0x1f7   :  { %v1606_v12 = vpop.f32.mrb[51].mxu0  ;;  %4349 = vmatmul.mubr.f32.gmra.mrb[88].mxu1 %v1604_v11 }
 0x1fc   :  { %v1609_v13 = vpop.f32.mrb[52].mxu0 }
 0x1fd   :  { %v1611_v0 = vpop.f32.mrb[53].mxu0  ;;  %4351 = vmatprep.mubr.f32.mxu1 %v1609_v13 }
 0x1fe   :  { %v1612_v16 = vpop.f32.mrb[54].mxu0 }
 0x1ff   :  { %v1614_v17 = vpop.f32.mrb[55].mxu0  ;;  %4352 = vmatmul.mubr.f32.gmra.mrb[90].mxu1 %v1612_v16 }
 0x204   :  { %v1617_v20 = vpop.f32.mrb[56].mxu0 }
 0x205   :  { %v1619_v21 = vpop.f32.mrb[57].mxu0  ;;  %4354 = vmatprep.mubr.f32.mxu1 %v1617_v20 }
 0x206   :  { %v1620_v22 = vpop.f32.mrb[58].mxu0 }
 0x207   :  { %v1622_v25 = vpop.f32.mrb[59].mxu0  ;;  %4355 = vmatmul.mubr.f32.gmra.mrb[92].mxu1 %v1620_v22 }
 0x20c   :  { %v1625_v26 = vpop.f32.mrb[60].mxu0 }
 0x20d   :  { %v1627_v27 = vpop.f32.mrb[61].mxu0  ;;  %4357 = vmatprep.mubr.f32.mxu1 %v1625_v26 }
 0x20e   :  { %v1628_v31 = vpop.f32.mrb[62].mxu0 }
 0x20f   :  { %v1630_v33 = vpop.f32.mrb[63].mxu0  ;;  %4358 = vmatmul.mubr.f32.gmra.mrb[94].mxu1 %v1628_v31 }
 0x214   :  { %v1633_v34 = vpop.f32.mrb[64].mxu0 }
 0x215   :  { %v1634_v39 = vadd.f32 %v1633_v34, %v5580_v29  ;;  %v1635_v40 = vpop.f32.mrb[65].mxu0 }
 0x216   :  { %v1636_v42 = vpop.f32.mrb[66].mxu0 }
 0x217   :  { %v1637_v46 = vadd.f32 %v1636_v42, %v5585_v32  ;;  %v1638_v48 = vpop.f32.mrb[67].mxu0  ;;  %4360 = vmatprep.mubr.f32.mxu1 %v1634_v39 }
 0x219   :  { %4361 = vmatmul.mubr.f32.gmra.mrb[96].mxu1 %v1637_v46 }
 0x21c   :  { %v1641_v49 = vpop.f32.mrb[68].mxu0 }
 0x21d   :  { %v1642_v54 = vadd.f32 %v1641_v49, %v5590_v35  ;;  %v1643_v55 = vpop.f32.mrb[69].mxu0 }
 0x21e   :  { %v1644_v58 = vpop.f32.mrb[70].mxu0 }
 0x21f   :  { %v1645_v60 = vadd.f32 %v1644_v58, %v5595_v38  ;;  %v1646_v61 = vpop.f32.mrb[71].mxu0  ;;  %4363 = vmatprep.mubr.f32.mxu1 %v1642_v54 }
 0x221   :  { %4364 = vmatmul.mubr.f32.gmra.mrb[98].mxu1 %v1645_v60 }
 0x224   :  { %v1649_v1 = vpop.f32.mrb[72].mxu0 }
 0x225   :  { %v1650_v29 = vadd.f32 %v1649_v1, %v5600_v41  ;;  %v1651_v2 = vpop.f32.mrb[73].mxu0 }
 0x226   :  { %v1652_v3 = vpop.f32.mrb[74].mxu0 }
 0x227   :  { %v1653_v32 = vadd.f32 %v1652_v3, %v5605_v44  ;;  %v1654_v6 = vpop.f32.mrb[75].mxu0  ;;  %4366 = vmatprep.mubr.f32.mxu1 %v1650_v29 }
 0x229   :  { %4367 = vmatmul.mubr.f32.gmra.mrb[100].mxu1 %v1653_v32 }
 0x22c   :  { %v1657_v7 = vpop.f32.mrb[76].mxu0 }
 0x22d   :  { %v1658_v35 = vadd.f32 %v1657_v7, %v5610_v47  ;;  %v1659_v8 = vpop.f32.mrb[77].mxu0 }
 0x22e   :  { %v1660_v11 = vpop.f32.mrb[78].mxu0 }
 0x22f   :  { %v1661_v38 = vadd.f32 %v1660_v11, %v5615_v50  ;;  %v1662_v12 = vpop.f32.mrb[79].mxu0  ;;  %4369 = vmatprep.mubr.f32.mxu1 %v1658_v35 }
 0x231   :  { %4370 = vmatmul.mubr.f32.gmra.mrb[102].mxu1 %v1661_v38 }
 0x234   :  { %v1665_v13 = vpop.f32.mrb[80].mxu0 }
 0x235   :  { %v1666_v41 = vadd.f32 %v1665_v13, %v5620_v53  ;;  %v1667_v0 = vpop.f32.mrb[81].mxu0 }
 0x236   :  { %v1668_v16 = vpop.f32.mrb[82].mxu0 }
 0x237   :  { %v1669_v44 = vadd.f32 %v1668_v16, %v5625_v56  ;;  %v1670_v17 = vpop.f32.mrb[83].mxu0  ;;  %4372 = vmatprep.mubr.f32.mxu1 %v1666_v41 }
 0x239   :  { %4373 = vmatmul.mubr.f32.gmra.mrb[104].mxu1 %v1669_v44 }
 0x23c   :  { %v1673_v20 = vpop.f32.mrb[84].mxu0 }
 0x23d   :  { %v1674_v47 = vadd.f32 %v1673_v20, %v5630_v59  ;;  %v1675_v21 = vpop.f32.mrb[85].mxu0 }
 0x23e   :  { %v1676_v22 = vpop.f32.mrb[86].mxu0 }
 0x23f   :  { %v1677_v50 = vadd.f32 %v1676_v22, %v5635_v62  ;;  %v1678_v25 = vpop.f32.mrb[87].mxu0  ;;  %4375 = vmatprep.mubr.f32.mxu1 %v1674_v47 }
 0x241   :  { %4376 = vmatmul.mubr.f32.gmra.mrb[106].mxu1 %v1677_v50 }
 0x244   :  { %v1681_v26 = vpop.f32.mrb[88].mxu0 }
 0x245   :  { %v1682_v53 = vadd.f32 %v1681_v26, %v5640_v4  ;;  %v1683_v27 = vpop.f32.mrb[89].mxu0 }
 0x246   :  { %v1684_v31 = vpop.f32.mrb[90].mxu0 }
 0x247   :  { %v1685_v56 = vadd.f32 %v1684_v31, %v5645_v9  ;;  %v1686_v33 = vpop.f32.mrb[91].mxu0  ;;  %4378 = vmatprep.mubr.f32.mxu1 %v1682_v53 }
 0x249   :  { %4379 = vmatmul.mubr.f32.gmra.mrb[108].mxu1 %v1685_v56 }
 0x24c   :  { %v1689_v34 = vpop.f32.mrb[92].mxu0 }
 0x24d   :  { %v1690_v59 = vadd.f32 %v1689_v34, %v5650_v14  ;;  %v1691_v39 = vpop.f32.mrb[93].mxu0 }
 0x24e   :  { %v1692_v40 = vpop.f32.mrb[94].mxu0 }
 0x24f   :  { %v1693_v62 = vadd.f32 %v1692_v40, %v5655_v18  ;;  %v1694_v42 = vpop.f32.mrb[95].mxu0  ;;  %4381 = vmatprep.mubr.f32.mxu1 %v1690_v59 }
 0x251   :  { %4382 = vmatmul.mubr.f32.gmra.mrb[110].mxu1 %v1693_v62 }
 0x254   :  { %v1697_v46 = vpop.f32.mrb[96].mxu0 }
 0x255   :  { %v1698_v4 = vadd.f32 %v1697_v46, %v5660_v23  ;;  %v1699_v48 = vpop.f32.mrb[97].mxu0 }
 0x256   :  { %v1700_v49 = vpop.f32.mrb[98].mxu0 }
 0x257   :  { %v1701_v9 = vadd.f32 %v1700_v49, %v5665_v28  ;;  %v1702_v54 = vpop.f32.mrb[99].mxu0  ;;  %4384 = vmatprep.mubr.f32.mxu1 %v1698_v4 }
 0x259   :  { %4385 = vmatmul.mubr.f32.gmra.mrb[112].mxu1 %v1701_v9 }
 0x25c   :  { %v1705_v55 = vpop.f32.mrb[100].mxu0 }
 0x25d   :  { %v1706_v14 = vadd.f32 %v1705_v55, %v5670_v36  ;;  %v1707_v58 = vpop.f32.mrb[101].mxu0  ;;  %v5729_v36 = vld [vmem:[%s5905_s4] ss:$0 sm:$0xff] }
 0x25e   :  { %v1708_v60 = vpop.f32.mrb[102].mxu0 }
 0x25f   :  { %v1709_v18 = vadd.f32 %v1708_v60, %v5675_v43  ;;  %v1710_v61 = vpop.f32.mrb[103].mxu0  ;;  %4387 = vmatprep.mubr.f32.mxu1 %v1706_v14 }
 0x261   :  { %4388 = vmatmul.mubr.f32.gmra.mrb[114].mxu1 %v1709_v18 }
 0x264   :  { %v1713_v1 = vpop.f32.mrb[104].mxu0 }
 0x265   :  { %v1714_v23 = vadd.f32 %v1713_v1, %v5680_v51  ;;  %v1715_v29 = vpop.f32.mrb[105].mxu0 }
 0x266   :  { %v1716_v2 = vpop.f32.mrb[106].mxu0 }
 0x267   :  { %v1717_v28 = vadd.f32 %v1716_v2, %v5682_v57  ;;  %v1718_v3 = vpop.f32.mrb[107].mxu0  ;;  %4390 = vmatprep.mubr.f32.mxu1 %v1714_v23 }
 0x269   :  { %4391 = vmatmul.mubr.f32.gmra.mrb[116].mxu1 %v1717_v28 }
 0x26a   :  { %v4314_v32 = vpop.f32.mrb[64].mxu1 }
 0x26b   :  { %v2898_v43 = vadd.f32 %v4314_v32, %v5729_v36  ;;  %v2571_v6 = vpop.f32.mrb[65].mxu1 }
 0x26c   :  { %v2897_v7 = vadd.f32 %v5729_v36, %v2571_v6  ;;  %v1721_v35 = vpop.f32.mrb[108].mxu0 }
 0x26d   :  { %v2962_v51 = vmax.f32 %v2898_v43, 0.0  ;;  %v1722_v8 = vadd.f32 %v1721_v35, %v5684_v63  ;;  %v1723_v11 = vpop.f32.mrb[109].mxu0 }
 0x26e   :  { %v2961_v57 = vmax.f32 %v2897_v7, 0.0  ;;  %v1724_v38 = vpop.f32.mrb[110].mxu0 }
 0x26f   :  { %v1725_v12 = vadd.f32 %v1724_v38, %v5686_v5  ;;  %v1726_v13 = vpop.f32.mrb[111].mxu0  ;;  %4393 = vmatprep.mubr.f32.mxu1 %v1722_v8 }
 0x270   :  { %v3773_v41 = vpack.c.bf16 %v2962_v51, %v2961_v57 }
 0x271   :  { %4394 = vmatmul.mubr.f32.gmra.mrb[118].mxu1 %v1725_v12 }
 0x272   :  { %3774 = vst [vmem:[%s5906_s5] sm:$0xff] %v3773_v41   ;;  %v4317_v0 = vpop.f32.mrb[66].mxu1 }
 0x273   :  { %v2900_v16 = vadd.f32 %v4317_v0, %v5729_v36  ;;  %v2581_v44 = vpop.f32.mrb[67].mxu1 }
 0x274   :  { %v2899_v17 = vadd.f32 %v5729_v36, %v2581_v44  ;;  %v1729_v63 = vpop.f32.mrb[112].mxu0 }
 0x275   :  { %v2964_v20 = vmax.f32 %v2900_v16, 0.0  ;;  %v1730_v47 = vadd.f32 %v1729_v63, %v5688_v10  ;;  %v1731_v21 = vpop.f32.mrb[113].mxu0 }
 0x276   :  { %v2963_v5 = vmax.f32 %v2899_v17, 0.0  ;;  %v1732_v22 = vpop.f32.mrb[114].mxu0 }
 0x277   :  { %v1733_v50 = vadd.f32 %v1732_v22, %v5690_v15  ;;  %v1734_v25 = vpop.f32.mrb[115].mxu0  ;;  %4396 = vmatprep.mubr.f32.mxu1 %v1730_v47 }
 0x278   :  { %v3778_v26 = vpack.c.bf16 %v2964_v20, %v2963_v5 }
 0x279   :  { %4397 = vmatmul.mubr.f32.gmra.mrb[120].mxu1 %v1733_v50 }
 0x27a   :  { %3961 = vst [vmem:[%s5906_s5 + $0x8] sm:$0xff] %v3778_v26   ;;  %v4320_v53 = vpop.f32.mrb[68].mxu1 }
 0x27b   :  { %v2902_v27 = vadd.f32 %v4320_v53, %v5729_v36  ;;  %v2591_v31 = vpop.f32.mrb[69].mxu1 }
 0x27c   :  { %v2901_v56 = vadd.f32 %v5729_v36, %v2591_v31  ;;  %v1737_v10 = vpop.f32.mrb[116].mxu0 }
 0x27d   :  { %v2966_v33 = vmax.f32 %v2902_v27, 0.0  ;;  %v1738_v34 = vadd.f32 %v1737_v10, %v5692_v19  ;;  %v1739_v59 = vpop.f32.mrb[117].mxu0 }
 0x27e   :  { %v2965_v15 = vmax.f32 %v2901_v56, 0.0  ;;  %v1740_v39 = vpop.f32.mrb[118].mxu0 }
 0x27f   :  { %v1741_v40 = vadd.f32 %v1740_v39, %v5694_v24  ;;  %v1742_v62 = vpop.f32.mrb[119].mxu0  ;;  %4399 = vmatprep.mubr.f32.mxu1 %v1738_v34 }
 0x280   :  { %v3783_v42 = vpack.c.bf16 %v2966_v33, %v2965_v15 }
 0x281   :  { %4400 = vmatmul.mubr.f32.gmra.mrb[122].mxu1 %v1741_v40 }
 0x282   :  { %3962 = vst [vmem:[%s5906_s5 + $0x10] sm:$0xff] %v3783_v42   ;;  %v4323_v46 = vpop.f32.mrb[70].mxu1 }
 0x283   :  { %v2904_v4 = vadd.f32 %v4323_v46, %v5729_v36  ;;  %v2601_v48 = vpop.f32.mrb[71].mxu1 }
 0x284   :  { %v2903_v49 = vadd.f32 %v5729_v36, %v2601_v48  ;;  %v1745_v19 = vpop.f32.mrb[120].mxu0 }
 0x285   :  { %v2968_v9 = vmax.f32 %v2904_v4, 0.0  ;;  %v1746_v54 = vadd.f32 %v1745_v19, %v5696_v30  ;;  %v1747_v55 = vpop.f32.mrb[121].mxu0 }
 0x286   :  { %v2967_v24 = vmax.f32 %v2903_v49, 0.0  ;;  %v1748_v14 = vpop.f32.mrb[122].mxu0 }
 0x287   :  { %v1749_v58 = vadd.f32 %v1748_v14, %v5698_v37  ;;  %v1750_v60 = vpop.f32.mrb[123].mxu0  ;;  %4402 = vmatprep.mubr.f32.mxu1 %v1746_v54 }
 0x288   :  { %v3788_v18 = vpack.c.bf16 %v2968_v9, %v2967_v24 }
 0x289   :  { %4403 = vmatmul.mubr.f32.gmra.mrb[124].mxu1 %v1749_v58 }
 0x28a   :  { %3963 = vst [vmem:[%s5906_s5 + $0x18] sm:$0xff] %v3788_v18   ;;  %v4326_v61 = vpop.f32.mrb[72].mxu1 }
 0x28b   :  { %v2906_v1 = vadd.f32 %v4326_v61, %v5729_v36  ;;  %v2611_v23 = vpop.f32.mrb[73].mxu1 }
 0x28c   :  { %v2905_v29 = vadd.f32 %v5729_v36, %v2611_v23  ;;  %v1753_v30 = vpop.f32.mrb[124].mxu0 }
 0x28d   :  { %v2970_v2 = vmax.f32 %v2906_v1, 0.0  ;;  %v1754_v28 = vadd.f32 %v1753_v30, %v5700_v45  ;;  %v1755_v3 = vpop.f32.mrb[125].mxu0 }
 0x28e   :  { %v2969_v37 = vmax.f32 %v2905_v29, 0.0  ;;  %v1756_v32 = vpop.f32.mrb[126].mxu0 }
 0x28f   :  { %v1757_v43 = vadd.f32 %v1756_v32, %v5702_v52  ;;  %v1758_v6 = vpop.f32.mrb[127].mxu0  ;;  %4405 = vmatprep.mubr.f32.mxu1 %v1754_v28 }
 0x290   :  { %v3793_v7 = vpack.c.bf16 %v2970_v2, %v2969_v37 }
 0x291   :  { %4406 = vmatmul.mubr.f32.gmra.mrb[126].mxu1 %v1757_v43 }
 0x292   :  { %3964 = vst [vmem:[%s5906_s5 + $0x20] sm:$0xff] %v3793_v7   ;;  %v4329_v35 = vpop.f32.mrb[74].mxu1 }
 0x293   :  { %v2908_v51 = vadd.f32 %v4329_v35, %v5729_v36  ;;  %v2621_v8 = vpop.f32.mrb[75].mxu1 }
 0x294   :  { %v2907_v11 = vadd.f32 %v5729_v36, %v2621_v8 }
 0x295   :  { %v2972_v45 = vmax.f32 %v2908_v51, 0.0 }
 0x296   :  { %v2971_v57 = vmax.f32 %v2907_v11, 0.0 }
 0x298   :  { %v3798_v38 = vpack.c.bf16 %v2972_v45, %v2971_v57 }
 0x29a   :  { %3965 = vst [vmem:[%s5906_s5 + $0x28] sm:$0xff] %v3798_v38   ;;  %v4332_v52 = vpop.f32.mrb[76].mxu1 }
 0x29b   :  { %v2910_v12 = vadd.f32 %v4332_v52, %v5729_v36  ;;  %v2631_v13 = vpop.f32.mrb[77].mxu1 }
 0x29c   :  { %v2909_v41 = vadd.f32 %v5729_v36, %v2631_v13 }
 0x29d   :  { %v2974_v0 = vmax.f32 %v2910_v12, 0.0 }
 0x29e   :  { %v2973_v16 = vmax.f32 %v2909_v41, 0.0 }
 0x2a0   :  { %v3803_v44 = vpack.c.bf16 %v2974_v0, %v2973_v16 }
 0x2a2   :  { %3966 = vst [vmem:[%s5906_s5 + $0x30] sm:$0xff] %v3803_v44   ;;  %v4335_v17 = vpop.f32.mrb[78].mxu1 }
 0x2a3   :  { %v2912_v63 = vadd.f32 %v4335_v17, %v5729_v36  ;;  %v2641_v20 = vpop.f32.mrb[79].mxu1 }
 0x2a4   :  { %v2911_v47 = vadd.f32 %v5729_v36, %v2641_v20 }
 0x2a5   :  { %v2976_v21 = vmax.f32 %v2912_v63, 0.0 }
 0x2a6   :  { %v2975_v5 = vmax.f32 %v2911_v47, 0.0 }
 0x2a8   :  { %v3808_v22 = vpack.c.bf16 %v2976_v21, %v2975_v5 }
 0x2aa   :  { %3967 = vst [vmem:[%s5906_s5 + $0x38] sm:$0xff] %v3808_v22   ;;  %v4338_v50 = vpop.f32.mrb[80].mxu1 }
 0x2ab   :  { %v2914_v25 = vadd.f32 %v4338_v50, %v5729_v36  ;;  %v2651_v26 = vpop.f32.mrb[81].mxu1 }
 0x2ac   :  { %v2913_v53 = vadd.f32 %v5729_v36, %v2651_v26 }
 0x2ad   :  { %v2978_v27 = vmax.f32 %v2914_v25, 0.0 }
 0x2ae   :  { %v2977_v31 = vmax.f32 %v2913_v53, 0.0 }
 0x2b0   :  { %v3813_v56 = vpack.c.bf16 %v2978_v27, %v2977_v31 }
 0x2b2   :  { %3968 = vst [vmem:[%s5906_s5 + $0x40] sm:$0xff] %v3813_v56   ;;  %v4341_v10 = vpop.f32.mrb[82].mxu1 }
 0x2b3   :  { %v2916_v33 = vadd.f32 %v4341_v10, %v5729_v36  ;;  %v2661_v34 = vpop.f32.mrb[83].mxu1 }
 0x2b4   :  { %v2915_v59 = vadd.f32 %v5729_v36, %v2661_v34 }
 0x2b5   :  { %v2980_v15 = vmax.f32 %v2916_v33, 0.0 }
 0x2b6   :  { %v2979_v39 = vmax.f32 %v2915_v59, 0.0 }
 0x2b8   :  { %v3818_v40 = vpack.c.bf16 %v2980_v15, %v2979_v39 }
 0x2ba   :  { %3969 = vst [vmem:[%s5906_s5 + $0x48] sm:$0xff] %v3818_v40   ;;  %v4344_v62 = vpop.f32.mrb[84].mxu1 }
 0x2bb   :  { %v2918_v42 = vadd.f32 %v4344_v62, %v5729_v36  ;;  %v2671_v46 = vpop.f32.mrb[85].mxu1 }
 0x2bc   :  { %v2917_v4 = vadd.f32 %v5729_v36, %v2671_v46 }
 0x2bd   :  { %v2982_v48 = vmax.f32 %v2918_v42, 0.0 }
 0x2be   :  { %v2981_v49 = vmax.f32 %v2917_v4, 0.0 }
 0x2c0   :  { %v3823_v19 = vpack.c.bf16 %v2982_v48, %v2981_v49 }
 0x2c2   :  { %3970 = vst [vmem:[%s5906_s5 + $0x50] sm:$0xff] %v3823_v19   ;;  %v4347_v9 = vpop.f32.mrb[86].mxu1 }
 0x2c3   :  { %v2920_v54 = vadd.f32 %v4347_v9, %v5729_v36  ;;  %v2681_v55 = vpop.f32.mrb[87].mxu1 }
 0x2c4   :  { %v2919_v24 = vadd.f32 %v5729_v36, %v2681_v55 }
 0x2c5   :  { %v2984_v14 = vmax.f32 %v2920_v54, 0.0 }
 0x2c6   :  { %v2983_v58 = vmax.f32 %v2919_v24, 0.0 }
 0x2c8   :  { %v3828_v60 = vpack.c.bf16 %v2984_v14, %v2983_v58 }
 0x2ca   :  { %3971 = vst [vmem:[%s5906_s5 + $0x58] sm:$0xff] %v3828_v60   ;;  %v4350_v18 = vpop.f32.mrb[88].mxu1 }
 0x2cb   :  { %v2922_v61 = vadd.f32 %v4350_v18, %v5729_v36  ;;  %v2691_v1 = vpop.f32.mrb[89].mxu1 }
 0x2cc   :  { %v2921_v23 = vadd.f32 %v5729_v36, %v2691_v1 }
 0x2cd   :  { %v2986_v29 = vmax.f32 %v2922_v61, 0.0 }
 0x2ce   :  { %v2985_v30 = vmax.f32 %v2921_v23, 0.0 }
 0x2d0   :  { %v3833_v2 = vpack.c.bf16 %v2986_v29, %v2985_v30 }
 0x2d2   :  { %3972 = vst [vmem:[%s5906_s5 + $0x60] sm:$0xff] %v3833_v2   ;;  %v4353_v28 = vpop.f32.mrb[90].mxu1 }
 0x2d3   :  { %v2924_v3 = vadd.f32 %v4353_v28, %v5729_v36  ;;  %v2701_v37 = vpop.f32.mrb[91].mxu1 }
 0x2d4   :  { %v2923_v32 = vadd.f32 %v5729_v36, %v2701_v37 }
 0x2d5   :  { %v2988_v43 = vmax.f32 %v2924_v3, 0.0 }
 0x2d6   :  { %v2987_v6 = vmax.f32 %v2923_v32, 0.0 }
 0x2d8   :  { %v3838_v7 = vpack.c.bf16 %v2988_v43, %v2987_v6 }
 0x2da   :  { %3973 = vst [vmem:[%s5906_s5 + $0x68] sm:$0xff] %v3838_v7   ;;  %v4356_v35 = vpop.f32.mrb[92].mxu1 }
 0x2db   :  { %v2926_v51 = vadd.f32 %v4356_v35, %v5729_v36  ;;  %v2711_v8 = vpop.f32.mrb[93].mxu1 }
 0x2dc   :  { %v2925_v11 = vadd.f32 %v5729_v36, %v2711_v8 }
 0x2dd   :  { %v2990_v45 = vmax.f32 %v2926_v51, 0.0 }
 0x2de   :  { %v2989_v57 = vmax.f32 %v2925_v11, 0.0 }
 0x2e0   :  { %v3843_v38 = vpack.c.bf16 %v2990_v45, %v2989_v57 }
 0x2e2   :  { %3974 = vst [vmem:[%s5906_s5 + $0x70] sm:$0xff] %v3843_v38   ;;  %v4359_v52 = vpop.f32.mrb[94].mxu1 }
 0x2e3   :  { %v2928_v12 = vadd.f32 %v4359_v52, %v5729_v36  ;;  %v2721_v13 = vpop.f32.mrb[95].mxu1 }
 0x2e4   :  { %v2927_v41 = vadd.f32 %v5729_v36, %v2721_v13 }
 0x2e5   :  { %v2992_v0 = vmax.f32 %v2928_v12, 0.0 }
 0x2e6   :  { %v2991_v16 = vmax.f32 %v2927_v41, 0.0 }
 0x2e8   :  { %v3848_v44 = vpack.c.bf16 %v2992_v0, %v2991_v16 }
 0x2ea   :  { %3975 = vst [vmem:[%s5906_s5 + $0x78] sm:$0xff] %v3848_v44  }
 0x2ec   :  { %v4362_v17 = vpop.f32.mrb[96].mxu1 }
 0x2ed   :  { %v2930_v63 = vadd.f32 %v4362_v17, %v5729_v36  ;;  %v2731_v20 = vpop.f32.mrb[97].mxu1 }
 0x2ee   :  { %v2929_v47 = vadd.f32 %v5729_v36, %v2731_v20 }
 0x2ef   :  { %v2994_v21 = vmax.f32 %v2930_v63, 0.0 }
 0x2f0   :  { %v2993_v5 = vmax.f32 %v2929_v47, 0.0 }
 0x2f2   :  { %v3853_v22 = vpack.c.bf16 %v2994_v21, %v2993_v5 }
 0x2f4   :  { %3976 = vst [vmem:[%s5906_s5 + $0x80] sm:$0xff] %v3853_v22   ;;  %v4365_v50 = vpop.f32.mrb[98].mxu1 }
 0x2f5   :  { %v2932_v25 = vadd.f32 %v4365_v50, %v5729_v36  ;;  %v2741_v26 = vpop.f32.mrb[99].mxu1 }
 0x2f6   :  { %v2931_v53 = vadd.f32 %v5729_v36, %v2741_v26 }
 0x2f7   :  { %v2996_v27 = vmax.f32 %v2932_v25, 0.0 }
 0x2f8   :  { %v2995_v31 = vmax.f32 %v2931_v53, 0.0 }
 0x2fa   :  { %v3858_v56 = vpack.c.bf16 %v2996_v27, %v2995_v31 }
 0x2fc   :  { %3977 = vst [vmem:[%s5906_s5 + $0x88] sm:$0xff] %v3858_v56   ;;  %v4368_v10 = vpop.f32.mrb[100].mxu1 }
 0x2fd   :  { %v2934_v33 = vadd.f32 %v4368_v10, %v5729_v36  ;;  %v2751_v34 = vpop.f32.mrb[101].mxu1 }
 0x2fe   :  { %v2933_v59 = vadd.f32 %v5729_v36, %v2751_v34 }
 0x2ff   :  { %v2998_v15 = vmax.f32 %v2934_v33, 0.0 }
 0x300   :  { %v2997_v39 = vmax.f32 %v2933_v59, 0.0 }
 0x302   :  { %v3863_v40 = vpack.c.bf16 %v2998_v15, %v2997_v39 }
 0x304   :  { %3978 = vst [vmem:[%s5906_s5 + $0x90] sm:$0xff] %v3863_v40   ;;  %v4371_v62 = vpop.f32.mrb[102].mxu1 }
 0x305   :  { %v2936_v42 = vadd.f32 %v4371_v62, %v5729_v36  ;;  %v2761_v46 = vpop.f32.mrb[103].mxu1 }
 0x306   :  { %v2935_v4 = vadd.f32 %v5729_v36, %v2761_v46 }
 0x307   :  { %v3000_v48 = vmax.f32 %v2936_v42, 0.0 }
 0x308   :  { %v2999_v49 = vmax.f32 %v2935_v4, 0.0 }
 0x30a   :  { %v3868_v19 = vpack.c.bf16 %v3000_v48, %v2999_v49 }
 0x30c   :  { %3979 = vst [vmem:[%s5906_s5 + $0x98] sm:$0xff] %v3868_v19   ;;  %v4374_v9 = vpop.f32.mrb[104].mxu1 }
 0x30d   :  { %v2938_v54 = vadd.f32 %v4374_v9, %v5729_v36  ;;  %v2771_v55 = vpop.f32.mrb[105].mxu1 }
 0x30e   :  { %v2937_v24 = vadd.f32 %v5729_v36, %v2771_v55 }
 0x30f   :  { %v3002_v14 = vmax.f32 %v2938_v54, 0.0 }
 0x310   :  { %v3001_v58 = vmax.f32 %v2937_v24, 0.0 }
 0x312   :  { %v3873_v60 = vpack.c.bf16 %v3002_v14, %v3001_v58 }
 0x314   :  { %3980 = vst [vmem:[%s5906_s5 + $0xa0] sm:$0xff] %v3873_v60   ;;  %v4377_v18 = vpop.f32.mrb[106].mxu1 }
 0x315   :  { %v2940_v61 = vadd.f32 %v4377_v18, %v5729_v36  ;;  %v2781_v1 = vpop.f32.mrb[107].mxu1 }
 0x316   :  { %v2939_v23 = vadd.f32 %v5729_v36, %v2781_v1 }
 0x317   :  { %v3004_v29 = vmax.f32 %v2940_v61, 0.0 }
 0x318   :  { %v3003_v30 = vmax.f32 %v2939_v23, 0.0 }
 0x31a   :  { %v3878_v2 = vpack.c.bf16 %v3004_v29, %v3003_v30 }
 0x31c   :  { %3981 = vst [vmem:[%s5906_s5 + $0xa8] sm:$0xff] %v3878_v2   ;;  %v4380_v28 = vpop.f32.mrb[108].mxu1 }
 0x31d   :  { %v2942_v3 = vadd.f32 %v4380_v28, %v5729_v36  ;;  %v2791_v37 = vpop.f32.mrb[109].mxu1 }
 0x31e   :  { %v2941_v32 = vadd.f32 %v5729_v36, %v2791_v37 }
 0x31f   :  { %v3006_v43 = vmax.f32 %v2942_v3, 0.0 }
 0x320   :  { %v3005_v6 = vmax.f32 %v2941_v32, 0.0 }
 0x322   :  { %v3883_v7 = vpack.c.bf16 %v3006_v43, %v3005_v6 }
 0x324   :  { %3982 = vst [vmem:[%s5906_s5 + $0xb0] sm:$0xff] %v3883_v7   ;;  %v4383_v35 = vpop.f32.mrb[110].mxu1 }
 0x325   :  { %v2944_v51 = vadd.f32 %v4383_v35, %v5729_v36  ;;  %v2801_v8 = vpop.f32.mrb[111].mxu1 }
 0x326   :  { %v2943_v11 = vadd.f32 %v5729_v36, %v2801_v8 }
 0x327   :  { %v3008_v45 = vmax.f32 %v2944_v51, 0.0 }
 0x328   :  { %v3007_v57 = vmax.f32 %v2943_v11, 0.0 }
 0x32a   :  { %v3888_v38 = vpack.c.bf16 %v3008_v45, %v3007_v57 }
 0x32c   :  { %3983 = vst [vmem:[%s5906_s5 + $0xb8] sm:$0xff] %v3888_v38   ;;  %v4386_v52 = vpop.f32.mrb[112].mxu1 }
 0x32d   :  { %v2946_v12 = vadd.f32 %v4386_v52, %v5729_v36  ;;  %v2811_v13 = vpop.f32.mrb[113].mxu1 }
 0x32e   :  { %v2945_v41 = vadd.f32 %v5729_v36, %v2811_v13 }
 0x32f   :  { %v3010_v0 = vmax.f32 %v2946_v12, 0.0 }
 0x330   :  { %v3009_v16 = vmax.f32 %v2945_v41, 0.0 }
 0x332   :  { %v3893_v44 = vpack.c.bf16 %v3010_v0, %v3009_v16 }
 0x334   :  { %3984 = vst [vmem:[%s5906_s5 + $0xc0] sm:$0xff] %v3893_v44   ;;  %v4389_v17 = vpop.f32.mrb[114].mxu1 }
 0x335   :  { %v2948_v63 = vadd.f32 %v4389_v17, %v5729_v36  ;;  %v2821_v20 = vpop.f32.mrb[115].mxu1 }
 0x336   :  { %v2947_v47 = vadd.f32 %v5729_v36, %v2821_v20 }
 0x337   :  { %v3012_v21 = vmax.f32 %v2948_v63, 0.0 }
 0x338   :  { %v3011_v5 = vmax.f32 %v2947_v47, 0.0 }
 0x33a   :  { %v3898_v22 = vpack.c.bf16 %v3012_v21, %v3011_v5 }
 0x33c   :  { %3985 = vst [vmem:[%s5906_s5 + $0xc8] sm:$0xff] %v3898_v22   ;;  %v4392_v50 = vpop.f32.mrb[116].mxu1 }
 0x33d   :  { %v2950_v25 = vadd.f32 %v4392_v50, %v5729_v36  ;;  %v2831_v26 = vpop.f32.mrb[117].mxu1 }
 0x33e   :  { %v2949_v53 = vadd.f32 %v5729_v36, %v2831_v26 }
 0x33f   :  { %v3014_v27 = vmax.f32 %v2950_v25, 0.0 }
 0x340   :  { %v3013_v31 = vmax.f32 %v2949_v53, 0.0 }
 0x342   :  { %v3903_v56 = vpack.c.bf16 %v3014_v27, %v3013_v31 }
 0x344   :  { %3986 = vst [vmem:[%s5906_s5 + $0xd0] sm:$0xff] %v3903_v56   ;;  %v4395_v10 = vpop.f32.mrb[118].mxu1 }
 0x345   :  { %v2952_v33 = vadd.f32 %v4395_v10, %v5729_v36  ;;  %v2841_v34 = vpop.f32.mrb[119].mxu1 }
 0x346   :  { %v2951_v59 = vadd.f32 %v5729_v36, %v2841_v34 }
 0x347   :  { %v3016_v15 = vmax.f32 %v2952_v33, 0.0 }
 0x348   :  { %v3015_v39 = vmax.f32 %v2951_v59, 0.0 }
 0x34a   :  { %v3908_v40 = vpack.c.bf16 %v3016_v15, %v3015_v39 }
 0x34c   :  { %3987 = vst [vmem:[%s5906_s5 + $0xd8] sm:$0xff] %v3908_v40   ;;  %v4398_v62 = vpop.f32.mrb[120].mxu1 }
 0x34d   :  { %v2954_v42 = vadd.f32 %v4398_v62, %v5729_v36  ;;  %v2851_v46 = vpop.f32.mrb[121].mxu1 }
 0x34e   :  { %v2953_v4 = vadd.f32 %v5729_v36, %v2851_v46 }
 0x34f   :  { %v3018_v48 = vmax.f32 %v2954_v42, 0.0 }
 0x350   :  { %v3017_v49 = vmax.f32 %v2953_v4, 0.0 }
 0x352   :  { %v3913_v19 = vpack.c.bf16 %v3018_v48, %v3017_v49 }
 0x354   :  { %3988 = vst [vmem:[%s5906_s5 + $0xe0] sm:$0xff] %v3913_v19   ;;  %v4401_v9 = vpop.f32.mrb[122].mxu1 }
 0x355   :  { %v2956_v54 = vadd.f32 %v4401_v9, %v5729_v36  ;;  %v2861_v55 = vpop.f32.mrb[123].mxu1 }
 0x356   :  { %v2955_v24 = vadd.f32 %v5729_v36, %v2861_v55 }
 0x357   :  { %v3020_v14 = vmax.f32 %v2956_v54, 0.0 }
 0x358   :  { %v3019_v58 = vmax.f32 %v2955_v24, 0.0 }
 0x35a   :  { %v3918_v60 = vpack.c.bf16 %v3020_v14, %v3019_v58 }
 0x35c   :  { %3989 = vst [vmem:[%s5906_s5 + $0xe8] sm:$0xff] %v3918_v60   ;;  %v4404_v18 = vpop.f32.mrb[124].mxu1 }
 0x35d   :  { %v2958_v61 = vadd.f32 %v4404_v18, %v5729_v36  ;;  %v2871_v1 = vpop.f32.mrb[125].mxu1 }
 0x35e   :  { %v2957_v23 = vadd.f32 %v5729_v36, %v2871_v1 }
 0x35f   :  { %v3022_v29 = vmax.f32 %v2958_v61, 0.0 }
 0x360   :  { %v3021_v30 = vmax.f32 %v2957_v23, 0.0 }
 0x362   :  { %v3923_v2 = vpack.c.bf16 %v3022_v29, %v3021_v30 }
 0x364   :  { %3990 = vst [vmem:[%s5906_s5 + $0xf0] sm:$0xff] %v3923_v2   ;;  %v4407_v28 = vpop.f32.mrb[126].mxu1 }
 0x365   :  { %v2960_v3 = vadd.f32 %v4407_v28, %v5729_v36  ;;  %v2881_v37 = vpop.f32.mrb[127].mxu1 }
 0x366   :  { %v2959_v32 = vadd.f32 %v5729_v36, %v2881_v37 }
 0x367   :  { %v3024_v43 = vmax.f32 %v2960_v3, 0.0 }
 0x368   :  { %v3023_v6 = vmax.f32 %v2959_v32, 0.0 }
 0x36a   :  { %v3928_v7 = vpack.c.bf16 %v3024_v43, %v3023_v6 }
 0x36c   :  { %3991 = vst [vmem:[%s5906_s5 + $0xf8] sm:$0xff] %v3928_v7  }

</bundles_post_ra>
